<compile_context>
chip_gen: v5e
topology: v5e:2x2
jax: 0.10.0
libtpu: 0.0.40
codegen_flags: <defaults>
</compile_context>

<pallas_src>
import functools
import math

import jax
import jax.numpy as jnp
from jax.experimental import pallas as pl
from jax.experimental.pallas import tpu as pltpu


# --------------------------------------------------------------------------- #
# helpers
# --------------------------------------------------------------------------- #
def _round_up(x, m):
    return (x + m - 1) // m * m


# --------------------------------------------------------------------------- #
# fused transformer-layer kernel (whole encoder in one pallas_call)
# --------------------------------------------------------------------------- #
def _make_layer_kernel(*, seq_valid, seq_pad, embed_dim, num_heads, eps):
    dh = embed_dim // num_heads
    scale = 1.0 / math.sqrt(dh)

    def layer_norm(x, g, b):
        mean = jnp.mean(x, axis=-1, keepdims=True)
        xc = x - mean
        var = jnp.mean(xc * xc, axis=-1, keepdims=True)
        return xc * jax.lax.rsqrt(var + eps) * g + b

    def kernel(x_ref,
               ln1_g_ref, ln1_b_ref, w_qkv_ref, b_qkv_ref,
               w_o_ref, b_o_ref,
               ln2_g_ref, ln2_b_ref, w_fc1_ref, b_fc1_ref,
               w_fc2_ref, b_fc2_ref,
               o_ref,
               h_ref, attn_ref):
        layer = pl.program_id(1)

        # load the residual stream into VMEM once per batch (layer == 0)
        @pl.when(layer == 0)
        def _():
            h_ref[...] = x_ref[...]

        h = h_ref[...]                                          # (S_pad, E) f32

        # ---------------- attention block (pre-LN) ---------------- #
        ln1 = layer_norm(h, ln1_g_ref[...], ln1_b_ref[...]).astype(jnp.bfloat16)
        # fused QKV projection: one lane-dense (S_pad, 3E) matmul, K fits in
        # one tile -> no accumulator scratch needed.
        qkv = jnp.dot(ln1, w_qkv_ref[...],
                      preferred_element_type=jnp.float32) + b_qkv_ref[...]

        # mask padded key positions (tokens seq_valid..seq_pad-1)
        kcol = jax.lax.broadcasted_iota(jnp.int32, (seq_pad, seq_pad), 1)
        kmask = kcol < seq_valid

        for hd in range(num_heads):                 # static loop, unrolled
            q = qkv[:, hd * dh:(hd + 1) * dh].astype(jnp.bfloat16)
            k = qkv[:, embed_dim + hd * dh:
                       embed_dim + (hd + 1) * dh].astype(jnp.bfloat16)
            v = qkv[:, 2 * embed_dim + hd * dh:
                       2 * embed_dim + (hd + 1) * dh].astype(jnp.bfloat16)
            s = jax.lax.dot_general(q, k, (((1,), (1,)), ((), ())),
                                    preferred_element_type=jnp.float32) * scale
            s = jnp.where(kmask, s, -1e30)
            m = jnp.max(s, axis=-1, keepdims=True)
            p = jnp.exp(s - m)
            denom = jnp.sum(p, axis=-1, keepdims=True)
            o = jnp.dot(p.astype(jnp.bfloat16), v,
                        preferred_element_type=jnp.float32)
            o = o * pl.reciprocal(denom, approx=True)           # divide on EUP
            attn_ref[:, hd * dh:(hd + 1) * dh] = o.astype(jnp.bfloat16)

        # output projection + residual, all in VMEM
        h = jnp.dot(attn_ref[...], w_o_ref[...],
                    preferred_element_type=jnp.float32) + b_o_ref[...] + h

        # ---------------- MLP block (pre-LN) ---------------- #
        ln2 = layer_norm(h, ln2_g_ref[...], ln2_b_ref[...]).astype(jnp.bfloat16)
        inter = jnp.dot(ln2, w_fc1_ref[...],
                        preferred_element_type=jnp.float32) + b_fc1_ref[...]
        # TODO(synk): HF ViT uses exact (erf) GELU; tanh approximation is used
        #             here for a guaranteed Mosaic lowering.
        inter = jax.nn.gelu(inter, approximate=True).astype(jnp.bfloat16)
        h = jnp.dot(inter, w_fc2_ref[...],
                    preferred_element_type=jnp.float32) + b_fc2_ref[...] + h

        h_ref[...] = h                                          # carry residual

        @pl.when(layer == pl.num_programs(1) - 1)
        def _():
            o_ref[...] = h.astype(o_ref.dtype)

    return kernel


def vit_encoder_layers(h, stacked, *, num_heads, seq_valid, eps=1e-12):
    """h: (B, S_pad, E) f32 residual stream; stacked: layer-stacked params."""
    B, S_pad, E = h.shape
    L = stacked["w_qkv"].shape[0]
    F = stacked["w_fc1"].shape[-1]

    kernel = _make_layer_kernel(seq_valid=seq_valid, seq_pad=S_pad,
                                embed_dim=E, num_heads=num_heads, eps=eps)

    def wspec(d0, d1):
        # per-layer weight/bias block, indexed by the layer grid axis only
        return pl.BlockSpec((None, d0, d1), lambda b, l: (l, 0, 0))

    x_spec = pl.BlockSpec((None, S_pad, E), lambda b, l: (b, 0, 0))

    return pl.pallas_call(
        kernel,
        out_shape=jax.ShapeDtypeStruct((B, S_pad, E), jnp.float32),
        grid_spec=pltpu.PrefetchScalarGridSpec(
            num_scalar_prefetch=0,
            grid=(B, L),                       # batch parallel, layers sequential
            in_specs=[
                x_spec,
                wspec(1, E), wspec(1, E),          # ln1 gamma / beta
                wspec(E, 3 * E), wspec(1, 3 * E),  # fused QKV
                wspec(E, E), wspec(1, E),          # attention out-proj
                wspec(1, E), wspec(1, E),          # ln2 gamma / beta
                wspec(E, F), wspec(1, F),          # fc1
                wspec(F, E), wspec(1, E),          # fc2
            ],
            out_specs=x_spec,
            scratch_shapes=[
                pltpu.VMEM((S_pad, E), jnp.float32),    # residual stream
                pltpu.VMEM((S_pad, E), jnp.bfloat16),   # lane-dense attn output
            ],
        ),
        compiler_params=pltpu.CompilerParams(
            dimension_semantics=("parallel", "arbitrary"),
            # per-step working set (<~5 MiB incl. double-buffered bf16 weights)
            # — explicit limit keeps headroom on all of v5e/v6e/v7x.
            vmem_limit_bytes=32 * 1024 * 1024,
        ),
    )(h,
      stacked["ln1_g"], stacked["ln1_b"],
      stacked["w_qkv"], stacked["b_qkv"],
      stacked["w_o"], stacked["b_o"],
      stacked["ln2_g"], stacked["ln2_b"],
      stacked["w_fc1"], stacked["b_fc1"],
      stacked["w_fc2"], stacked["b_fc2"])


# --------------------------------------------------------------------------- #
# full module forward
# --------------------------------------------------------------------------- #
def vit_stitching_encoder_forward(x, params, *, num_heads):
    """x: (B, 25, E) — same input layout as the PyTorch module."""
    B, S, E = x.shape
    Sq = S + 1                                   # + CLS token
    S_pad = _round_up(Sq, 32)                    # 26 -> 32: clean bf16 tiling

    # CLS token + position embeddings + one-time token padding (trivial glue)
    cls = jnp.broadcast_to(params["cls_token"].astype(jnp.float32), (B, 1, E))
    h = jnp.concatenate([cls, x.astype(jnp.float32)], axis=1)
    h = h + params["pos_emb"].astype(jnp.float32)
    h = jnp.pad(h, ((0, 0), (0, S_pad - Sq), (0, 0)))

    out = vit_encoder_layers(h, params["stacked"],
                             num_heads=num_heads, seq_valid=Sq)

    # encoder-only module: no final LayerNorm; drop CLS token and row padding
    return out[:, 1:Sq, :]


def init_params(key, embed_dim, num_heads, mlp_dim, num_layers, seq_len=25):
    D, F, L = embed_dim, mlp_dim, num_layers
    key, k1, k2, kq, ko, ki, kf = jax.random.split(key, 7)
    params = {
        "cls_token": jax.random.normal(k1, (1, 1, D), jnp.float32),
        "pos_emb": jax.random.normal(k2, (1, seq_len + 1, D), jnp.float32),
    }
    # Layer-stacked params; matmul weights pre-cast to bf16 ONCE (native MXU
    # input dtype -> no per-forward casts and ~half the weight HBM traffic).
    params["stacked"] = {
        "ln1_g": jnp.ones((L, 1, D), jnp.float32),
        "ln1_b": jnp.zeros((L, 1, D), jnp.float32),
        "ln2_g": jnp.ones((L, 1, D), jnp.float32),
        "ln2_b": jnp.zeros((L, 1, D), jnp.float32),
        "w_qkv": (jax.random.normal(kq, (L, D, 3 * D), jnp.float32)
                  / math.sqrt(D)).astype(jnp.bfloat16),
        "b_qkv": jnp.zeros((L, 1, 3 * D), jnp.float32),
        "w_o": (jax.random.normal(ko, (L, D, D), jnp.float32)
                / math.sqrt(D)).astype(jnp.bfloat16),
        "b_o": jnp.zeros((L, 1, D), jnp.float32),
        "w_fc1": (jax.random.normal(ki, (L, D, F), jnp.float32)
                  / math.sqrt(D)).astype(jnp.bfloat16),
        "b_fc1": jnp.zeros((L, 1, F), jnp.float32),
        "w_fc2": (jax.random.normal(kf, (L, F, D), jnp.float32)
                  / math.sqrt(F)).astype(jnp.bfloat16),
        "b_fc2": jnp.zeros((L, 1, D), jnp.float32),
    }
    return params


if __name__ == "__main__":
    key = jax.random.PRNGKey(0)
    kx, kp = jax.random.split(key)

    # small-but-representative shapes: seq=25 is fixed by the module
    # (position_embeddings has 26 rows); ViT-base scaled down, head_dim=64.
    batch, seq, embed_dim = 2, 25, 256
    num_heads, mlp_dim, num_layers = 4, 1024, 2

    x = jax.random.normal(kx, (batch, seq, embed_dim), jnp.float32)
    params = init_params(kp, embed_dim, num_heads, mlp_dim, num_layers,
                         seq_len=seq)

    fwd = jax.jit(functools.partial(vit_stitching_encoder_forward,
                                    num_heads=num_heads))
    out = jax.block_until_ready(fwd(x, params))

    assert out.shape == (batch, seq, embed_dim), out.shape
    assert bool(jnp.all(jnp.isfinite(out)))
    print("KERNEL_OK")
</pallas_src>

<mosaic_0001>
module attributes {stable_mosaic.version = 11 : i64} {
  func.func @kernel(%arg0: i32, %arg1: i32, %arg2: memref<1x32x256xf32, #tpu.memory_space<vmem>>, %arg3: memref<1x1x256xf32, #tpu.memory_space<vmem>>, %arg4: memref<1x1x256xf32, #tpu.memory_space<vmem>>, %arg5: memref<1x256x768xbf16, #tpu.memory_space<vmem>>, %arg6: memref<1x1x768xf32, #tpu.memory_space<vmem>>, %arg7: memref<1x256x256xbf16, #tpu.memory_space<vmem>>, %arg8: memref<1x1x256xf32, #tpu.memory_space<vmem>>, %arg9: memref<1x1x256xf32, #tpu.memory_space<vmem>>, %arg10: memref<1x1x256xf32, #tpu.memory_space<vmem>>, %arg11: memref<1x256x1024xbf16, #tpu.memory_space<vmem>>, %arg12: memref<1x1x1024xf32, #tpu.memory_space<vmem>>, %arg13: memref<1x1024x256xbf16, #tpu.memory_space<vmem>>, %arg14: memref<1x1x256xf32, #tpu.memory_space<vmem>>, %arg15: memref<1x32x256xf32, #tpu.memory_space<vmem>>, %arg16: memref<32x256xf32, #tpu.memory_space<vmem>>, %arg17: memref<32x256xbf16, #tpu.memory_space<vmem>>) attributes {dimension_semantics = [#tpu.dimension_semantics<parallel>, #tpu.dimension_semantics<arbitrary>], iteration_bounds = array<i64: 2, 2>, scalar_prefetch = 0 : i64, scratch_operands = 2 : i64, tpu.core_type = #tpu.core_type<tc>, window_params = [{transform_indices = @transform_0, window_bounds = array<i64: 1, 32, 256>}, {transform_indices = @transform_1, window_bounds = array<i64: 1, 1, 256>}, {transform_indices = @transform_2, window_bounds = array<i64: 1, 1, 256>}, {transform_indices = @transform_3, window_bounds = array<i64: 1, 256, 768>}, {transform_indices = @transform_4, window_bounds = array<i64: 1, 1, 768>}, {transform_indices = @transform_5, window_bounds = array<i64: 1, 256, 256>}, {transform_indices = @transform_6, window_bounds = array<i64: 1, 1, 256>}, {transform_indices = @transform_7, window_bounds = array<i64: 1, 1, 256>}, {transform_indices = @transform_8, window_bounds = array<i64: 1, 1, 256>}, {transform_indices = @transform_9, window_bounds = array<i64: 1, 256, 1024>}, {transform_indices = @transform_10, window_bounds = array<i64: 1, 1, 1024>}, {transform_indices = @transform_11, window_bounds = array<i64: 1, 1024, 256>}, {transform_indices = @transform_12, window_bounds = array<i64: 1, 1, 256>}, {transform_indices = @transform_13, window_bounds = array<i64: 1, 32, 256>}]} {
    %c0_i32 = arith.constant 0 : i32
    %0 = arith.cmpi eq, %arg1, %c0_i32 : i32
    %1 = arith.extui %0 : i1 to i32
    %c0_i32_0 = arith.constant 0 : i32
    %2 = arith.cmpi ne, %1, %c0_i32_0 : i32
    scf.if %2 {
      %c0_89 = arith.constant 0 : index
      %c0_90 = arith.constant 0 : index
      %c0_91 = arith.constant 0 : index
      %206 = vector.load %arg2[%c0_89, %c0_90, %c0_91] : memref<1x32x256xf32, #tpu.memory_space<vmem>>, vector<1x32x256xf32>
      %207 = vector.shape_cast %206 : vector<1x32x256xf32> to vector<32x256xf32>
      %c0_92 = arith.constant 0 : index
      %c0_93 = arith.constant 0 : index
      %208 = vector.load %arg16[%c0_92, %c0_93] : memref<32x256xf32, #tpu.memory_space<vmem>>, vector<32x256xf32>
      tpu.vector_store %arg16[%c0_92, %c0_93], %207 {strides = array<i32>} : memref<32x256xf32, #tpu.memory_space<vmem>>, vector<32x256xf32>,
    } else {
    }
    %c0 = arith.constant 0 : index
    %c0_1 = arith.constant 0 : index
    %3 = vector.load %arg16[%c0, %c0_1] : memref<32x256xf32, #tpu.memory_space<vmem>>, vector<32x256xf32>
    %c0_2 = arith.constant 0 : index
    %c0_3 = arith.constant 0 : index
    %c0_4 = arith.constant 0 : index
    %4 = vector.load %arg3[%c0_2, %c0_3, %c0_4] : memref<1x1x256xf32, #tpu.memory_space<vmem>>, vector<1x1x256xf32>
    %5 = vector.shape_cast %4 : vector<1x1x256xf32> to vector<1x256xf32>
    %c0_5 = arith.constant 0 : index
    %c0_6 = arith.constant 0 : index
    %c0_7 = arith.constant 0 : index
    %6 = vector.load %arg4[%c0_5, %c0_6, %c0_7] : memref<1x1x256xf32, #tpu.memory_space<vmem>>, vector<1x1x256xf32>
    %7 = vector.shape_cast %6 : vector<1x1x256xf32> to vector<1x256xf32>
    %cst = arith.constant dense<0.000000e+00> : vector<32xf32>
    %8 = vector.multi_reduction <add>, %3, %cst [1] : vector<32x256xf32> to vector<32xf32>
    %9 = vector.shape_cast %8 : vector<32xf32> to vector<32x1xf32>
    %cst_8 = arith.constant 2.560000e+02 : f32
    %10 = vector.broadcast %cst_8 : f32 to vector<32x1xf32>
    %11 = arith.divf %9, %10 : vector<32x1xf32>
    %12 = vector.broadcast %11 : vector<32x1xf32> to vector<32x256xf32>
    %13 = arith.subf %3, %12 : vector<32x256xf32>
    %14 = arith.mulf %13, %13 : vector<32x256xf32>
    %cst_9 = arith.constant dense<0.000000e+00> : vector<32xf32>
    %15 = vector.multi_reduction <add>, %14, %cst_9 [1] : vector<32x256xf32> to vector<32xf32>
    %16 = vector.shape_cast %15 : vector<32xf32> to vector<32x1xf32>
    %cst_10 = arith.constant 2.560000e+02 : f32
    %17 = vector.broadcast %cst_10 : f32 to vector<32x1xf32>
    %18 = arith.divf %16, %17 : vector<32x1xf32>
    %cst_11 = arith.constant 9.99999996E-13 : f32
    %19 = vector.broadcast %cst_11 : f32 to vector<32x1xf32>
    %20 = arith.addf %18, %19 : vector<32x1xf32>
    %21 = math.rsqrt %20 : vector<32x1xf32>
    %22 = vector.broadcast %21 : vector<32x1xf32> to vector<32x256xf32>
    %23 = arith.mulf %13, %22 : vector<32x256xf32>
    %24 = vector.broadcast %5 : vector<1x256xf32> to vector<32x256xf32>
    %25 = arith.mulf %23, %24 : vector<32x256xf32>
    %26 = vector.broadcast %7 : vector<1x256xf32> to vector<32x256xf32>
    %27 = arith.addf %25, %26 : vector<32x256xf32>
    %28 = arith.truncf %27 : vector<32x256xf32> to vector<32x256xbf16>
    %c0_12 = arith.constant 0 : index
    %c0_13 = arith.constant 0 : index
    %c0_14 = arith.constant 0 : index
    %29 = vector.load %arg5[%c0_12, %c0_13, %c0_14] : memref<1x256x768xbf16, #tpu.memory_space<vmem>>, vector<1x256x768xbf16>
    %30 = vector.shape_cast %29 : vector<1x256x768xbf16> to vector<256x768xbf16>
    %cst_15 = arith.constant dense<0.000000e+00> : vector<32x768xf32>
    %31 = tpu.matmul %28, %30, %cst_15 {dimension_numbers = #tpu.dot_dimension_numbers<[1], [0], [0], [1], [0, 0, 1, 1], [], []>} : vector<32x256xbf16>, vector<256x768xbf16>, vector<32x768xf32> -> vector<32x768xf32>
    %c0_16 = arith.constant 0 : index
    %c0_17 = arith.constant 0 : index
    %c0_18 = arith.constant 0 : index
    %32 = vector.load %arg6[%c0_16, %c0_17, %c0_18] : memref<1x1x768xf32, #tpu.memory_space<vmem>>, vector<1x1x768xf32>
    %33 = vector.shape_cast %32 : vector<1x1x768xf32> to vector<1x768xf32>
    %34 = vector.broadcast %33 : vector<1x768xf32> to vector<32x768xf32>
    %35 = arith.addf %31, %34 : vector<32x768xf32>
    %36 = tpu.iota {dimensions = array<i32: 1>} : vector<32x32xi32>
    %c26_i32 = arith.constant 26 : i32
    %37 = vector.broadcast %c26_i32 : i32 to vector<32x32xi32>
    %38 = arith.cmpi slt, %36, %37 : vector<32x32xi32>
    %39 = vector.extract_strided_slice %35 {offsets = [0, 0], sizes = [32, 64], strides = [1, 1]} : vector<32x768xf32> to vector<32x64xf32>
    %40 = arith.truncf %39 : vector<32x64xf32> to vector<32x64xbf16>
    %41 = vector.extract_strided_slice %35 {offsets = [0, 256], sizes = [32, 64], strides = [1, 1]} : vector<32x768xf32> to vector<32x64xf32>
    %42 = arith.truncf %41 : vector<32x64xf32> to vector<32x64xbf16>
    %43 = vector.extract_strided_slice %35 {offsets = [0, 512], sizes = [32, 64], strides = [1, 1]} : vector<32x768xf32> to vector<32x64xf32>
    %44 = arith.truncf %43 : vector<32x64xf32> to vector<32x64xbf16>
    %cst_19 = arith.constant dense<0.000000e+00> : vector<32x32xf32>
    %45 = tpu.matmul %40, %42, %cst_19 {dimension_numbers = #tpu.dot_dimension_numbers<[1], [1], [0], [0], [0, 0, 1, 0], [], []>} : vector<32x64xbf16>, vector<32x64xbf16>, vector<32x32xf32> -> vector<32x32xf32>
    %cst_20 = arith.constant 1.250000e-01 : f32
    %46 = vector.broadcast %cst_20 : f32 to vector<32x32xf32>
    %47 = arith.mulf %45, %46 : vector<32x32xf32>
    %cst_21 = arith.constant -1.000000e+30 : f32
    %48 = vector.broadcast %cst_21 : f32 to vector<32x32xf32>
    %49 = arith.select %38, %47, %48 : vector<32x32xi1>, vector<32x32xf32>
    %cst_22 = arith.constant dense<0xFF800000> : vector<32xf32>
    %50 = vector.multi_reduction <maximumf>, %49, %cst_22 [1] : vector<32x32xf32> to vector<32xf32>
    %51 = vector.shape_cast %50 : vector<32xf32> to vector<32x1xf32>
    %52 = vector.broadcast %51 : vector<32x1xf32> to vector<32x32xf32>
    %53 = arith.subf %49, %52 : vector<32x32xf32>
    %54 = math.exp %53 : vector<32x32xf32>
    %cst_23 = arith.constant dense<0.000000e+00> : vector<32xf32>
    %55 = vector.multi_reduction <add>, %54, %cst_23 [1] : vector<32x32xf32> to vector<32xf32>
    %56 = vector.shape_cast %55 : vector<32xf32> to vector<32x1xf32>
    %57 = arith.truncf %54 : vector<32x32xf32> to vector<32x32xbf16>
    %cst_24 = arith.constant dense<0.000000e+00> : vector<32x64xf32>
    %58 = tpu.matmul %57, %44, %cst_24 {dimension_numbers = #tpu.dot_dimension_numbers<[1], [0], [0], [1], [0, 0, 1, 1], [], []>} : vector<32x32xbf16>, vector<32x64xbf16>, vector<32x64xf32> -> vector<32x64xf32>
    %59 = tpu.reciprocal %56 {approx = true} : vector<32x1xf32> -> vector<32x1xf32>
    %60 = vector.broadcast %59 : vector<32x1xf32> to vector<32x64xf32>
    %61 = arith.mulf %58, %60 : vector<32x64xf32>
    %62 = arith.truncf %61 : vector<32x64xf32> to vector<32x64xbf16>
    %c0_25 = arith.constant 0 : index
    %c0_26 = arith.constant 0 : index
    %63 = vector.load %arg17[%c0_25, %c0_26] : memref<32x256xbf16, #tpu.memory_space<vmem>>, vector<32x64xbf16>
    tpu.vector_store %arg17[%c0_25, %c0_26], %62 {strides = array<i32>} : memref<32x256xbf16, #tpu.memory_space<vmem>>, vector<32x64xbf16>,
    %64 = vector.extract_strided_slice %35 {offsets = [0, 64], sizes = [32, 64], strides = [1, 1]} : vector<32x768xf32> to vector<32x64xf32>
    %65 = arith.truncf %64 : vector<32x64xf32> to vector<32x64xbf16>
    %66 = vector.extract_strided_slice %35 {offsets = [0, 320], sizes = [32, 64], strides = [1, 1]} : vector<32x768xf32> to vector<32x64xf32>
    %67 = arith.truncf %66 : vector<32x64xf32> to vector<32x64xbf16>
    %68 = vector.extract_strided_slice %35 {offsets = [0, 576], sizes = [32, 64], strides = [1, 1]} : vector<32x768xf32> to vector<32x64xf32>
    %69 = arith.truncf %68 : vector<32x64xf32> to vector<32x64xbf16>
    %cst_27 = arith.constant dense<0.000000e+00> : vector<32x32xf32>
    %70 = tpu.matmul %65, %67, %cst_27 {dimension_numbers = #tpu.dot_dimension_numbers<[1], [1], [0], [0], [0, 0, 1, 0], [], []>} : vector<32x64xbf16>, vector<32x64xbf16>, vector<32x32xf32> -> vector<32x32xf32>
    %cst_28 = arith.constant 1.250000e-01 : f32
    %71 = vector.broadcast %cst_28 : f32 to vector<32x32xf32>
    %72 = arith.mulf %70, %71 : vector<32x32xf32>
    %cst_29 = arith.constant -1.000000e+30 : f32
    %73 = vector.broadcast %cst_29 : f32 to vector<32x32xf32>
    %74 = arith.select %38, %72, %73 : vector<32x32xi1>, vector<32x32xf32>
    %cst_30 = arith.constant dense<0xFF800000> : vector<32xf32>
    %75 = vector.multi_reduction <maximumf>, %74, %cst_30 [1] : vector<32x32xf32> to vector<32xf32>
    %76 = vector.shape_cast %75 : vector<32xf32> to vector<32x1xf32>
    %77 = vector.broadcast %76 : vector<32x1xf32> to vector<32x32xf32>
    %78 = arith.subf %74, %77 : vector<32x32xf32>
    %79 = math.exp %78 : vector<32x32xf32>
    %cst_31 = arith.constant dense<0.000000e+00> : vector<32xf32>
    %80 = vector.multi_reduction <add>, %79, %cst_31 [1] : vector<32x32xf32> to vector<32xf32>
    %81 = vector.shape_cast %80 : vector<32xf32> to vector<32x1xf32>
    %82 = arith.truncf %79 : vector<32x32xf32> to vector<32x32xbf16>
    %cst_32 = arith.constant dense<0.000000e+00> : vector<32x64xf32>
    %83 = tpu.matmul %82, %69, %cst_32 {dimension_numbers = #tpu.dot_dimension_numbers<[1], [0], [0], [1], [0, 0, 1, 1], [], []>} : vector<32x32xbf16>, vector<32x64xbf16>, vector<32x64xf32> -> vector<32x64xf32>
    %84 = tpu.reciprocal %81 {approx = true} : vector<32x1xf32> -> vector<32x1xf32>
    %85 = vector.broadcast %84 : vector<32x1xf32> to vector<32x64xf32>
    %86 = arith.mulf %83, %85 : vector<32x64xf32>
    %87 = arith.truncf %86 : vector<32x64xf32> to vector<32x64xbf16>
    %c0_33 = arith.constant 0 : index
    %c64 = arith.constant 64 : index
    %88 = vector.load %arg17[%c0_33, %c64] : memref<32x256xbf16, #tpu.memory_space<vmem>>, vector<32x64xbf16>
    tpu.vector_store %arg17[%c0_33, %c64], %87 {strides = array<i32>} : memref<32x256xbf16, #tpu.memory_space<vmem>>, vector<32x64xbf16>,
    %89 = vector.extract_strided_slice %35 {offsets = [0, 128], sizes = [32, 64], strides = [1, 1]} : vector<32x768xf32> to vector<32x64xf32>
    %90 = arith.truncf %89 : vector<32x64xf32> to vector<32x64xbf16>
    %91 = vector.extract_strided_slice %35 {offsets = [0, 384], sizes = [32, 64], strides = [1, 1]} : vector<32x768xf32> to vector<32x64xf32>
    %92 = arith.truncf %91 : vector<32x64xf32> to vector<32x64xbf16>
    %93 = vector.extract_strided_slice %35 {offsets = [0, 640], sizes = [32, 64], strides = [1, 1]} : vector<32x768xf32> to vector<32x64xf32>
    %94 = arith.truncf %93 : vector<32x64xf32> to vector<32x64xbf16>
    %cst_34 = arith.constant dense<0.000000e+00> : vector<32x32xf32>
    %95 = tpu.matmul %90, %92, %cst_34 {dimension_numbers = #tpu.dot_dimension_numbers<[1], [1], [0], [0], [0, 0, 1, 0], [], []>} : vector<32x64xbf16>, vector<32x64xbf16>, vector<32x32xf32> -> vector<32x32xf32>
    %cst_35 = arith.constant 1.250000e-01 : f32
    %96 = vector.broadcast %cst_35 : f32 to vector<32x32xf32>
    %97 = arith.mulf %95, %96 : vector<32x32xf32>
    %cst_36 = arith.constant -1.000000e+30 : f32
    %98 = vector.broadcast %cst_36 : f32 to vector<32x32xf32>
    %99 = arith.select %38, %97, %98 : vector<32x32xi1>, vector<32x32xf32>
    %cst_37 = arith.constant dense<0xFF800000> : vector<32xf32>
    %100 = vector.multi_reduction <maximumf>, %99, %cst_37 [1] : vector<32x32xf32> to vector<32xf32>
    %101 = vector.shape_cast %100 : vector<32xf32> to vector<32x1xf32>
    %102 = vector.broadcast %101 : vector<32x1xf32> to vector<32x32xf32>
    %103 = arith.subf %99, %102 : vector<32x32xf32>
    %104 = math.exp %103 : vector<32x32xf32>
    %cst_38 = arith.constant dense<0.000000e+00> : vector<32xf32>
    %105 = vector.multi_reduction <add>, %104, %cst_38 [1] : vector<32x32xf32> to vector<32xf32>
    %106 = vector.shape_cast %105 : vector<32xf32> to vector<32x1xf32>
    %107 = arith.truncf %104 : vector<32x32xf32> to vector<32x32xbf16>
    %cst_39 = arith.constant dense<0.000000e+00> : vector<32x64xf32>
    %108 = tpu.matmul %107, %94, %cst_39 {dimension_numbers = #tpu.dot_dimension_numbers<[1], [0], [0], [1], [0, 0, 1, 1], [], []>} : vector<32x32xbf16>, vector<32x64xbf16>, vector<32x64xf32> -> vector<32x64xf32>
    %109 = tpu.reciprocal %106 {approx = true} : vector<32x1xf32> -> vector<32x1xf32>
    %110 = vector.broadcast %109 : vector<32x1xf32> to vector<32x64xf32>
    %111 = arith.mulf %108, %110 : vector<32x64xf32>
    %112 = arith.truncf %111 : vector<32x64xf32> to vector<32x64xbf16>
    %c0_40 = arith.constant 0 : index
    %c128 = arith.constant 128 : index
    %113 = vector.load %arg17[%c0_40, %c128] : memref<32x256xbf16, #tpu.memory_space<vmem>>, vector<32x64xbf16>
    tpu.vector_store %arg17[%c0_40, %c128], %112 {strides = array<i32>} : memref<32x256xbf16, #tpu.memory_space<vmem>>, vector<32x64xbf16>,
    %114 = vector.extract_strided_slice %35 {offsets = [0, 192], sizes = [32, 64], strides = [1, 1]} : vector<32x768xf32> to vector<32x64xf32>
    %115 = arith.truncf %114 : vector<32x64xf32> to vector<32x64xbf16>
    %116 = vector.extract_strided_slice %35 {offsets = [0, 448], sizes = [32, 64], strides = [1, 1]} : vector<32x768xf32> to vector<32x64xf32>
    %117 = arith.truncf %116 : vector<32x64xf32> to vector<32x64xbf16>
    %118 = vector.extract_strided_slice %35 {offsets = [0, 704], sizes = [32, 64], strides = [1, 1]} : vector<32x768xf32> to vector<32x64xf32>
    %119 = arith.truncf %118 : vector<32x64xf32> to vector<32x64xbf16>
    %cst_41 = arith.constant dense<0.000000e+00> : vector<32x32xf32>
    %120 = tpu.matmul %115, %117, %cst_41 {dimension_numbers = #tpu.dot_dimension_numbers<[1], [1], [0], [0], [0, 0, 1, 0], [], []>} : vector<32x64xbf16>, vector<32x64xbf16>, vector<32x32xf32> -> vector<32x32xf32>
    %cst_42 = arith.constant 1.250000e-01 : f32
    %121 = vector.broadcast %cst_42 : f32 to vector<32x32xf32>
    %122 = arith.mulf %120, %121 : vector<32x32xf32>
    %cst_43 = arith.constant -1.000000e+30 : f32
    %123 = vector.broadcast %cst_43 : f32 to vector<32x32xf32>
    %124 = arith.select %38, %122, %123 : vector<32x32xi1>, vector<32x32xf32>
    %cst_44 = arith.constant dense<0xFF800000> : vector<32xf32>
    %125 = vector.multi_reduction <maximumf>, %124, %cst_44 [1] : vector<32x32xf32> to vector<32xf32>
    %126 = vector.shape_cast %125 : vector<32xf32> to vector<32x1xf32>
    %127 = vector.broadcast %126 : vector<32x1xf32> to vector<32x32xf32>
    %128 = arith.subf %124, %127 : vector<32x32xf32>
    %129 = math.exp %128 : vector<32x32xf32>
    %cst_45 = arith.constant dense<0.000000e+00> : vector<32xf32>
    %130 = vector.multi_reduction <add>, %129, %cst_45 [1] : vector<32x32xf32> to vector<32xf32>
    %131 = vector.shape_cast %130 : vector<32xf32> to vector<32x1xf32>
    %132 = arith.truncf %129 : vector<32x32xf32> to vector<32x32xbf16>
    %cst_46 = arith.constant dense<0.000000e+00> : vector<32x64xf32>
    %133 = tpu.matmul %132, %119, %cst_46 {dimension_numbers = #tpu.dot_dimension_numbers<[1], [0], [0], [1], [0, 0, 1, 1], [], []>} : vector<32x32xbf16>, vector<32x64xbf16>, vector<32x64xf32> -> vector<32x64xf32>
    %134 = tpu.reciprocal %131 {approx = true} : vector<32x1xf32> -> vector<32x1xf32>
    %135 = vector.broadcast %134 : vector<32x1xf32> to vector<32x64xf32>
    %136 = arith.mulf %133, %135 : vector<32x64xf32>
    %137 = arith.truncf %136 : vector<32x64xf32> to vector<32x64xbf16>
    %c0_47 = arith.constant 0 : index
    %c192 = arith.constant 192 : index
    %138 = vector.load %arg17[%c0_47, %c192] : memref<32x256xbf16, #tpu.memory_space<vmem>>, vector<32x64xbf16>
    tpu.vector_store %arg17[%c0_47, %c192], %137 {strides = array<i32>} : memref<32x256xbf16, #tpu.memory_space<vmem>>, vector<32x64xbf16>,
    %c0_48 = arith.constant 0 : index
    %c0_49 = arith.constant 0 : index
    %139 = vector.load %arg17[%c0_48, %c0_49] : memref<32x256xbf16, #tpu.memory_space<vmem>>, vector<32x256xbf16>
    %c0_50 = arith.constant 0 : index
    %c0_51 = arith.constant 0 : index
    %c0_52 = arith.constant 0 : index
    %140 = vector.load %arg7[%c0_50, %c0_51, %c0_52] : memref<1x256x256xbf16, #tpu.memory_space<vmem>>, vector<1x256x256xbf16>
    %141 = vector.shape_cast %140 : vector<1x256x256xbf16> to vector<256x256xbf16>
    %cst_53 = arith.constant dense<0.000000e+00> : vector<32x256xf32>
    %142 = tpu.matmul %139, %141, %cst_53 {dimension_numbers = #tpu.dot_dimension_numbers<[1], [0], [0], [1], [0, 0, 1, 1], [], []>} : vector<32x256xbf16>, vector<256x256xbf16>, vector<32x256xf32> -> vector<32x256xf32>
    %c0_54 = arith.constant 0 : index
    %c0_55 = arith.constant 0 : index
    %c0_56 = arith.constant 0 : index
    %143 = vector.load %arg8[%c0_54, %c0_55, %c0_56] : memref<1x1x256xf32, #tpu.memory_space<vmem>>, vector<1x1x256xf32>
    %144 = vector.shape_cast %143 : vector<1x1x256xf32> to vector<1x256xf32>
    %145 = vector.broadcast %144 : vector<1x256xf32> to vector<32x256xf32>
    %146 = arith.addf %142, %145 : vector<32x256xf32>
    %147 = arith.addf %146, %3 : vector<32x256xf32>
    %c0_57 = arith.constant 0 : index
    %c0_58 = arith.constant 0 : index
    %c0_59 = arith.constant 0 : index
    %148 = vector.load %arg9[%c0_57, %c0_58, %c0_59] : memref<1x1x256xf32, #tpu.memory_space<vmem>>, vector<1x1x256xf32>
    %149 = vector.shape_cast %148 : vector<1x1x256xf32> to vector<1x256xf32>
    %c0_60 = arith.constant 0 : index
    %c0_61 = arith.constant 0 : index
    %c0_62 = arith.constant 0 : index
    %150 = vector.load %arg10[%c0_60, %c0_61, %c0_62] : memref<1x1x256xf32, #tpu.memory_space<vmem>>, vector<1x1x256xf32>
    %151 = vector.shape_cast %150 : vector<1x1x256xf32> to vector<1x256xf32>
    %cst_63 = arith.constant dense<0.000000e+00> : vector<32xf32>
    %152 = vector.multi_reduction <add>, %147, %cst_63 [1] : vector<32x256xf32> to vector<32xf32>
    %153 = vector.shape_cast %152 : vector<32xf32> to vector<32x1xf32>
    %cst_64 = arith.constant 2.560000e+02 : f32
    %154 = vector.broadcast %cst_64 : f32 to vector<32x1xf32>
    %155 = arith.divf %153, %154 : vector<32x1xf32>
    %156 = vector.broadcast %155 : vector<32x1xf32> to vector<32x256xf32>
    %157 = arith.subf %147, %156 : vector<32x256xf32>
    %158 = arith.mulf %157, %157 : vector<32x256xf32>
    %cst_65 = arith.constant dense<0.000000e+00> : vector<32xf32>
    %159 = vector.multi_reduction <add>, %158, %cst_65 [1] : vector<32x256xf32> to vector<32xf32>
    %160 = vector.shape_cast %159 : vector<32xf32> to vector<32x1xf32>
    %cst_66 = arith.constant 2.560000e+02 : f32
    %161 = vector.broadcast %cst_66 : f32 to vector<32x1xf32>
    %162 = arith.divf %160, %161 : vector<32x1xf32>
    %cst_67 = arith.constant 9.99999996E-13 : f32
    %163 = vector.broadcast %cst_67 : f32 to vector<32x1xf32>
    %164 = arith.addf %162, %163 : vector<32x1xf32>
    %165 = math.rsqrt %164 : vector<32x1xf32>
    %166 = vector.broadcast %165 : vector<32x1xf32> to vector<32x256xf32>
    %167 = arith.mulf %157, %166 : vector<32x256xf32>
    %168 = vector.broadcast %149 : vector<1x256xf32> to vector<32x256xf32>
    %169 = arith.mulf %167, %168 : vector<32x256xf32>
    %170 = vector.broadcast %151 : vector<1x256xf32> to vector<32x256xf32>
    %171 = arith.addf %169, %170 : vector<32x256xf32>
    %172 = arith.truncf %171 : vector<32x256xf32> to vector<32x256xbf16>
    %c0_68 = arith.constant 0 : index
    %c0_69 = arith.constant 0 : index
    %c0_70 = arith.constant 0 : index
    %173 = vector.load %arg11[%c0_68, %c0_69, %c0_70] : memref<1x256x1024xbf16, #tpu.memory_space<vmem>>, vector<1x256x1024xbf16>
    %174 = vector.shape_cast %173 : vector<1x256x1024xbf16> to vector<256x1024xbf16>
    %cst_71 = arith.constant dense<0.000000e+00> : vector<32x1024xf32>
    %175 = tpu.matmul %172, %174, %cst_71 {dimension_numbers = #tpu.dot_dimension_numbers<[1], [0], [0], [1], [0, 0, 1, 1], [], []>} : vector<32x256xbf16>, vector<256x1024xbf16>, vector<32x1024xf32> -> vector<32x1024xf32>
    %c0_72 = arith.constant 0 : index
    %c0_73 = arith.constant 0 : index
    %c0_74 = arith.constant 0 : index
    %176 = vector.load %arg12[%c0_72, %c0_73, %c0_74] : memref<1x1x1024xf32, #tpu.memory_space<vmem>>, vector<1x1x1024xf32>
    %177 = vector.shape_cast %176 : vector<1x1x1024xf32> to vector<1x1024xf32>
    %178 = vector.broadcast %177 : vector<1x1024xf32> to vector<32x1024xf32>
    %179 = arith.addf %175, %178 : vector<32x1024xf32>
    %180 = arith.mulf %179, %179 : vector<32x1024xf32>
    %181 = arith.mulf %179, %180 : vector<32x1024xf32>
    %cst_75 = arith.constant 4.471500e-02 : f32
    %182 = vector.broadcast %cst_75 : f32 to vector<32x1024xf32>
    %183 = arith.mulf %182, %181 : vector<32x1024xf32>
    %184 = arith.addf %179, %183 : vector<32x1024xf32>
    %cst_76 = arith.constant 0.797884583 : f32
    %185 = vector.broadcast %cst_76 : f32 to vector<32x1024xf32>
    %186 = arith.mulf %185, %184 : vector<32x1024xf32>
    %187 = math.tanh %186 : vector<32x1024xf32>
    %cst_77 = arith.constant 1.000000e+00 : f32
    %188 = vector.broadcast %cst_77 : f32 to vector<32x1024xf32>
    %189 = arith.addf %188, %187 : vector<32x1024xf32>
    %cst_78 = arith.constant 5.000000e-01 : f32
    %190 = vector.broadcast %cst_78 : f32 to vector<32x1024xf32>
    %191 = arith.mulf %190, %189 : vector<32x1024xf32>
    %192 = arith.mulf %179, %191 : vector<32x1024xf32>
    %193 = arith.truncf %192 : vector<32x1024xf32> to vector<32x1024xbf16>
    %c0_79 = arith.constant 0 : index
    %c0_80 = arith.constant 0 : index
    %c0_81 = arith.constant 0 : index
    %194 = vector.load %arg13[%c0_79, %c0_80, %c0_81] : memref<1x1024x256xbf16, #tpu.memory_space<vmem>>, vector<1x1024x256xbf16>
    %195 = vector.shape_cast %194 : vector<1x1024x256xbf16> to vector<1024x256xbf16>
    %cst_82 = arith.constant dense<0.000000e+00> : vector<32x256xf32>
    %196 = tpu.matmul %193, %195, %cst_82 {dimension_numbers = #tpu.dot_dimension_numbers<[1], [0], [0], [1], [0, 0, 1, 1], [], []>} : vector<32x1024xbf16>, vector<1024x256xbf16>, vector<32x256xf32> -> vector<32x256xf32>
    %c0_83 = arith.constant 0 : index
    %c0_84 = arith.constant 0 : index
    %c0_85 = arith.constant 0 : index
    %197 = vector.load %arg14[%c0_83, %c0_84, %c0_85] : memref<1x1x256xf32, #tpu.memory_space<vmem>>, vector<1x1x256xf32>
    %198 = vector.shape_cast %197 : vector<1x1x256xf32> to vector<1x256xf32>
    %199 = vector.broadcast %198 : vector<1x256xf32> to vector<32x256xf32>
    %200 = arith.addf %196, %199 : vector<32x256xf32>
    %201 = arith.addf %200, %147 : vector<32x256xf32>
    %c0_86 = arith.constant 0 : index
    %c0_87 = arith.constant 0 : index
    %202 = vector.load %arg16[%c0_86, %c0_87] : memref<32x256xf32, #tpu.memory_space<vmem>>, vector<32x256xf32>
    tpu.vector_store %arg16[%c0_86, %c0_87], %201 {strides = array<i32>} : memref<32x256xf32, #tpu.memory_space<vmem>>, vector<32x256xf32>,
    %c1_i32 = arith.constant 1 : i32
    %203 = arith.cmpi eq, %arg1, %c1_i32 : i32
    %204 = arith.extui %203 : i1 to i32
    %c0_i32_88 = arith.constant 0 : i32
    %205 = arith.cmpi ne, %204, %c0_i32_88 : i32
    scf.if %205 {
      %c0_89 = arith.constant 0 : index
      %c0_90 = arith.constant 0 : index
      %c0_91 = arith.constant 0 : index
      %206 = vector.load %arg15[%c0_89, %c0_90, %c0_91] : memref<1x32x256xf32, #tpu.memory_space<vmem>>, vector<1x32x256xf32>
      %207 = vector.shape_cast %206 : vector<1x32x256xf32> to vector<32x256xf32>
      %208 = vector.shape_cast %201 : vector<32x256xf32> to vector<1x32x256xf32>
      tpu.vector_store %arg15[%c0_89, %c0_90, %c0_91], %208 {strides = array<i32>} : memref<1x32x256xf32, #tpu.memory_space<vmem>>, vector<1x32x256xf32>,
    } else {
    }
    return
  }
  func.func @transform_0(%arg0: i32, %arg1: i32) -> (i32, i32, i32) {
    %c0_i32 = arith.constant 0 : i32
    %c0_i32_0 = arith.constant 0 : i32
    %c0_i32_1 = arith.constant 0 : i32
    return %arg0, %c0_i32, %c0_i32_0 : i32, i32, i32
  }
  func.func @transform_1(%arg0: i32, %arg1: i32) -> (i32, i32, i32) {
    %c0_i32 = arith.constant 0 : i32
    %c0_i32_0 = arith.constant 0 : i32
    %c0_i32_1 = arith.constant 0 : i32
    return %arg1, %c0_i32, %c0_i32_0 : i32, i32, i32
  }
  func.func @transform_2(%arg0: i32, %arg1: i32) -> (i32, i32, i32) {
    %c0_i32 = arith.constant 0 : i32
    %c0_i32_0 = arith.constant 0 : i32
    %c0_i32_1 = arith.constant 0 : i32
    return %arg1, %c0_i32, %c0_i32_0 : i32, i32, i32
  }
  func.func @transform_3(%arg0: i32, %arg1: i32) -> (i32, i32, i32) {
    %c0_i32 = arith.constant 0 : i32
    %c0_i32_0 = arith.constant 0 : i32
    %c0_i32_1 = arith.constant 0 : i32
    return %arg1, %c0_i32, %c0_i32_0 : i32, i32, i32
  }
  func.func @transform_4(%arg0: i32, %arg1: i32) -> (i32, i32, i32) {
    %c0_i32 = arith.constant 0 : i32
    %c0_i32_0 = arith.constant 0 : i32
    %c0_i32_1 = arith.constant 0 : i32
    return %arg1, %c0_i32, %c0_i32_0 : i32, i32, i32
  }
  func.func @transform_5(%arg0: i32, %arg1: i32) -> (i32, i32, i32) {
    %c0_i32 = arith.constant 0 : i32
    %c0_i32_0 = arith.constant 0 : i32
    %c0_i32_1 = arith.constant 0 : i32
    return %arg1, %c0_i32, %c0_i32_0 : i32, i32, i32
  }
  func.func @transform_6(%arg0: i32, %arg1: i32) -> (i32, i32, i32) {
    %c0_i32 = arith.constant 0 : i32
    %c0_i32_0 = arith.constant 0 : i32
    %c0_i32_1 = arith.constant 0 : i32
    return %arg1, %c0_i32, %c0_i32_0 : i32, i32, i32
  }
  func.func @transform_7(%arg0: i32, %arg1: i32) -> (i32, i32, i32) {
    %c0_i32 = arith.constant 0 : i32
    %c0_i32_0 = arith.constant 0 : i32
    %c0_i32_1 = arith.constant 0 : i32
    return %arg1, %c0_i32, %c0_i32_0 : i32, i32, i32
  }
  func.func @transform_8(%arg0: i32, %arg1: i32) -> (i32, i32, i32) {
    %c0_i32 = arith.constant 0 : i32
    %c0_i32_0 = arith.constant 0 : i32
    %c0_i32_1 = arith.constant 0 : i32
    return %arg1, %c0_i32, %c0_i32_0 : i32, i32, i32
  }
  func.func @transform_9(%arg0: i32, %arg1: i32) -> (i32, i32, i32) {
    %c0_i32 = arith.constant 0 : i32
    %c0_i32_0 = arith.constant 0 : i32
    %c0_i32_1 = arith.constant 0 : i32
    return %arg1, %c0_i32, %c0_i32_0 : i32, i32, i32
  }
  func.func @transform_10(%arg0: i32, %arg1: i32) -> (i32, i32, i32) {
    %c0_i32 = arith.constant 0 : i32
    %c0_i32_0 = arith.constant 0 : i32
    %c0_i32_1 = arith.constant 0 : i32
    return %arg1, %c0_i32, %c0_i32_0 : i32, i32, i32
  }
  func.func @transform_11(%arg0: i32, %arg1: i32) -> (i32, i32, i32) {
    %c0_i32 = arith.constant 0 : i32
    %c0_i32_0 = arith.constant 0 : i32
    %c0_i32_1 = arith.constant 0 : i32
    return %arg1, %c0_i32, %c0_i32_0 : i32, i32, i32
  }
  func.func @transform_12(%arg0: i32, %arg1: i32) -> (i32, i32, i32) {
    %c0_i32 = arith.constant 0 : i32
    %c0_i32_0 = arith.constant 0 : i32
    %c0_i32_1 = arith.constant 0 : i32
    return %arg1, %c0_i32, %c0_i32_0 : i32, i32, i32
  }
  func.func @transform_13(%arg0: i32, %arg1: i32) -> (i32, i32, i32) {
    %c0_i32 = arith.constant 0 : i32
    %c0_i32_0 = arith.constant 0 : i32
    %c0_i32_1 = arith.constant 0 : i32
    return %arg0, %c0_i32, %c0_i32_0 : i32, i32, i32
  }
}

</mosaic_0001>

<bundles_post_ra>
// kernel: vit_stitching_encoder_forward.1
= control target key start
LH: loop header
LB: loop body
LE: loop exit
PB: predicated region body
PF: predicated region fallthrough
CT: control target
= control target key end

     0   :  { %s9907_s0 = inlined_call_operand.vmem [shape: f32[2,32,256], index: 0, kind: input, shape index: {}]   ;;  %s9908_s1 = inlined_call_operand.vmem [shape: f32[2,1,256], index: 1, kind: input, shape index: {}]   ;;  %s9909_s2 = inlined_call_operand.vmem [shape: f32[2,1,256], index: 2, kind: input, shape index: {}]   ;;  %s9910_s3 = inlined_call_operand.hbm [shape: bf16[2,256,768], index: 3, kind: input, shape index: {}]   ;;  %s9911_s4 = inlined_call_operand.vmem [shape: f32[2,1,768], index: 4, kind: input, shape index: {}]   ;;  %s9912_s5 = inlined_call_operand.vmem [shape: bf16[2,256,256], index: 5, kind: input, shape index: {}]   ;;  %s9913_s6 = inlined_call_operand.vmem [shape: f32[2,1,256], index: 6, kind: input, shape index: {}]   ;;  %s9914_s7 = inlined_call_operand.vmem [shape: f32[2,1,256], index: 7, kind: input, shape index: {}]   ;;  %s9915_s8 = inlined_call_operand.vmem [shape: f32[2,1,256], index: 8, kind: input, shape index: {}]   ;;  %s9916_s9 = inlined_call_operand.hbm [shape: bf16[2,256,1024], index: 9, kind: input, shape index: {}]   ;;  %s9917_s10 = inlined_call_operand.vmem [shape: f32[2,1,1024], index: 10, kind: input, shape index: {}]   ;;  %s9918_s11 = inlined_call_operand.hbm [shape: bf16[2,1024,256], index: 11, kind: input, shape index: {}]   ;;  %s9919_s12 = inlined_call_operand.vmem [shape: f32[2,1,256], index: 12, kind: input, shape index: {}]   ;;  %s9920_s13 = inlined_call_operand.vmem [shape: f32[2,32,256], index: 13, kind: output, shape index: {}]  }
   0x1   :  { %9930 = sst [smem:[#allocation21_spill]] %s9907_s0 }
   0x2   :  { %9931 = sst [smem:[#allocation22_spill]] %s9910_s3 }
   0x3   :  { %9932 = sst [smem:[#allocation23_spill]] %s9911_s4 }
   0x4   :  { %9933 = sst [smem:[#allocation24_spill]] %s9912_s5 }
   0x5   :  { %9934 = sst [smem:[#allocation25_spill]] %s9913_s6 }
   0x6   :  { %9935 = sst [smem:[#allocation26_spill]] %s9914_s7 }
   0x7   :  { %9936 = sst [smem:[#allocation27_spill]] %s9915_s8 }
   0x8   :  { %9937 = sst [smem:[#allocation28_spill]] %s9916_s9 }
   0x9   :  { %9938 = sst [smem:[#allocation29_spill]] %s9917_s10 }
   0xa   :  { %9939 = sst [smem:[#allocation30_spill]] %s9918_s11 }
   0xb   :  { %9940 = sst [smem:[#allocation31_spill]] %s9919_s12 }
   0xc   :  { %9941 = sst [smem:[#allocation32_spill]] %s9920_s13 }
   0xd   :  { %18 = vsyncpa [#allocation5], 0 }
   0xe   :  { %20 = vsyncpa [#allocation5 + $0x1], 0 }
   0xf   :  { %21 = vsyncpa [#allocation7], 0 }
  0x10   :  { %23 = vsyncpa [#allocation7 + $0x1], 0  ;;  %s7940_s25 = smov 0   ;;  %s7942_s26 = smov 0  }
  0x11   :  { %s7944_s27 = smov 0   ;;  %s7946_s28 = smov 0  }
  0x12   :  { %s7948_s29 = smov 0   ;;  %s7950_s30 = smov 0  }
  0x13   :  { %s7952_s14 = smov 0   ;;  %s7954_s15 = smov 0  }
  0x14 LB: > { %9942 = sst [smem:[#allocation11_spill]] %s7836_s26  ;;  %s9922_s16 = sadd.s32 4294967295, %s7860_s15   ;;  %s7860_s15 = sphi %s7954_s15, %s29_s15   ;;  %s7856_s14 = sphi %s7952_s14, %s9988_s14   ;;  %s7852_s30 = sphi %s7950_s30, %s9987_s30   ;;  %s7848_s29 = sphi %s7948_s29, %s9986_s29   ;;  %s7844_s28 = sphi %s7946_s28, %s9985_s28   ;;  %s7840_s27 = sphi %s7944_s27, %s9984_s27   ;;  %s7836_s26 = sphi %s7942_s26, %s9983_s26   ;;  %s7832_s25 = sphi %s7940_s25, %s9982_s25  }
  0x15   : > { %9943 = sst [smem:[#allocation12_spill]] %s7840_s27  ;;  %s38_s17 = sadd.s32 1, %s7852_s30 }
  0x16   : > { %9944 = sst [smem:[#allocation13_spill]] %s7852_s30  ;;  %p39_p0 = scmp.ge.s32.totalorder %s38_s17, 2 }
  0x17   : > { %9945 = sst [smem:[#allocation14_spill]] %s7856_s14  ;;  %s41_s18 = sadd.s32 1, %s7856_s14 }
  0x18   : > { %9946 = sst [smem:[#allocation15_spill]] %s7860_s15  ;;  %s126_s19 = sadd.s32 1, %s7840_s27 }
  0x19   : > { %p133_p1 = scmp.ne.s32.totalorder %s7840_s27, %s7836_s26  ;;  %s9990_s17 = smov (%p39_p0, %s38_s17), 0 }
  0x1a   : > { %9947 = sst [smem:[#allocation16_spill]] %s9990_s17  ;;  %s9992_s18 = smov (!%p39_p0, %s41_s18), %s7856_s14 }
  0x1b   : > { %s123_s20 = ssub.s32 %s7852_s30, %s9990_s17  ;;  %p134_p2 = scmp.eq.s32.totalorder %s7860_s15, 0 }
  0x1c   : > { %p43_p3 = scmp.ge.s32.totalorder %s9992_s18, 2  ;;  %p124_p4 = scmp.eq.s32.totalorder %s123_s20, 0 }
  0x1d   : > { %p135_p5 = por %p134_p2, %p133_p1  ;;  %p139_p6 = scmp.ne.s32.totalorder %s7836_s26, %s7832_s25 }
  0x1e   : > { %s9994_s18 = smov (%p43_p3, %s9992_s18), 0  ;;  %p140_p7 = scmp.eq.s32.totalorder %s9922_s16, 0 }
  0x1f   : > { %9948 = sst [smem:[#allocation17_spill]] %s9994_s18  ;;  %p7472_p8 = scmp.lt.s32.totalorder %s7860_s15, 4 }
  0x20   : > { %s7994_s21 = scalar_select %p124_p4, %s7840_s27, %s126_s19  }
  0x21   : > { %s8000_s22 = sand.u32 1, %s7840_s27   ;;  %p8002_p9 = por %p140_p7, %p139_p6 }
  0x22   : > { %9949 = sst [smem:[#allocation18_spill]] %s7994_s21  ;;  %s503_s24 = sand.u32 1, %s7860_s15  }
  0x23   : > { %p8007_p10 = pnand %p7472_p8, %p135_p5  ;;  %s5465_s25 = sshll.u32 %s8000_s22, 10 }
  0x24   : > { %s7059_s20 = sshll.u32 %s7852_s30, 10  ;;  %s9952_s9 = sld [smem:[#allocation28_spill]] }
  0x25   : > { %s507_s14 = scalar_lea.vmem [#allocation6], %s5465_s25  ;;  %s8016_s13 = scalar_lea.sflag [#allocation7], %s503_s24 }
  0x26   : > { %s515_s21 = sshll.u32 %s507_s14, 4  ;;  %s7862_s12 = smov 512   ;;  %s516_s21 = int_to_ptr.vmem [resolvable:$true] %s515_s21 }
  0x27   : > { %s7863_s10 = smov 32   ;;  %s9953_s11 = sld [smem:[#allocation30_spill]] }
  0x28   : > { %s536_s19 = scalar_lea.vmem [#allocation8], %s5465_s25  ;;  %p5471_p11 = scmp.ge.s32.totalorder %s7860_s15, 1 }
  0x29   : > { %p559_p12 = scmp.lt.s32.totalorder %s7860_s15, 5  ;;  %s9955_s3 = sld [smem:[#allocation22_spill]] }
  0x2a   : > { %s512_s16 = scalar_lea.hbm %s9952_s9, %s7059_s20  ;;  %s544_s9 = sshll.u32 %s536_s19, 4  ;;  %s545_s9 = int_to_ptr.vmem [resolvable:$true] %s544_s9 }
  0x2b   : > { %s513_s27 = sshll.u32 %s512_s16, 4  ;;  %p8026_p13 = pnand %p5471_p11, %p559_p12  ;;  %s514_s27 = int_to_ptr.hbm [resolvable:$true] %s513_s27 }
  0x2c   : > { %7468 = dma.hbm_to_vmem [thread:$0]  (!%p8007_p10), %s514_s27, 16384, %s516_s21, %s8016_s13, %s7862_s12, %s7862_s12, %s7863_s10  }
  0x2d   : > { %s541_s18 = scalar_lea.hbm %s9953_s11, %s7059_s20  ;;  %s7452_s10 = smul.u32 768, %s8000_s22 }
  0x2e   : > { %s542_s14 = sshll.u32 %s541_s18, 4  ;;  %s7453_s12 = smul.u32 768, %s7852_s30  ;;  %s543_s14 = int_to_ptr.hbm [resolvable:$true] %s542_s14 }
  0x2f   : > { %s449_s21 = scalar_lea.vmem [#allocation4], %s7452_s10  ;;  %s446_s20 = scalar_lea.sflag [#allocation5], %s8000_s22 }
  0x30   : > { %s454_s8 = scalar_lea.hbm %s9955_s3, %s7453_s12  ;;  %s457_s24 = sshll.u32 %s449_s21, 4  ;;  %s458_s24 = int_to_ptr.vmem [resolvable:$true] %s457_s24 }
  0x31   : > { %s455_s25 = sshll.u32 %s454_s8, 4  ;;  %s7864_s18 = smov 384   ;;  %s456_s25 = int_to_ptr.hbm [resolvable:$true] %s455_s25 }
  0x32   : > { %s7865_s19 = smov 24   ;;  %s7866_s11 = smov 128  }
  0x33   : > { %7465 = dma.hbm_to_vmem [thread:$0]  (!%p8007_p10), %s456_s25, 12288, %s458_s24, %s446_s20, %s7864_s18, %s7864_s18, %s7865_s19  }
  0x34   : > { %s7867_s4 = smov 8   ;;  %563 = sbr.rel (%p8026_p13) target bundleno = 2228 (0x8b4), region = 72 }
  0x35   : > { %7471 = dma.hbm_to_vmem [thread:$0]  (!%p8007_p10), %s543_s14, 16384, %s545_s9, %s8016_s13, %s7866_s11, %s7866_s11, %s7867_s4  }
  0x39   : > { %s8044_s12 = sand.u32 1, %s7836_s26  }
  0x3a   : > { %s7454_s10 = smul.u32 768, %s8044_s12  ;;  %s566_s27 = scalar_lea.sflag [#allocation5], %s8044_s12 }
  0x3c   : > { %s8048_s22 = scalar_lea.vmem [#allocation4], %s7454_s10 }
  0x3d   : > { %7823 = dma.done.wait (%p8002_p9), %s566_s27, 12288  }
  0x3e   : > { %7825 = vsyncadd (%p8002_p9), %s566_s27, 4294955008  ;;  %s9956_s4 = sadd.s32 4294967295, %s7860_s15   ;;  %s5472_s11 = sshll.u32 %s8044_s12, 10 }
  0x3f   : > { %s575_s9 = sand.u32 1, %s9956_s4   ;;  %s8057_s17 = scalar_lea.vmem [#allocation6], %s5472_s11 }
  0x40   : > { %s576_s13 = scalar_lea.sflag [#allocation7], %s575_s9  ;;  %9957 = sst [smem:[#allocation19_spill]] %s8057_s17 }
  0x41   : > { %7827 = dma.done.wait (%p8002_p9), %s576_s13, 32768  }
  0x42   : > { %7829 = vsyncadd (%p8002_p9), %s576_s13, 4294934528  ;;  %p685_p0 = scmp.lt.s32.totalorder %s7848_s29, 1  ;;  %p690_p1 = scmp.lt.s32.totalorder %s7844_s28, 1 }
  0x43   : > { %s9958_s0 = sld [smem:[#allocation21_spill]]  ;;  %s8116_s30 = scalar_lea.vmem [#allocation8], %s5472_s11 }
  0x44   : > { %s9996_s29 = smov (!%p685_p0, %s7848_s29), 1  ;;  %s9959_s5 = sld [smem:[#allocation24_spill]] }
  0x45   : > { %s691_s14 = scalar_select %p690_p1, %s7844_s28, 1 }
  0x46   : > { %s7061_s16 = sshll.u32 %s9996_s29, 6  ;;  %s9963_s18 = sld [smem:[#allocation26_spill]] }
  0x47   : > { %s8070_s24 = sshll.u32 %s691_s14, 1  ;;  %s7455_s12 = smul.u32 6, %s691_s14 }
  0x48   : > { %s7062_s10 = sshll.u32 %s691_s14, 8  ;;  %s9964_s15 = sld [smem:[#allocation27_spill]] }
  0x49   : > { %s689_s21 = scalar_lea.vmem %s9958_s0, %s7061_s16  ;;  %s9962_s0 = sld [smem:[#allocation23_spill]] }
  0x4a   : > { %s8083_s9 = scalar_lea.vmem %s9959_s5, %s7062_s10  ;;  %s5483_s27 = sshll.u32 %s691_s14, 3 }
  0x4b   : > { %9960 = sst [smem:[#allocation20_spill]] %s8083_s9  ;;  %p5487_p2 = scmp.ne.s32.totalorder %s7844_s28, 0 }
  0x4c   : > { %s714_s19 = scalar_lea.vmem %s9963_s18, %s8070_s24  ;;  %s9965_s5 = sld [smem:[#allocation29_spill]] }
  0x4d   : > { %s9966_s8 = sld [smem:[#allocation31_spill]] }
  0x4e   : > { %s718_s17 = scalar_lea.vmem %s9964_s15, %s8070_s24  ;;  %s9967_s20 = sld [smem:[#allocation32_spill]] }
  0x4f   : > { %s8092_s3 = scalar_lea.vmem %s9962_s0, %s7455_s12 }
  0x50   : > { %736 = sbr.rel (%p5487_p2) target bundleno = 94 (0x5e), region = 88 }
  0x52   : > { %s8105_s9 = scalar_lea.vmem %s9965_s5, %s5483_s27 }
  0x53   : > { %s726_s25 = scalar_lea.vmem %s9966_s8, %s8070_s24 }
  0x54   : > { %s8114_s6 = scalar_lea.vmem %s9967_s20, %s7061_s16 }
  0x55   : > { %v737_v0 = vld [vmem:[%s689_s21] sm:$0xff]  ;;  %v738_v1 = vld [vmem:[%s689_s21 + $0x8] sm:$0xff]  ;;  %v739_v2 = vld [vmem:[%s689_s21 + $0x10] sm:$0xff] }
  0x56   : > { %745 = vst [vmem:[#allocation2 + $0x30] sm:$0xff] %v737_v0  ;;  %v740_v3 = vld [vmem:[%s689_s21 + $0x18] sm:$0xff]  ;;  %v741_v4 = vld [vmem:[%s689_s21 + $0x20] sm:$0xff]  ;;  %v742_v5 = vld [vmem:[%s689_s21 + $0x28] sm:$0xff] }
  0x57   : > { %746 = vst [vmem:[#allocation2] sm:$0xff] %v738_v1  ;;  %v743_v6 = vld [vmem:[%s689_s21 + $0x30] sm:$0xff]  ;;  %v744_v7 = vld [vmem:[%s689_s21 + $0x38] sm:$0xff] }
  0x58   : > { %747 = vst [vmem:[#allocation2 + $0x18] sm:$0xff] %v739_v2 }
  0x59   : > { %748 = vst [vmem:[#allocation2 + $0x10] sm:$0xff] %v740_v3 }
  0x5a   : > { %749 = vst [vmem:[#allocation2 + $0x8] sm:$0xff] %v741_v4 }
  0x5b   : > { %750 = vst [vmem:[#allocation2 + $0x20] sm:$0xff] %v742_v5 }
  0x5c   : > { %751 = vst [vmem:[#allocation2 + $0x28] sm:$0xff] %v743_v6 }
  0x5d   : > { %752 = vst [vmem:[#allocation2 + $0x38] sm:$0xff] %v744_v7 }
  0x5e PF: > { %v753_v10 = vld [vmem:[#allocation2 + $0x30] sm:$0xff]  ;;  %v754_v12 = vld [vmem:[#allocation2] sm:$0xff]  ;;  %v7868_v20 = vmov 256.0   ;;  %v7109_v56 = vld [vmem:[%s8048_s22 + $0x164] sm:$0xf0]  ;;  %s9968_s15 = scalar_lea.vmem %s9908_s1, %s8070_s24  ;;  %s9969_s16 = scalar_lea.vmem %s9909_s2, %s8070_s24  ;;  %vm1727_vm13 = vcmask 523264  }
  0x5f   : > { %v763_v13 = vadd.f32 %v754_v12, %v753_v10  ;;  %v755_v16 = vld [vmem:[#allocation2 + $0x18] sm:$0xff]  ;;  %7545 = vrcp.f32 %v7868_v20  ;;  %v5658_v55 = vld [vmem:[%s8048_s22 + $0x150] sm:$0xf]  ;;  %v7157_v59 = vld [vmem:[%s8048_s22 + $0x2e4] sm:$0xf0]  ;;  %vm1767_vm15 = vcmask 261120  }
  0x60   : > { %v756_v17 = vld [vmem:[#allocation2 + $0x10] sm:$0xff]  ;;  %v5659_v58 = vor.u32 %v7109_v56, %v5658_v55  ;;  %v5660_v61 = vld [vmem:[%s8048_s22 + $0x168] sm:$0xf0]  ;;  %v5634_v3 = vld [vmem:[%s8048_s22 + $0x120] sm:$0xf]  ;;  %s9973_s29 = sld [smem:[#allocation25_spill]] }
  0x61   : > { %v757_v8 = vld [vmem:[#allocation2 + $0x8] sm:$0xff]  ;;  %764 = vadd.xlane.f32.xlu0 %v763_v13  ;;  %v766_v19 = vadd.f32 %v756_v17, %v755_v16  ;;  %v5850_v57 = vld [vmem:[%s8048_s22 + $0x2d0] sm:$0xf]  ;;  %v7106_v60 = vld [vmem:[%s8048_s22 + $0x154] sm:$0xf]  ;;  %s9975_s18 = sld [smem:[#allocation19_spill]] }
  0x62   : > { %v758_v9 = vld [vmem:[#allocation2 + $0x20] sm:$0xff]  ;;  %v5851_v62 = vor.u32 %v7157_v59, %v5850_v57  ;;  %v5663_v63 = vor.u32 %v7106_v60, %v5660_v61  ;;  %v7154_v0 = vld [vmem:[%s8048_s22 + $0x2d4] sm:$0xf]  ;;  %v5852_v1 = vld [vmem:[%s8048_s22 + $0x2e8] sm:$0xf0]  ;;  %1490 = vmatpush.bf16.msra.mxu0 %v5659_v58  ;;  %p7056_p3 = scmp.ne.s32.totalorder %s7844_s28, 1 }
  0x63   : > { %v769_v11 = vadd.f32 %v758_v9, %v757_v8  ;;  %v759_v14 = vld [vmem:[#allocation2 + $0x28] sm:$0xff]  ;;  %v5855_v2 = vor.u32 %v7154_v0, %v5852_v1  ;;  %v7103_v4 = vld [vmem:[%s8048_s22 + $0x134] sm:$0xf0]  ;;  %v5826_v5 = vld [vmem:[%s8048_s22 + $0x2a0] sm:$0xf] }
  0x64   : > { %v760_v15 = vld [vmem:[#allocation2 + $0x38] sm:$0xff]  ;;  %1509 = vmatpush.bf16.msra.mxu1 %v5851_v62  ;;  %1528 = vmatpush.bf16.msra.mxu2 %v5663_v63  ;;  %v5635_v6 = vor.u32 %v7103_v4, %v5634_v3  ;;  %v7094_v20 = vld [vmem:[%s8048_s22 + $0xf4] sm:$0xf]  ;;  %v5756_v58 = vld [vmem:[%s8048_s22 + $0x228] sm:$0xf0] }
  0x65   : > { %770 = vadd.xlane.f32.xlu1 %v769_v11  ;;  %v772_v18 = vadd.f32 %v760_v15, %v759_v14  ;;  %v7546_v21 = vpop.eup %7545  ;;  %1547 = vmatpush.bf16.msra.mxu3 %v5855_v2  ;;  %v7151_v7 = vld [vmem:[%s8048_s22 + $0x2b4] sm:$0xf0]  ;;  %v5828_v13 = vld [vmem:[%s8048_s22 + $0x2b8] sm:$0xf0]  ;;  %v7130_v57 = vld [vmem:[%s8048_s22 + $0x214] sm:$0xf] }
  0x66   : > { %v776_v22 = vmul.f32 256.0, %v7546_v21  ;;  %vm780_vm0 = vweird.f32 %v7546_v21  ;;  %1491 = vmatpush.bf16.msra.mxu0 %v5635_v6  ;;  %v5759_v59 = vor.u32 %v7130_v57, %v5756_v58  ;;  %v5538_v60 = vld [vmem:[%s8048_s22 + $0x60] sm:$0xf]  ;;  %v7079_v61 = vld [vmem:[%s8048_s22 + $0x74] sm:$0xf0]  ;;  %s9974_s8 = scalar_lea.vmem %s9973_s29, %s8070_s24 }
  0x67   : > { %v5730_v62 = vld [vmem:[%s8048_s22 + $0x1e0] sm:$0xf]  ;;  %v5539_v63 = vor.u32 %v7079_v61, %v5538_v60  ;;  %v7127_v0 = vld [vmem:[%s8048_s22 + $0x1f4] sm:$0xf0]  ;;  %v7076_v1 = vld [vmem:[%s8048_s22 + $0x64] sm:$0xf] }
  0x68   : > { %v777_v23 = vsub.f32 1.0, %v776_v22  ;;  %v5540_v2 = vld [vmem:[%s8048_s22 + $0x78] sm:$0xf0]  ;;  %v5731_v3 = vor.u32 %v7127_v0, %v5730_v62  ;;  %v5860_v60 = vld [vmem:[%s8048_s22 + $0x2f0] sm:$0xf0] }
  0x69   : > { %767 = vadd.xlane.f32.xlu0 %v766_v19  ;;  %v7145_v19 = vld [vmem:[%s8048_s22 + $0x284] sm:$0xf0]  ;;  %v5543_v4 = vor.u32 %v7076_v1, %v5540_v2  ;;  %v5732_v6 = vld [vmem:[%s8048_s22 + $0x1f8] sm:$0xf0]  ;;  %v7104_v0 = vld [vmem:[%s8048_s22 + $0x13c] sm:$0xf0] }
  0x6a   : > { %v778_v24 = vmul.f32 %v7546_v21, %v777_v23  ;;  %v5642_v61 = vld [vmem:[%s8048_s22 + $0x128] sm:$0xf]  ;;  %v7152_v2 = vld [vmem:[%s8048_s22 + $0x2bc] sm:$0xf0] }
  0x6b   : > { %v5834_v1 = vld [vmem:[%s8048_s22 + $0x2a8] sm:$0xf] }
  0x6c   : > { %v779_v25 = vadd.f32 %v7546_v21, %v778_v24  ;;  %v7142_v24 = vld [vmem:[%s8048_s22 + $0x274] sm:$0xf] }
  0x6d   : > { %773 = vadd.xlane.f32.xlu1 %v772_v18 }
  0x6e   : > { %v8119_v26 = vsel %vm780_vm0, %v7546_v21, %v779_v25  ;;  %v5612_v21 = vld [vmem:[%s8048_s22 + $0x108] sm:$0xf0]  ;;  %vm1843_vm0 = vcmask 519168  }
  0x6f   : > { %v5615_v23 = vor.u32 %v7094_v20, %v5612_v21  ;;  %v5804_v25 = vld [vmem:[%s8048_s22 + $0x288] sm:$0xf0] }
  0xd4   : > { %v765_v29 = vpop.xlane.xlu0 %764 }
  0xd5   : > { %v782_v30 = vmul.f32 %v8119_v26, %v765_v29  ;;  %v7091_v29 = vld [vmem:[%s8048_s22 + $0xd4] sm:$0xf0] }
  0xd7   : > { %v8127_v33 = vsub.f32 %v753_v10, %v782_v30  ;;  %v8129_v34 = vsub.f32 %v754_v12, %v782_v30  ;;  %v5827_v10 = vor.u32 %v7151_v7, %v5826_v5  ;;  %v7148_v12 = vld [vmem:[%s8048_s22 + $0x2a4] sm:$0xf]  ;;  %v5778_v30 = vld [vmem:[%s8048_s22 + $0x240] sm:$0xf] }
  0xd8   : > { %v771_v27 = vpop.xlane.xlu1 %770  ;;  %v7124_v5 = vld [vmem:[%s8048_s22 + $0x1e4] sm:$0xf] }
  0xd9   : > { %v784_v28 = vmul.f32 %v8119_v26, %v771_v27  ;;  %v794_v37 = vmul.f32 %v8127_v33, %v8127_v33  ;;  %v795_v38 = vmul.f32 %v8129_v34, %v8129_v34  ;;  %1510 = vmatpush.bf16.msra.mxu1 %v5827_v10  ;;  %v5807_v27 = vor.u32 %v7142_v24, %v5804_v25  ;;  %v5706_v10 = vld [vmem:[%s8048_s22 + $0x1b0] sm:$0xf]  ;;  %v5490_v24 = vld [vmem:[%s8048_s22] sm:$0xf]  ;;  %v7067_v25 = vld [vmem:[%s8048_s22 + $0x14] sm:$0xf0] }
  0xda   : > { %v5735_v7 = vor.u32 %v7124_v5, %v5732_v6  ;;  %v5643_v5 = vor.u32 %v7104_v0, %v5642_v61  ;;  %v5835_v6 = vor.u32 %v7152_v2, %v5834_v1 }
  0xdb   : > { %v8123_v31 = vsub.f32 %v757_v8, %v784_v28  ;;  %v8125_v32 = vsub.f32 %v758_v9, %v784_v28  ;;  %v802_v41 = vadd.f32 %v795_v38, %v794_v37  ;;  %v7100_v8 = vld [vmem:[%s8048_s22 + $0x124] sm:$0xf]  ;;  %v5636_v9 = vld [vmem:[%s8048_s22 + $0x138] sm:$0xf0]  ;;  %v5586_v28 = vld [vmem:[%s8048_s22 + $0xc0] sm:$0xf] }
  0xdc   : > { %v768_v43 = vpop.xlane.xlu0 %767  ;;  %v5639_v11 = vor.u32 %v7100_v8, %v5636_v9  ;;  %v7088_v37 = vld [vmem:[%s8048_s22 + $0xc4] sm:$0xf]  ;;  %v5588_v38 = vld [vmem:[%s8048_s22 + $0xd8] sm:$0xf0]  ;;  %v5514_v8 = vld [vmem:[%s8048_s22 + $0x30] sm:$0xf] }
  0xdd   : > { %v798_v35 = vmul.f32 %v8123_v31, %v8123_v31  ;;  %v799_v36 = vmul.f32 %v8125_v32, %v8125_v32  ;;  %v783_v44 = vmul.f32 %v8119_v26, %v768_v43  ;;  %803 = vadd.xlane.f32.xlu2 %v802_v41  ;;  %v7136_v41 = vld [vmem:[%s8048_s22 + $0x244] sm:$0xf]  ;;  %v7073_v9 = vld [vmem:[%s8048_s22 + $0x44] sm:$0xf0] }
  0xde   : > { %1529 = vmatpush.bf16.msra.mxu2 %v5639_v11  ;;  %v5515_v11 = vor.u32 %v7073_v9, %v5514_v8  ;;  %v5644_v8 = vld [vmem:[%s8048_s22 + $0x140] sm:$0xf0] }
  0xdf   : > { %v808_v39 = vadd.f32 %v799_v36, %v798_v35  ;;  %v8145_v47 = vsub.f32 %v755_v16, %v783_v44  ;;  %v8147_v48 = vsub.f32 %v756_v17, %v783_v44  ;;  %v7097_v16 = vld [vmem:[%s8048_s22 + $0x104] sm:$0xf0]  ;;  %v5802_v17 = vld [vmem:[%s8048_s22 + $0x270] sm:$0xf]  ;;  %v5587_v35 = vor.u32 %v7091_v29, %v5586_v28  ;;  %v7139_v36 = vld [vmem:[%s8048_s22 + $0x254] sm:$0xf0] }
  0xe0   : > { %v774_v40 = vpop.xlane.xlu1 %773  ;;  %v5803_v22 = vor.u32 %v7145_v19, %v5802_v17  ;;  %v5562_v44 = vld [vmem:[%s8048_s22 + $0x90] sm:$0xf]  ;;  %v5708_v19 = vld [vmem:[%s8048_s22 + $0x1c8] sm:$0xf0]  ;;  %v5491_v29 = vor.u32 %v7067_v25, %v5490_v24  ;;  %v7095_v24 = vld [vmem:[%s8048_s22 + $0xfc] sm:$0xf] }
  0xe1   : > { %v785_v42 = vmul.f32 %v8119_v26, %v774_v40  ;;  %809 = vadd.xlane.f32.xlu0 %v808_v39  ;;  %v796_v51 = vmul.f32 %v8145_v47, %v8145_v47  ;;  %v797_v52 = vmul.f32 %v8147_v48, %v8147_v48  ;;  %v5779_v39 = vor.u32 %v7139_v36, %v5778_v30  ;;  %v7115_v30 = vld [vmem:[%s8048_s22 + $0x194] sm:$0xf0]  ;;  %v5620_v25 = vld [vmem:[%s8048_s22 + $0x110] sm:$0xf0] }
  0xe2   : > { %1511 = vmatpush.bf16.msra.mxu1 %v5803_v22  ;;  %1530 = vmatpush.bf16.msra.mxu2 %v5615_v23  ;;  %v5591_v40 = vor.u32 %v7088_v37, %v5588_v38  ;;  %v5492_v38 = vld [vmem:[%s8048_s22 + $0x18] sm:$0xf0] }
  0xe3   : > { %v8141_v45 = vsub.f32 %v759_v14, %v785_v42  ;;  %v8143_v46 = vsub.f32 %v760_v15, %v785_v42  ;;  %v805_v54 = vadd.f32 %v797_v52, %v796_v51  ;;  %v5831_v14 = vor.u32 %v7148_v12, %v5828_v13  ;;  %v5610_v15 = vld [vmem:[%s8048_s22 + $0xf0] sm:$0xf]  ;;  %v5780_v42 = vld [vmem:[%s8048_s22 + $0x258] sm:$0xf0]  ;;  %v7133_v52 = vld [vmem:[%s8048_s22 + $0x224] sm:$0xf0] }
  0xe4   : > { %v5611_v18 = vor.u32 %v7097_v16, %v5610_v15  ;;  %v5783_v43 = vor.u32 %v7136_v41, %v5780_v42  ;;  %v7121_v12 = vld [vmem:[%s8048_s22 + $0x1c4] sm:$0xf0]  ;;  %v7070_v13 = vld [vmem:[%s8048_s22 + $0x34] sm:$0xf]  ;;  %v5684_v41 = vld [vmem:[%s8048_s22 + $0x198] sm:$0xf0] }
  0xe5   : > { %v800_v49 = vmul.f32 %v8141_v45, %v8141_v45  ;;  %v801_v50 = vmul.f32 %v8143_v46, %v8143_v46  ;;  %806 = vadd.xlane.f32.xlu2 %v805_v54  ;;  %1548 = vmatpush.bf16.msra.mxu3 %v5831_v14  ;;  %v5564_v54 = vld [vmem:[%s8048_s22 + $0xa8] sm:$0xf0]  ;;  %v5707_v16 = vor.u32 %v7121_v12, %v5706_v10 }
  0xe6   : > { %1492 = vmatpush.bf16.msra.mxu0 %v5611_v18  ;;  %1512 = vmatpush.bf16.msra.mxu1 %v5779_v39  ;;  %v5516_v14 = vld [vmem:[%s8048_s22 + $0x48] sm:$0xf0]  ;;  %v7118_v18 = vld [vmem:[%s8048_s22 + $0x1b4] sm:$0xf]  ;;  %v7112_v39 = vld [vmem:[%s8048_s22 + $0x184] sm:$0xf] }
  0xe7   : > { %v811_v53 = vadd.f32 %v801_v50, %v800_v49  ;;  %1531 = vmatpush.bf16.msra.mxu2 %v5591_v40  ;;  %v7085_v49 = vld [vmem:[%s8048_s22 + $0xa4] sm:$0xf0]  ;;  %v5754_v50 = vld [vmem:[%s8048_s22 + $0x210] sm:$0xf]  ;;  %v5519_v17 = vor.u32 %v7070_v13, %v5516_v14  ;;  %v5711_v22 = vor.u32 %v7118_v18, %v5708_v19  ;;  %v5687_v42 = vor.u32 %v7112_v39, %v5684_v41  ;;  %v7149_v12 = vld [vmem:[%s8048_s22 + $0x2ac] sm:$0xf] }
  0xe8   : > { %v5563_v51 = vor.u32 %v7085_v49, %v5562_v44  ;;  %v5755_v55 = vor.u32 %v7133_v52, %v5754_v50  ;;  %v7110_v44 = vld [vmem:[%s8048_s22 + $0x16c] sm:$0xf0]  ;;  %v5858_v49 = vld [vmem:[%s8048_s22 + $0x2d8] sm:$0xf]  ;;  %v5836_v13 = vld [vmem:[%s8048_s22 + $0x2c0] sm:$0xf0] }
  0xe9   : > { %812 = vadd.xlane.f32.xlu1 %v811_v53  ;;  %1549 = vmatpush.bf16.msra.mxu3 %v5807_v27  ;;  %v7082_v53 = vld [vmem:[%s8048_s22 + $0x94] sm:$0xf]  ;;  %v5682_v27 = vld [vmem:[%s8048_s22 + $0x180] sm:$0xf]  ;;  %v7158_v52 = vld [vmem:[%s8048_s22 + $0x2ec] sm:$0xf0]  ;;  %v5839_v18 = vor.u32 %v7149_v12, %v5836_v13 }
  0xea   : > { %1493 = vmatpush.bf16.msra.mxu0 %v5587_v35  ;;  %v5567_v56 = vor.u32 %v7082_v53, %v5564_v54  ;;  %1513 = vmatpush.bf16.msra.mxu1 %v5755_v55  ;;  %v7064_v35 = vld [vmem:[%s8048_s22 + $0x4] sm:$0xf]  ;;  %v5683_v37 = vor.u32 %v7115_v30, %v5682_v27  ;;  %v7107_v53 = vld [vmem:[%s8048_s22 + $0x15c] sm:$0xf]  ;;  %v5668_v54 = vld [vmem:[%s8048_s22 + $0x170] sm:$0xf0]  ;;  %v5859_v57 = vor.u32 %v7158_v52, %v5858_v49 }
  0xeb   : > { %v5495_v40 = vor.u32 %v7064_v35, %v5492_v38  ;;  %v5671_v58 = vor.u32 %v7107_v53, %v5668_v54  ;;  %v5810_v19 = vld [vmem:[%s8048_s22 + $0x278] sm:$0xf]  ;;  %v7143_v27 = vld [vmem:[%s8048_s22 + $0x27c] sm:$0xf]  ;;  %v5812_v30 = vld [vmem:[%s8048_s22 + $0x290] sm:$0xf0] }
  0xec   : > { %1532 = vmatpush.bf16.msra.mxu2 %v5567_v56  ;;  %v5594_v35 = vld [vmem:[%s8048_s22 + $0xc8] sm:$0xf]  ;;  %v5815_v38 = vor.u32 %v7143_v27, %v5812_v30  ;;  %v7092_v39 = vld [vmem:[%s8048_s22 + $0xdc] sm:$0xf0]  ;;  %v7089_v49 = vld [vmem:[%s8048_s22 + $0xcc] sm:$0xf] }
  0xed   : > { %1550 = vmatpush.bf16.msra.mxu3 %v5783_v43  ;;  %v5666_v43 = vld [vmem:[%s8048_s22 + $0x158] sm:$0xf]  ;;  %v761_v41 = vld [vmem:[%s9968_s15] sm:$0x3]  ;;  %v5596_v53 = vld [vmem:[%s8048_s22 + $0xe0] sm:$0xf0] }
  0xee   : > { %1494 = vmatpush.bf16.msra.mxu0 %v5563_v51  ;;  %1514 = vmatpush.bf16.msra.mxu1 %v5731_v3  ;;  %v5667_v51 = vor.u32 %v7110_v44, %v5666_v43  ;;  %v5595_v43 = vor.u32 %v7092_v39, %v5594_v35  ;;  %v7140_v44 = vld [vmem:[%s8048_s22 + $0x25c] sm:$0xf0]  ;;  %v7137_v54 = vld [vmem:[%s8048_s22 + $0x24c] sm:$0xf]  ;;  %v8302_v0 = vperm.slane %v761_v41, 1 }
  0xef   : > { %v7080_v30 = vld [vmem:[%s8048_s22 + $0x7c] sm:$0xf0]  ;;  %v5738_v35 = vld [vmem:[%s8048_s22 + $0x1e8] sm:$0xf]  ;;  %v5548_v39 = vld [vmem:[%s8048_s22 + $0x80] sm:$0xf0] }
  0xf0   : > { %1533 = vmatpush.bf16.msra.mxu2 %v5543_v4 }
  0xf1   : > { %1551 = vmatpush.bf16.msra.mxu3 %v5759_v59  ;;  %v7155_v59 = vld [vmem:[%s8048_s22 + $0x2dc] sm:$0xf] }
  0xf2   : > { %1495 = vmatpush.bf16.msra.mxu0 %v5539_v63  ;;  %1515 = vmatpush.bf16.msra.mxu1 %v5707_v16  ;;  %v5863_v63 = vor.u32 %v7155_v59, %v5860_v60  ;;  %v7098_v16 = vld [vmem:[%s8048_s22 + $0x10c] sm:$0xf0]  ;;  %v762_v59 = vld [vmem:[%s9969_s16] sm:$0x3] }
  0xf4   : > { %1534 = vmatpush.bf16.msra.mxu2 %v5519_v17 }
  0xf5   : > { %1552 = vmatpush.bf16.msra.mxu3 %v5735_v7  ;;  %v7101_v7 = vld [vmem:[%s8048_s22 + $0x12c] sm:$0xf] }
  0xf6   : > { %1496 = vmatpush.bf16.msra.mxu0 %v5515_v11  ;;  %1516 = vmatpush.bf16.msra.mxu1 %v5683_v37  ;;  %v5647_v11 = vor.u32 %v7101_v7, %v5644_v8  ;;  %v7086_v7 = vld [vmem:[%s8048_s22 + $0xac] sm:$0xf0]  ;;  %v5762_v8 = vld [vmem:[%s8048_s22 + $0x218] sm:$0xf] }
  0xf8   : > { %1535 = vmatpush.bf16.msra.mxu2 %v5495_v40  ;;  %v5786_v40 = vld [vmem:[%s8048_s22 + $0x248] sm:$0xf] }
  0xf9   : > { %1553 = vmatpush.bf16.msra.mxu3 %v5711_v22  ;;  %v5787_v52 = vor.u32 %v7140_v44, %v5786_v40  ;;  %v5740_v44 = vld [vmem:[%s8048_s22 + $0x200] sm:$0xf0] }
  0xfa   : > { %1497 = vmatpush.bf16.msra.mxu0 %v5491_v29  ;;  %1585 = vmatpush.bf16.msrb.mxu1 %v5859_v57  ;;  %v5623_v29 = vor.u32 %v7095_v24, %v5620_v25  ;;  %v5599_v57 = vor.u32 %v7089_v49, %v5596_v53  ;;  %v5546_v24 = vld [vmem:[%s8048_s22 + $0x68] sm:$0xf]  ;;  %v5522_v49 = vld [vmem:[%s8048_s22 + $0x38] sm:$0xf] }
  0xfb   : > { %v5714_v53 = vld [vmem:[%s8048_s22 + $0x1b8] sm:$0xf] }
  0xfc   : > { %1604 = vmatpush.bf16.msrb.mxu2 %v5671_v58  ;;  %v5788_v58 = vld [vmem:[%s8048_s22 + $0x260] sm:$0xf0] }
  0xfd   : > { %1554 = vmatpush.bf16.msra.mxu3 %v5687_v42 }
  0xfe   : > { %1566 = vmatpush.bf16.msrb.mxu0 %v5667_v51  ;;  %1586 = vmatpush.bf16.msrb.mxu1 %v5835_v6  ;;  %v5570_v6 = vld [vmem:[%s8048_s22 + $0x98] sm:$0xf] }
  0xff   : > { %v5571_v13 = vor.u32 %v7086_v7, %v5570_v6  ;;  %v5716_v6 = vld [vmem:[%s8048_s22 + $0x1d0] sm:$0xf0]  ;;  %v5498_v7 = vld [vmem:[%s8048_s22 + $0x8] sm:$0xf] }
 0x100   : > { %1605 = vmatpush.bf16.msrb.mxu2 %v5647_v11  ;;  %v8314_v11 = vperm.slane %v762_v59, 0 }
 0x101   : > { %1623 = vmatpush.bf16.msrb.mxu3 %v5863_v63  ;;  %v8300_v63 = vperm.slane %v761_v41, 0 }
 0x102   : > { %1567 = vmatpush.bf16.msrb.mxu0 %v5643_v5 }
 0x104   : > { %1606 = vmatpush.bf16.msrb.mxu2 %v5623_v29 }
 0x105   : > { %1624 = vmatpush.bf16.msrb.mxu3 %v5839_v18  ;;  %v5572_v18 = vld [vmem:[%s8048_s22 + $0xb0] sm:$0xf0] }
 0x108   : > { %1607 = vmatpush.bf16.msrb.mxu2 %v5599_v57 }
 0x109   : > { %1625 = vmatpush.bf16.msrb.mxu3 %v5815_v38  ;;  %v7077_v38 = vld [vmem:[%s8048_s22 + $0x6c] sm:$0xf] }
 0x150   : > { %v804_v20 = vpop.xlane.xlu2 %803 }
 0x151   : > { %v814_v23 = vmul.f32 %v804_v20, %v8119_v26  ;;  %v7146_v20 = vld [vmem:[%s8048_s22 + $0x28c] sm:$0xf0] }
 0x153   : > { %v8222_v36 = vadd.f32 1e-12, %v814_v23  ;;  %v5811_v23 = vor.u32 %v7146_v20, %v5810_v19  ;;  %v7131_v19 = vld [vmem:[%s8048_s22 + $0x21c] sm:$0xf] }
 0x154   : > { %v810_v15 = vpop.xlane.xlu0 %809 }
 0x155   : > { %v816_v21 = vmul.f32 %v810_v15, %v8119_v26  ;;  %v5618_v15 = vld [vmem:[%s8048_s22 + $0xf8] sm:$0xf]  ;;  %1587 = vmatpush.bf16.msrb.mxu1 %v5811_v23  ;;  %vm828_vm2 = vweird.f32 %v8222_v36  ;;  %v5764_v23 = vld [vmem:[%s8048_s22 + $0x230] sm:$0xf0] }
 0x156   : > { %v5619_v22 = vor.u32 %v7098_v16, %v5618_v15  ;;  %v8321_v15 = vperm.slane %v762_v59, 1 }
 0x157   : > { %v8218_v28 = vadd.f32 1e-12, %v816_v21 }
 0x158   : > { %v807_v56 = vpop.xlane.xlu2 %806  ;;  %1568 = vmatpush.bf16.msrb.mxu0 %v5619_v22 }
 0x159   : > { %7547 = vrsqrt.f32 %v8218_v28  ;;  %v815_v62 = vmul.f32 %v807_v56, %v8119_v26  ;;  %1588 = vmatpush.bf16.msrb.mxu1 %v5787_v52  ;;  %v7074_v52 = vld [vmem:[%s8048_s22 + $0x4c] sm:$0xf0]  ;;  %vm848_vm7 = vweird.f32 %v8218_v28 }
 0x15a   : > { %7549 = vrsqrt.f32 %v8222_v36  ;;  %v5523_v59 = vor.u32 %v7074_v52, %v5522_v49  ;;  %v7105_v52 = vld [vmem:[%s8048_s22 + $0x144] sm:$0xf0] }
 0x15b   : > { %v8251_v10 = vadd.f32 1e-12, %v815_v62  ;;  %v5791_v62 = vor.u32 %v7137_v54, %v5788_v58  ;;  %v7122_v54 = vld [vmem:[%s8048_s22 + $0x1cc] sm:$0xf0] }
 0x15c   : > { %v813_v50 = vpop.xlane.xlu1 %812  ;;  %1569 = vmatpush.bf16.msrb.mxu0 %v5595_v43  ;;  %v7125_v43 = vld [vmem:[%s8048_s22 + $0x1ec] sm:$0xf] }
 0x15d   : > { %v817_v55 = vmul.f32 %v813_v50, %v8119_v26  ;;  %1626 = vmatpush.bf16.msrb.mxu3 %v5791_v62  ;;  %vm838_vm5 = vweird.f32 %v8251_v10  ;;  %v7119_v62 = vld [vmem:[%s8048_s22 + $0x1bc] sm:$0xf] }
 0x15f   : > { %v8243_v3 = vpop.eup %7547  ;;  %v8245_v4 = vadd.f32 1e-12, %v817_v55 }
 0x160   : > { %v8249_v9 = vpop.eup %7549  ;;  %v843_v17 = vmul.f32 %v8243_v3, %v8218_v28  ;;  %1570 = vmatpush.bf16.msrb.mxu0 %v5571_v13  ;;  %vm849_vm10 = vweird.f32 %v8243_v3  ;;  %v7111_v28 = vld [vmem:[%s8048_s22 + $0x174] sm:$0xf0] }
 0x161   : > { %v823_v14 = vmul.f32 %v8249_v9, %v8222_v36  ;;  %7551 = vrsqrt.f32 %v8245_v4  ;;  %vm829_vm1 = vweird.f32 %v8249_v9  ;;  %vm858_vm8 = vweird.f32 %v8245_v4  ;;  %vm850_vm12 = vmor %vm848_vm7, %vm849_vm10 }
 0x162   : > { %7553 = vrsqrt.f32 %v8251_v10  ;;  %v844_v42 = vmul.f32 %v8243_v3, %v843_v17  ;;  %vm830_vm3 = vmor %vm828_vm2, %vm829_vm1  ;;  %vm1998_vm1 = vcmask 1043968  }
 0x163   : > { %v824_v21 = vmul.f32 %v8249_v9, %v823_v14  ;;  %v7083_v14 = vld [vmem:[%s8048_s22 + $0x9c] sm:$0xf] }
 0x164   : > { %v8306_v1 = vmul.f32 0.5, %v844_v42  ;;  %v5575_v22 = vor.u32 %v7083_v14, %v5572_v18  ;;  %v5551_v42 = vor.u32 %v7077_v38, %v5548_v39  ;;  %v7065_v14 = vld [vmem:[%s8048_s22 + $0xc] sm:$0xf]  ;;  %v7159_v38 = vld [vmem:[%s8048_s22 + $0x2f4] sm:$0xf0] }
 0x165   : > { %v825_v37 = vmul.f32 0.5, %v824_v21  ;;  %v7108_v39 = vld [vmem:[%s8048_s22 + $0x164] sm:$0xf] }
 0x166   : > { %v846_v21 = vsub.f32 1.5, %v8306_v1  ;;  %1608 = vmatpush.bf16.msrb.mxu2 %v5575_v22  ;;  %v5692_v22 = vld [vmem:[%s8048_s22 + $0x1a0] sm:$0xf0] }
 0x167   : > { %v8281_v50 = vpop.eup %7551  ;;  %v826_v51 = vsub.f32 1.5, %v825_v37  ;;  %v7128_v37 = vld [vmem:[%s8048_s22 + $0x1fc] sm:$0xf0] }
 0x168   : > { %v8286_v55 = vpop.eup %7553  ;;  %v853_v56 = vmul.f32 %v8281_v50, %v8245_v4  ;;  %v5739_v41 = vor.u32 %v7128_v37, %v5738_v35  ;;  %vm859_vm9 = vweird.f32 %v8281_v50  ;;  %v5866_v35 = vld [vmem:[%s8048_s22 + $0x2e0] sm:$0xf] }
 0x169   : > { %v827_v60 = vmul.f32 %v8249_v9, %v826_v51  ;;  %v833_v61 = vmul.f32 %v8286_v55, %v8251_v10  ;;  %vm839_vm4 = vweird.f32 %v8286_v55  ;;  %v5767_v10 = vor.u32 %v7131_v19, %v5764_v23  ;;  %v5500_v19 = vld [vmem:[%s8048_s22 + $0x20] sm:$0xf0]  ;;  %vm860_vm11 = vmor %vm858_vm8, %vm859_vm9 }
 0x16a   : > { %v854_v2 = vmul.f32 %v8281_v50, %v853_v56  ;;  %vm8334_vm6 = vmor %vm838_vm5, %vm839_vm4  ;;  %v5743_v51 = vor.u32 %v7125_v43, %v5740_v44  ;;  %1609 = vmatpush.bf16.msrb.mxu2 %v5551_v42  ;;  %v5503_v4 = vor.u32 %v7065_v14, %v5500_v19  ;;  %v7156_v42 = vld [vmem:[%s8048_s22 + $0x2e4] sm:$0xf]  ;;  %v5650_v43 = vld [vmem:[%s8048_s22 + $0x130] sm:$0xf] }
 0x16b   : > { %v831_v36 = vsel %vm830_vm3, %v8249_v9, %v827_v60  ;;  %v834_v5 = vmul.f32 %v8286_v55, %v833_v61  ;;  %v7134_v9 = vld [vmem:[%s8048_s22 + $0x22c] sm:$0xf0]  ;;  %1627 = vmatpush.bf16.msrb.mxu3 %v5767_v10  ;;  %v7071_v60 = vld [vmem:[%s8048_s22 + $0x3c] sm:$0xf]  ;;  %v5524_v61 = vld [vmem:[%s8048_s22 + $0x50] sm:$0xf0] }
 0x16c   : > { %v8316_v12 = vmul.f32 0.5, %v854_v2  ;;  %v5763_v17 = vor.u32 %v7134_v9, %v5762_v8  ;;  %v862_v20 = vmul.f32 %v831_v36, %v8127_v33  ;;  %v863_v25 = vmul.f32 %v831_v36, %v8129_v34  ;;  %v7068_v8 = vld [vmem:[%s8048_s22 + $0x1c] sm:$0xf0]  ;;  %v5794_v19 = vld [vmem:[%s8048_s22 + $0x250] sm:$0xf] }
 0x16d   : > { %v835_v16 = vmul.f32 0.5, %v834_v5  ;;  %v5547_v34 = vor.u32 %v7080_v30, %v5546_v24  ;;  %v5715_v36 = vor.u32 %v7122_v54, %v5714_v53  ;;  %v5527_v5 = vor.u32 %v7071_v60, %v5524_v61  ;;  %v5674_v30 = vld [vmem:[%s8048_s22 + $0x160] sm:$0xf]  ;;  %v5842_v53 = vld [vmem:[%s8048_s22 + $0x2b0] sm:$0xf] }
 0x16e   : > { %v856_v27 = vsub.f32 1.5, %v8316_v12  ;;  %1589 = vmatpush.bf16.msrb.mxu1 %v5763_v17  ;;  %v875_v56 = vmul.f32 %v8300_v63, %v862_v20  ;;  %v876_v57 = vmul.f32 %v8302_v0, %v863_v25  ;;  %v5499_v9 = vor.u32 %v7068_v8, %v5498_v7  ;;  %v7113_v20 = vld [vmem:[%s8048_s22 + $0x18c] sm:$0xf]  ;;  %v7153_v54 = vld [vmem:[%s8048_s22 + $0x2c4] sm:$0xf0] }
 0x16f   : > { %v836_v29 = vsub.f32 1.5, %v835_v16  ;;  %1571 = vmatpush.bf16.msrb.mxu0 %v5547_v34  ;;  %1628 = vmatpush.bf16.msrb.mxu3 %v5743_v51  ;;  %v847_v16 = vmul.f32 %v8243_v3, %v846_v21  ;;  %v5695_v33 = vor.u32 %v7113_v20, %v5692_v22  ;;  %v5675_v37 = vor.u32 %v7111_v28, %v5674_v30  ;;  %v7141_v20 = vld [vmem:[%s8048_s22 + $0x264] sm:$0xf0] }
 0x170   : > { %v857_v17 = vmul.f32 %v8281_v50, %v856_v27  ;;  %v888_v23 = vadd.f32 %v8314_v11, %v875_v56  ;;  %v889_v24 = vadd.f32 %v8321_v15, %v876_v57  ;;  %1610 = vmatpush.bf16.msrb.mxu2 %v5527_v5  ;;  %v5651_v57 = vor.u32 %v7105_v52, %v5650_v43  ;;  %v7147_v5 = vld [vmem:[%s8048_s22 + $0x294] sm:$0xf0]  ;;  %v5554_v43 = vld [vmem:[%s8048_s22 + $0x70] sm:$0xf] }
 0x171   : > { %v837_v40 = vmul.f32 %v8286_v55, %v836_v29  ;;  %v851_v34 = vsel %vm850_vm12, %v8243_v3, %v847_v16  ;;  %v5868_v3 = vld [vmem:[%s8048_s22 + $0x2f8] sm:$0xf0]  ;;  %v5746_v52 = vld [vmem:[%s8048_s22 + $0x1f0] sm:$0xf] }
 0x172   : > { %1590 = vmatpush.bf16.msrb.mxu1 %v5739_v41  ;;  %v861_v10 = vsel %vm860_vm11, %v8281_v50, %v857_v17  ;;  %v5676_v50 = vld [vmem:[%s8048_s22 + $0x178] sm:$0xf0]  ;;  %v5871_v51 = vor.u32 %v7156_v42, %v5868_v3  ;;  %v866_v56 = vmul.f32 %v851_v34, %v8123_v31  ;;  %v867_v60 = vmul.f32 %v851_v34, %v8125_v32  ;;  %v5626_v31 = vld [vmem:[%s8048_s22 + $0x100] sm:$0xf]  ;;  %v7144_v32 = vld [vmem:[%s8048_s22 + $0x284] sm:$0xf] }
 0x173   : > { %v841_v58 = vsel %vm8334_vm6, %v8286_v55, %v837_v40  ;;  %v5690_v55 = vld [vmem:[%s8048_s22 + $0x188] sm:$0xf]  ;;  %1572 = vmatpush.bf16.msrb.mxu0 %v5523_v59  ;;  %v5867_v40 = vor.u32 %v7159_v38, %v5866_v35  ;;  %v5679_v41 = vor.u32 %v7108_v39, %v5676_v50  ;;  %v868_v44 = vmul.f32 %v861_v10, %v8141_v45  ;;  %v7150_v59 = vld [vmem:[%s8048_s22 + $0x2b4] sm:$0xf]  ;;  %v5770_v38 = vld [vmem:[%s8048_s22 + $0x220] sm:$0xf] }
 0x174   : > { %v864_v1 = vmul.f32 %v841_v58, %v8145_v47  ;;  %v865_v2 = vmul.f32 %v841_v58, %v8147_v48  ;;  %v5719_v47 = vor.u32 %v7119_v62, %v5716_v6  ;;  %v7116_v48 = vld [vmem:[%s8048_s22 + $0x19c] sm:$0xf0]  ;;  %v869_v49 = vmul.f32 %v861_v10, %v8143_v46  ;;  %1611 = vmatpush.bf16.msrb.mxu2 %v5503_v4  ;;  %v7102_v58 = vld [vmem:[%s8048_s22 + $0x134] sm:$0xf]  ;;  %v5652_v46 = vld [vmem:[%s8048_s22 + $0x148] sm:$0xf0] }
 0x175   : > { %v5691_v18 = vor.u32 %v7116_v48, %v5690_v55  ;;  %v5843_v45 = vor.u32 %v7153_v54, %v5842_v53  ;;  %v5655_v61 = vor.u32 %v7102_v58, %v5652_v46  ;;  %v5844_v62 = vld [vmem:[%s8048_s22 + $0x2c8] sm:$0xf0]  ;;  %v7096_v6 = vld [vmem:[%s8048_s22 + $0x104] sm:$0xf]  ;;  %v881_v7 = vmul.f32 %v8300_v63, %v868_v44  ;;  %v5820_v55 = vld [vmem:[%s8048_s22 + $0x298] sm:$0xf0] }
 0x176   : > { %v877_v12 = vmul.f32 %v8300_v63, %v864_v1  ;;  %v878_v13 = vmul.f32 %v8302_v0, %v865_v2  ;;  %1591 = vmatpush.bf16.msrb.mxu1 %v5715_v36  ;;  %1629 = vmatpush.bf16.msrb.mxu3 %v5719_v47  ;;  %v7099_v1 = vld [vmem:[%s8048_s22 + $0x114] sm:$0xf0]  ;;  %v5847_v2 = vor.u32 %v7150_v59, %v5844_v62  ;;  %v5818_v36 = vld [vmem:[%s8048_s22 + $0x280] sm:$0xf]  ;;  %v5628_v47 = vld [vmem:[%s8048_s22 + $0x118] sm:$0xf0] }
 0x177   : > { %1573 = vmatpush.bf16.msrb.mxu0 %v5499_v9  ;;  %v882_v8 = vmul.f32 %v8302_v0, %v869_v49  ;;  %v879_v48 = vmul.f32 %v8300_v63, %v866_v56  ;;  %v5602_v9 = vld [vmem:[%s8048_s22 + $0xd0] sm:$0xf]  ;;  %v880_v14 = vmul.f32 %v8302_v0, %v867_v60  ;;  %v5631_v16 = vor.u32 %v7096_v6, %v5628_v47  ;;  %v5796_v4 = vld [vmem:[%s8048_s22 + $0x268] sm:$0xf0]  ;;  %v7135_v39 = vld [vmem:[%s8048_s22 + $0x234] sm:$0xf0] }
 0x178   : > { %v890_v21 = vadd.f32 %v8314_v11, %v877_v12  ;;  %v891_v25 = vadd.f32 %v8321_v15, %v878_v13  ;;  %v5627_v12 = vor.u32 %v7099_v1, %v5626_v31  ;;  %v5819_v13 = vor.u32 %v7147_v5, %v5818_v36  ;;  %v7084_v50 = vld [vmem:[%s8048_s22 + $0xa4] sm:$0xf]  ;;  %v5772_v3 = vld [vmem:[%s8048_s22 + $0x238] sm:$0xf0]  ;;  %v7129_v53 = vld [vmem:[%s8048_s22 + $0x204] sm:$0xf0] }
 0x179   : > { %v5823_v17 = vor.u32 %v7144_v32, %v5820_v55  ;;  %v894_v63 = vadd.f32 %v8314_v11, %v881_v7  ;;  %v895_v22 = vadd.f32 %v8321_v15, %v882_v8  ;;  %v5795_v0 = vor.u32 %v7141_v20, %v5794_v19  ;;  %v7132_v42 = vld [vmem:[%s8048_s22 + $0x224] sm:$0xf]  ;;  %v7126_v58 = vld [vmem:[%s8048_s22 + $0x1f4] sm:$0xf]  ;;  %v5748_v46 = vld [vmem:[%s8048_s22 + $0x208] sm:$0xf0] }
 0x17a   : > { %v8389_v27 = vpack.c.bf16 %v890_v21, %v888_v23  ;;  %v8391_v29 = vpack.c.bf16 %v891_v25, %v889_v24  ;;  %1592 = vmatpush.bf16.msrb.mxu1 %v5691_v18  ;;  %1630 = vmatpush.bf16.msrb.mxu3 %v5695_v33  ;;  %v7093_v18 = vld [vmem:[%s8048_s22 + $0xe4] sm:$0xf0]  ;;  %v7090_v23 = vld [vmem:[%s8048_s22 + $0xd4] sm:$0xf]  ;;  %v5604_v21 = vld [vmem:[%s8048_s22 + $0xe8] sm:$0xf0]  ;;  %v892_v33 = vadd.f32 %v8314_v11, %v879_v48 }
 0x17b   : > { %v5603_v24 = vor.u32 %v7093_v18, %v5602_v9  ;;  %v7138_v25 = vld [vmem:[%s8048_s22 + $0x254] sm:$0xf]  ;;  %v893_v10 = vadd.f32 %v8321_v15, %v880_v14  ;;  %v5607_v35 = vor.u32 %v7090_v23, %v5604_v21  ;;  %v7087_v11 = vld [vmem:[%s8048_s22 + $0xb4] sm:$0xf0]  ;;  %v5775_v49 = vor.u32 %v7132_v42, %v5772_v3  ;;  %v5530_v59 = vld [vmem:[%s8048_s22 + $0x40] sm:$0xf] }
 0x17c   : > { %1498 = vmatmul.bf16.vlgmr.msra.gmra.mxu0 %v8389_v27  ;;  %1517 = vmatmul.bf16.vlgmr.msra.gmra.mxu1 %v8391_v29  ;;  %v8443_v30 = vpack.c.bf16 %v894_v63, %v892_v33  ;;  %v5799_v34 = vor.u32 %v7138_v25, %v5796_v4  ;;  %v5747_v56 = vor.u32 %v7129_v53, %v5746_v52  ;;  %v7075_v60 = vld [vmem:[%s8048_s22 + $0x54] sm:$0xf0]  ;;  %v5532_v36 = vld [vmem:[%s8048_s22 + $0x58] sm:$0xf0]  ;;  %v7120_v7 = vld [vmem:[%s8048_s22 + $0x1c4] sm:$0xf] }
 0x17d   : > { %1536 = vmatmul.bf16.vlgmr.msra.gmra.mxu2 %v8389_v27  ;;  %1555 = vmatmul.bf16.vlgmr.msra.gmra.mxu3 %v8391_v29  ;;  %v8445_v28 = vpack.c.bf16 %v895_v22, %v893_v10  ;;  %v7123_v62 = vld [vmem:[%s8048_s22 + $0x1d4] sm:$0xf0]  ;;  %v5751_v1 = vor.u32 %v7126_v58, %v5748_v46  ;;  %v5531_v5 = vor.u32 %v7075_v60, %v5530_v59  ;;  %v5724_v8 = vld [vmem:[%s8048_s22 + $0x1d8] sm:$0xf0]  ;;  %v5506_v47 = vld [vmem:[%s8048_s22 + $0x10] sm:$0xf] }
 0x17e   : > { %1642 = vmatpush.bf16.msra.mxu0 %v5675_v37  ;;  %1661 = vmatpush.bf16.msra.mxu1 %v5867_v40  ;;  %v5578_v37 = vld [vmem:[%s8048_s22 + $0xa0] sm:$0xf]  ;;  %v5580_v40 = vld [vmem:[%s8048_s22 + $0xb8] sm:$0xf0]  ;;  %v7069_v32 = vld [vmem:[%s8048_s22 + $0x24] sm:$0xf0] }
 0x17f   : > { %1680 = vmatpush.bf16.msra.mxu2 %v5679_v41  ;;  %1699 = vmatpush.bf16.msra.mxu3 %v5871_v51  ;;  %v5579_v15 = vor.u32 %v7087_v11, %v5578_v37  ;;  %v5771_v41 = vor.u32 %v7135_v39, %v5770_v38  ;;  %v5583_v44 = vor.u32 %v7084_v50, %v5580_v40  ;;  %v7081_v51 = vld [vmem:[%s8048_s22 + $0x84] sm:$0xf0]  ;;  %v5698_v55 = vld [vmem:[%s8048_s22 + $0x190] sm:$0xf]  ;;  %v7066_v9 = vld [vmem:[%s8048_s22 + $0x14] sm:$0xf] }
 0x180   : > { %v5555_v54 = vor.u32 %v7081_v51, %v5554_v43  ;;  %v7117_v48 = vld [vmem:[%s8048_s22 + $0x1a4] sm:$0xf0]  ;;  %v5507_v14 = vor.u32 %v7069_v32, %v5506_v47  ;;  %v7114_v18 = vld [vmem:[%s8048_s22 + $0x194] sm:$0xf]  ;;  %v5700_v19 = vld [vmem:[%s8048_s22 + $0x1a8] sm:$0xf0] }
 0x181   : > { %v5703_v63 = vor.u32 %v7114_v18, %v5700_v19  ;;  %v8500_v22 = vld [vmem:[%s8092_s3] sm:$0x3f]  ;;  %s7869_s3 = smov 64  }
 0x182   : > { %1643 = vmatpush.bf16.msra.mxu0 %v5651_v57  ;;  %1662 = vmatpush.bf16.msra.mxu1 %v5843_v45  ;;  %v7078_v57 = vld [vmem:[%s8048_s22 + $0x74] sm:$0xf]  ;;  %v5556_v45 = vld [vmem:[%s8048_s22 + $0x88] sm:$0xf0] }
 0x183   : > { %1681 = vmatpush.bf16.msra.mxu2 %v5655_v61  ;;  %1700 = vmatpush.bf16.msra.mxu3 %v5847_v2  ;;  %v5722_v61 = vld [vmem:[%s8048_s22 + $0x1c0] sm:$0xf]  ;;  %v5559_v31 = vor.u32 %v7078_v57, %v5556_v45  ;;  %v7072_v2 = vld [vmem:[%s8048_s22 + $0x44] sm:$0xf] }
 0x184   : > { %v5723_v6 = vor.u32 %v7123_v62, %v5722_v61 }
 0x186   : > { %1644 = vmatpush.bf16.msra.mxu0 %v5627_v12  ;;  %1663 = vmatpush.bf16.msra.mxu1 %v5819_v13  ;;  %v5535_v12 = vor.u32 %v7072_v2, %v5532_v36  ;;  %v5727_v13 = vor.u32 %v7120_v7, %v5724_v8 }
 0x187   : > { %1682 = vmatpush.bf16.msra.mxu2 %v5631_v16  ;;  %1701 = vmatpush.bf16.msra.mxu3 %v5823_v17  ;;  %v5699_v16 = vor.u32 %v7117_v48, %v5698_v55  ;;  %v5508_v17 = vld [vmem:[%s8048_s22 + $0x28] sm:$0xf0]  ;;  %s9972_s22 = sld [smem:[#allocation20_spill]] }
 0x188   : > { %v5511_v20 = vor.u32 %v7066_v9, %v5508_v17 }
 0x18a   : > { %1645 = vmatpush.bf16.msra.mxu0 %v5603_v24  ;;  %1664 = vmatpush.bf16.msra.mxu1 %v5795_v0  ;;  %v998_v0 = vperm.slane %v8500_v22, 0 }
 0x18b   : > { %1683 = vmatpush.bf16.msra.mxu2 %v5607_v35  ;;  %1702 = vmatpush.bf16.msra.mxu3 %v5799_v34  ;;  %v8504_v35 = vperm.slane %v8500_v22, 1 }
 0x18c   : > { %1503 = vmatmul.bf16.gmra.mxu0 %v8443_v30  ;;  %1522 = vmatmul.bf16.gmra.mxu1 %v8445_v28 }
 0x18d   : > { %1541 = vmatmul.bf16.gmra.mxu2 %v8443_v30  ;;  %1560 = vmatmul.bf16.gmra.mxu3 %v8445_v28 }
 0x18e   : > { %1646 = vmatpush.bf16.msra.mxu0 %v5579_v15  ;;  %1665 = vmatpush.bf16.msra.mxu1 %v5771_v41 }
 0x18f   : > { %1684 = vmatpush.bf16.msra.mxu2 %v5583_v44  ;;  %1703 = vmatpush.bf16.msra.mxu3 %v5775_v49 }
 0x192   : > { %1647 = vmatpush.bf16.msra.mxu0 %v5555_v54  ;;  %1666 = vmatpush.bf16.msra.mxu1 %v5747_v56  ;;  %v1000_v54 = vperm.slane %v8500_v22, 2 }
 0x193   : > { %1685 = vmatpush.bf16.msra.mxu2 %v5559_v31  ;;  %1704 = vmatpush.bf16.msra.mxu3 %v5751_v1 }
 0x196   : > { %1648 = vmatpush.bf16.msra.mxu0 %v5531_v5  ;;  %1667 = vmatpush.bf16.msra.mxu1 %v5723_v6 }
 0x197   : > { %1686 = vmatpush.bf16.msra.mxu2 %v5535_v12  ;;  %1705 = vmatpush.bf16.msra.mxu3 %v5727_v13  ;;  %v1001_v12 = vperm.slane %v8500_v22, 3 }
 0x19a   : > { %1649 = vmatpush.bf16.msra.mxu0 %v5507_v14  ;;  %1668 = vmatpush.bf16.msra.mxu1 %v5699_v16 }
 0x19b   : > { %1687 = vmatpush.bf16.msra.mxu2 %v5511_v20  ;;  %1706 = vmatpush.bf16.msra.mxu3 %v5703_v63 }
 0x19c   : > { %1574 = vmatmul.bf16.vlgmr.msrb.gmra.mxu0 %v8389_v27  ;;  %1593 = vmatmul.bf16.vlgmr.msrb.gmra.mxu1 %v8391_v29 }
 0x19d   : > { %1612 = vmatmul.bf16.vlgmr.msrb.gmra.mxu2 %v8389_v27  ;;  %1631 = vmatmul.bf16.vlgmr.msrb.gmra.mxu3 %v8391_v29 }
 0x1ac   : > { %1579 = vmatmul.bf16.gmra.mxu0 %v8443_v30  ;;  %1598 = vmatmul.bf16.gmra.mxu1 %v8445_v28 }
 0x1ad   : > { %1617 = vmatmul.bf16.gmra.mxu2 %v8443_v30  ;;  %1636 = vmatmul.bf16.gmra.mxu3 %v8445_v28 }
 0x1bc   : > { %1650 = vmatmul.bf16.vlgmr.msra.gmra.mxu0 %v8389_v27  ;;  %1669 = vmatmul.bf16.vlgmr.msra.gmra.mxu1 %v8391_v29 }
 0x1bd   : > { %1688 = vmatmul.bf16.vlgmr.msra.gmra.mxu2 %v8389_v27  ;;  %1707 = vmatmul.bf16.vlgmr.msra.gmra.mxu3 %v8391_v29 }
 0x1cc   : > { %1655 = vmatmul.bf16.gmra.mxu0 %v8443_v30  ;;  %1674 = vmatmul.bf16.gmra.mxu1 %v8445_v28 }
 0x1cd   : > { %1693 = vmatmul.bf16.gmra.mxu2 %v8443_v30  ;;  %1712 = vmatmul.bf16.gmra.mxu3 %v8445_v28 }
 0x1f9   : > { %v1499_v23 = vpop.f32.mrf.mxu0  ;;  %v1518_v24 = vpop.f32.mrf.mxu1 }
 0x1fa   : > { %v1500_v21 = vadd.f32 %v1499_v23, %v998_v0 }
 0x1fc   : > { %v1519_v10 = vadd.f32 %v1518_v24, %v1500_v21 }
 0x200   : > { %v1537_v25 = vpop.f32.mrf.mxu2  ;;  %v1556_v4 = vpop.f32.mrf.mxu3 }
 0x201   : > { %v1501_v27 = vpop.f32.mrf.mxu0  ;;  %v1520_v33 = vpop.f32.mrf.mxu1  ;;  %v1538_v28 = vadd.f32 %v1537_v25, %v8504_v35 }
 0x202   : > { %v1502_v29 = vadd.f32 %v1501_v27, %v998_v0 }
 0x203   : > { %v1557_v40 = vadd.f32 %v1556_v4, %v1538_v28 }
 0x204   : > { %v1521_v34 = vadd.f32 %v1520_v33, %v1502_v29 }
 0x206   : > { %v8506_v30 = vpack.c.bf16 %v1521_v34, %v1519_v10 }
 0x208   : > { %v1539_v37 = vpop.f32.mrf.mxu2  ;;  %v1558_v11 = vpop.f32.mrf.mxu3  ;;  %1850 = vrot.lane.b32.xlu1 %v8506_v30, %s7869_s3 }
 0x209   : > { %v1540_v38 = vadd.f32 %v1539_v37, %v8504_v35  ;;  %v1504_v15 = vpop.f32.mrf.mxu0  ;;  %v1523_v39 = vpop.f32.mrf.mxu1 }
 0x20a   : > { %v1505_v16 = vadd.f32 %v1504_v15, %v998_v0 }
 0x20b   : > { %v1559_v50 = vadd.f32 %v1558_v11, %v1540_v38 }
 0x20c   : > { %v1524_v4 = vadd.f32 %v1523_v39, %v1505_v16 }
 0x20d   : > { %v8512_v41 = vpack.c.bf16 %v1559_v50, %v1557_v40 }
 0x210   : > { %v1542_v42 = vpop.f32.mrf.mxu2  ;;  %v8514_v3 = vpop.f32.mrf.mxu3  ;;  %2129 = vrot.lane.b32.xlu1 %v8512_v41, %s7869_s3 }
 0x211   : > { %v1506_v43 = vpop.f32.mrf.mxu0  ;;  %v1525_v44 = vpop.f32.mrf.mxu1 }
 0x212   : > { %v1507_v13 = vadd.f32 %v1506_v43, %v998_v0  ;;  %v1543_v0 = vadd.f32 %v1542_v42, %v8504_v35  ;;  %v1002_v42 = vperm.slane %v8500_v22, 4 }
 0x214   : > { %v1526_v24 = vadd.f32 %v1525_v44, %v1507_v13  ;;  %v1562_v43 = vadd.f32 %v8514_v3, %v1543_v0 }
 0x216   : > { %v1722_v10 = vpack.c.bf16 %v1526_v24, %v1524_v4 }
 0x218   : > { %v1544_v49 = vpop.f32.mrf.mxu2  ;;  %v1563_v51 = vpop.f32.mrf.mxu3 }
 0x219   : > { %v1575_v52 = vpop.f32.mrf.mxu0  ;;  %v1594_v53 = vpop.f32.mrf.mxu1  ;;  %v1545_v27 = vadd.f32 %v1544_v49, %v8504_v35 }
 0x21a   : > { %v1576_v56 = vadd.f32 %v1575_v52, %v1000_v54 }
 0x21b   : > { %v1564_v38 = vadd.f32 %v1563_v51, %v1545_v27 }
 0x21c   : > { %v1595_v60 = vadd.f32 %v1594_v53, %v1576_v56 }
 0x21d   : > { %v2004_v44 = vpack.c.bf16 %v1564_v38, %v1562_v43 }
 0x220   : > { %v1613_v57 = vpop.f32.mrf.mxu2  ;;  %v1632_v45 = vpop.f32.mrf.mxu3 }
 0x221   : > { %v1577_v58 = vpop.f32.mrf.mxu0  ;;  %v1596_v46 = vpop.f32.mrf.mxu1  ;;  %v1614_v34 = vadd.f32 %v1613_v57, %v1001_v12 }
 0x222   : > { %v1578_v59 = vadd.f32 %v1577_v58, %v1000_v54 }
 0x223   : > { %v1633_v35 = vadd.f32 %v1632_v45, %v1614_v34 }
 0x224   : > { %v1597_v61 = vadd.f32 %v1596_v46, %v1578_v59 }
 0x226   : > { %v1723_v62 = vpack.c.bf16 %v1597_v61, %v1595_v60 }
 0x228   : > { %v1615_v31 = vpop.f32.mrf.mxu2  ;;  %v1634_v1 = vpop.f32.mrf.mxu3  ;;  %1856 = vrot.lane.b32.xlu0 %v1723_v62, %s7869_s3  ;;  %v1735_v11 = vsel %vm1727_vm13, %v1723_v62, 0 }
 0x229   : > { %v1580_v2 = vpop.f32.mrf.mxu0  ;;  %v1599_v36 = vpop.f32.mrf.mxu1  ;;  %v1616_v33 = vadd.f32 %v1615_v31, %v1001_v12 }
 0x22a   : > { %v1581_v5 = vadd.f32 %v1580_v2, %v1000_v54 }
 0x22b   : > { %v1635_v15 = vadd.f32 %v1634_v1, %v1616_v33 }
 0x22c   : > { %v1600_v55 = vadd.f32 %v1599_v36, %v1581_v5  ;;  %v1003_v36 = vperm.slane %v8500_v22, 5 }
 0x22d   : > { %v2005_v49 = vpack.c.bf16 %v1635_v15, %v1633_v35 }
 0x22f   : > { %v2016_v3 = vsel %vm1727_vm13, %v2005_v49, 0 }
 0x230   : > { %v1618_v6 = vpop.f32.mrf.mxu2  ;;  %v1637_v7 = vpop.f32.mrf.mxu3 }
 0x231   : > { %v1582_v8 = vpop.f32.mrf.mxu0  ;;  %v1601_v47 = vpop.f32.mrf.mxu1  ;;  %v1619_v14 = vadd.f32 %v1618_v6, %v1001_v12 }
 0x232   : > { %v1583_v32 = vadd.f32 %v1582_v8, %v1000_v54 }
 0x233   : > { %v1638_v21 = vadd.f32 %v1637_v7, %v1619_v14 }
 0x234   : > { %v1602_v48 = vadd.f32 %v1601_v47, %v1583_v32 }
 0x236   : > { %v1724_v9 = vpack.c.bf16 %v1602_v48, %v1600_v55 }
 0x238   : > { %v1620_v17 = vpop.f32.mrf.mxu2  ;;  %v1639_v18 = vpop.f32.mrf.mxu3  ;;  %1858 = vrot.lane.b32.xlu2 %v1724_v9, %s7869_s3  ;;  %v1738_v19 = vsel %vm1727_vm13, %v1724_v9, 0 }
 0x239   : > { %v1621_v20 = vadd.f32 %v1620_v17, %v1001_v12  ;;  %v1651_v63 = vpop.f32.mrf.mxu0  ;;  %v1670_v23 = vpop.f32.mrf.mxu1  ;;  %1746 = vmatpush.bf16.xpose.msrb.mxu0 %v1738_v19 }
 0x23a   : > { %v1652_v53 = vadd.f32 %v1651_v63, %v1002_v42 }
 0x23b   : > { %v1640_v25 = vadd.f32 %v1639_v18, %v1621_v20 }
 0x23c   : > { %v1671_v45 = vadd.f32 %v1670_v23, %v1652_v53 }
 0x23d   : > { %v2006_v29 = vpack.c.bf16 %v1640_v25, %v1638_v21 }
 0x23f   : > { %2137 = vrot.lane.b32.xlu0 %v2006_v29, %s7869_s3  ;;  %v2019_v40 = vsel %vm1727_vm13, %v2006_v29, 0  ;;  %v1718_v29 = vlaneseq }
 0x240   : > { %v1689_v28 = vpop.f32.mrf.mxu2  ;;  %v1708_v37 = vpop.f32.mrf.mxu3  ;;  %1852 = vrot.lane.b32.xlu2 %v1722_v10, %s7869_s3 }
 0x241   : > { %v1653_v50 = vpop.f32.mrf.mxu0  ;;  %v1672_v39 = vpop.f32.mrf.mxu1  ;;  %1747 = vmatpush.bf16.xpose.msrb.mxu0 %v1735_v11  ;;  %v1690_v55 = vadd.f32 %v1689_v28, %v1003_v36 }
 0x242   : > { %v1654_v52 = vadd.f32 %v1653_v50, %v1002_v42 }
 0x243   : > { %v1709_v14 = vadd.f32 %v1708_v37, %v1690_v55 }
 0x244   : > { %v1673_v56 = vadd.f32 %v1672_v39, %v1654_v52 }
 0x246   : > { %v1725_v46 = vpack.c.bf16 %v1673_v56, %v1671_v45 }
 0x247   : > { %2131 = vrot.lane.b32.xlu0 %v2004_v44, %s7869_s3 }
 0x248   : > { %v1691_v54 = vpop.f32.mrf.mxu2  ;;  %v1710_v51 = vpop.f32.mrf.mxu3  ;;  %5872 = vmatmul.msk.bf16.vlgmr.msrb.gmra.mxu0 %vm1727_vm13, %v8506_v30  ;;  %2135 = vrot.lane.b32.xlu2 %v2005_v49, %s7869_s3 }
 0x249   : > { %2027 = vmatpush.bf16.xpose.msra.mxu0 %v2019_v40  ;;  %v1656_v57 = vpop.f32.mrf.mxu0  ;;  %v1675_v58 = vpop.f32.mrf.mxu1  ;;  %v1692_v8 = vadd.f32 %v1691_v54, %v1003_v36 }
 0x24a   : > { %v1657_v59 = vadd.f32 %v1656_v57, %v1002_v42 }
 0x24b   : > { %v1711_v13 = vadd.f32 %v1710_v51, %v1692_v8 }
 0x24c   : > { %v1676_v2 = vadd.f32 %v1675_v58, %v1657_v59 }
 0x24d   : > { %v8543_v22 = vpack.c.bf16 %v1711_v13, %v1709_v14 }
 0x24f   : > { %1939 = vrot.lane.b32.xlu0 %v1725_v46, %s7869_s3 }
 0x250   : > { %v1694_v60 = vpop.f32.mrf.mxu2  ;;  %v1713_v61 = vpop.f32.mrf.mxu3 }
 0x251   : > { %2028 = vmatpush.bf16.xpose.msra.mxu0 %v2016_v3  ;;  %v1658_v62 = vpop.f32.mrf.mxu0  ;;  %v1677_v1 = vpop.f32.mrf.mxu1  ;;  %v1695_v6 = vadd.f32 %v1694_v60, %v1003_v36 }
 0x252   : > { %v1659_v31 = vadd.f32 %v1658_v62, %v1002_v42 }
 0x253   : > { %v1714_v48 = vadd.f32 %v1713_v61, %v1695_v6 }
 0x254   : > { %v1678_v30 = vadd.f32 %v1677_v1, %v1659_v31 }
 0x256   : > { %v1726_v5 = vpack.c.bf16 %v1678_v30, %v1676_v2 }
 0x258   : > { %v1696_v7 = vpop.f32.mrf.mxu2  ;;  %1818 = vmatpush.bf16.msrb.mxu1 %v1726_v5  ;;  %1941 = vrot.lane.b32.xlu0 %v1726_v5, %s7869_s3  ;;  %v1715_v32 = vpop.f32.mrf.mxu3 }
 0x259   : > { %v1697_v47 = vadd.f32 %v1696_v7, %v1003_v36  ;;  %5873 = vmatmul.msk.bf16.gmra.mxu0 %vm1727_vm13, %v1722_v10  ;;  %v8557_v10 = vand.u32 127, %v1718_v29 }
 0x25b   : > { %v1716_v12 = vadd.f32 %v1715_v32, %v1697_v47  ;;  %vm1720_vm14 = vcmp.lt.s32.totalorder %v8557_v10, 26 }
 0x25c   : > { %1819 = vmatpush.bf16.msrb.mxu1 %v1725_v46 }
 0x25d   : > { %v8540_v9 = vpack.c.bf16 %v1716_v12, %v1714_v48 }
 0x260   : > { %2098 = vmatpush.bf16.msra.mxu1 %v8540_v9 }
 0x264   : > { %2099 = vmatpush.bf16.msra.mxu1 %v8543_v22 }
 0x269   : > { %5880 = vmatmul.msk.bf16.vlgmr.msra.gmra.mxu0 %vm1727_vm13, %v8512_v41 }
 0x279   : > { %5881 = vmatmul.msk.bf16.gmra.mxu0 %vm1727_vm13, %v2004_v44 }
 0x27a   : > { %v1851_v20 = vpop.permute.xlu1 %1850 }
 0x282   : > { %v2130_v27 = vpop.permute.xlu1 %2129 }
 0x292   : > { %v1859_v16 = vpop.permute.xlu2 %1858 }
 0x293   : > { %v1870_v17 = vsel %vm1727_vm13, %v1859_v16, 0 }
 0x294   : > { %1878 = vmatpush.bf16.xpose.msrb.mxu2 %v1870_v17 }
 0x29a   : > { %v1857_v18 = vpop.permute.xlu0 %1856  ;;  %v1853_v63 = vpop.permute.xlu2 %1852 }
 0x29b   : > { %v1867_v19 = vsel %vm1727_vm13, %v1857_v18, 0 }
 0x29c   : > { %1879 = vmatpush.bf16.xpose.msrb.mxu2 %v1867_v19 }
 0x2a2   : > { %v2136_v41 = vpop.permute.xlu2 %2135 }
 0x2a3   : > { %5876 = vmatmul.msk.bf16.vlgmr.msrb.gmra.mxu2 %vm1727_vm13, %v1851_v20  ;;  %v2146_v25 = vsel %vm1727_vm13, %v2136_v41, 0 }
 0x2b1   : > { %v2138_v23 = vpop.permute.xlu0 %2137 }
 0x2b2   : > { %v2149_v24 = vsel %vm1727_vm13, %v2138_v23, 0 }
 0x2b3   : > { %2157 = vmatpush.bf16.xpose.msra.mxu2 %v2149_v24 }
 0x2b4   : > { %5877 = vmatmul.msk.bf16.gmra.mxu2 %vm1727_vm13, %v1853_v63 }
 0x2b9   : > { %v2132_v21 = vpop.permute.xlu0 %2131 }
 0x2bb   : > { %2158 = vmatpush.bf16.xpose.msra.mxu2 %v2146_v25 }
 0x2c1   : > { %v1940_v4 = vpop.permute.xlu0 %1939 }
 0x2c4   : > { %5884 = vmatmul.msk.bf16.vlgmr.msra.gmra.mxu2 %vm1727_vm13, %v2130_v27 }
 0x2c5   : > { %v1749_v39 = vpop.f32.mrf.mxu0 }
 0x2c6   : > { %v1759_v44 = vmul.f32 0.125, %v1749_v39 }
 0x2c8   : > { %v8580_v53 = vsel %vm1720_vm14, %v1759_v44, -1e+30 }
 0x2c9   : > { %v1768_v56 = vsel %vm1767_vm15, %v8580_v53, -inf }
 0x2ca   : > { %v1942_v33 = vpop.permute.xlu0 %1941 }
 0x2cb   : > { %1957 = vmatpush.bf16.msrb.mxu3 %v1942_v33 }
 0x2cd   : > { %v1751_v54 = vpop.f32.mrf.mxu0 }
 0x2ce   : > { %v1760_v58 = vmul.f32 0.125, %v1751_v54 }
 0x2cf   : > { %1958 = vmatpush.bf16.msrb.mxu3 %v1940_v4 }
 0x2d0   : > { %v8592_v46 = vsel %vm1720_vm14, %v1760_v58, -1e+30 }
 0x2d1   : > { %v1771_v60 = vsel %vm1767_vm15, %v8592_v46, -inf }
 0x2d4   : > { %5885 = vmatmul.msk.bf16.gmra.mxu2 %vm1727_vm13, %v2132_v21 }
 0x2d6   : > { %v1754_v62 = vpop.f32.mrf.mxu0 }
 0x2d7   : > { %v1761_v33 = vmul.f32 0.125, %v1754_v62 }
 0x2de   : > { %v1756_v5 = vpop.f32.mrf.mxu0 }
 0x2df   : > { %v1762_v55 = vmul.f32 0.125, %v1756_v5 }
 0x2e1   : > { %v8618_v48 = vsel %vm1720_vm14, %v1762_v55, -1e+30 }
 0x2e2   : > { %v1777_v12 = vsel %vm1767_vm15, %v8618_v48, -inf }
 0x2e6   : > { %v2030_v47 = vpop.f32.mrf.mxu0 }
 0x2e7   : > { %v2040_v13 = vmul.f32 0.125, %v2030_v47 }
 0x2e9   : > { %v8626_v16 = vsel %vm1720_vm14, %v2040_v13, -1e+30 }
 0x2ee   : > { %v2032_v14 = vpop.f32.mrf.mxu0 }
 0x2ef   : > { %v2041_v17 = vmul.f32 0.125, %v2032_v14 }
 0x2f1   : > { %v8632_v19 = vsel %vm1720_vm14, %v2041_v17, -1e+30 }
 0x2f2   : > { %v2051_v20 = vsel %vm1767_vm15, %v8632_v19, -inf }
 0x2f6   : > { %v2035_v18 = vpop.f32.mrf.mxu0 }
 0x2fe   : > { %v2037_v23 = vpop.f32.mrf.mxu0 }
 0x2ff   : > { %v2043_v41 = vmul.f32 0.125, %v2037_v23 }
 0x301   : > { %v8644_v25 = vsel %vm1720_vm14, %v2043_v41, -1e+30 }
 0x302   : > { %v2057_v4 = vsel %vm1767_vm15, %v8644_v25, -inf }
 0x326   : > { %v1881_v0 = vpop.f32.mrf.mxu2 }
 0x327   : > { %v1891_v34 = vmul.f32 0.125, %v1881_v0  ;;  %v8656_v0 = vsel %vm1720_vm14, %v1761_v33, -1e+30 }
 0x329   : > { %v8562_v28 = vsel %vm1720_vm14, %v1891_v34, -1e+30  ;;  %v1774_v34 = vsel %vm1767_vm15, %v8656_v0, -inf }
 0x32a   : > { %v1899_v37 = vsel %vm1767_vm15, %v8562_v28, -inf }
 0x32b   : > { %1900 = vmax.xlane.f32.xlu2 %v1899_v37 }
 0x32e   : > { %v1883_v11 = vpop.f32.mrf.mxu2 }
 0x32f   : > { %v1892_v38 = vmul.f32 0.125, %v1883_v11 }
 0x331   : > { %v8568_v15 = vsel %vm1720_vm14, %v1892_v38, -1e+30 }
 0x332   : > { %v1902_v50 = vsel %vm1767_vm15, %v8568_v15, -inf }
 0x333   : > { %1903 = vmax.xlane.f32.xlu1 %v1902_v50 }
 0x337   : > { %v1886_v40 = vpop.f32.mrf.mxu2 }
 0x338   : > { %v1893_v43 = vmul.f32 0.125, %v1886_v40 }
 0x33a   : > { %v8574_v35 = vsel %vm1720_vm14, %v1893_v43, -1e+30 }
 0x33b   : > { %v1905_v42 = vsel %vm1767_vm15, %v8574_v35, -inf }
 0x33c   : > { %1906 = vmax.xlane.f32.xlu0 %v1905_v42 }
 0x33f   : > { %v1888_v49 = vpop.f32.mrf.mxu2 }
 0x340   : > { %v1894_v52 = vmul.f32 0.125, %v1888_v49 }
 0x342   : > { %v8584_v51 = vsel %vm1720_vm14, %v1894_v52, -1e+30 }
 0x343   : > { %v1908_v57 = vsel %vm1767_vm15, %v8584_v51, -inf }
 0x344   : > { %1769 = vmax.xlane.f32.xlu0 %v1768_v56  ;;  %1909 = vmax.xlane.f32.xlu2 %v1908_v57 }
 0x347   : > { %v2160_v3 = vpop.f32.mrf.mxu2 }
 0x348   : > { %v2170_v45 = vmul.f32 0.125, %v2160_v3 }
 0x34a   : > { %v8596_v59 = vsel %vm1720_vm14, %v2170_v45, -1e+30 }
 0x34b   : > { %v2178_v61 = vsel %vm1767_vm15, %v8596_v59, -inf }
 0x34c   : > { %1772 = vmax.xlane.f32.xlu0 %v1771_v60  ;;  %2179 = vmax.xlane.f32.xlu1 %v2178_v61 }
 0x34f   : > { %v2162_v31 = vpop.f32.mrf.mxu2 }
 0x350   : > { %v2171_v1 = vmul.f32 0.125, %v2162_v31 }
 0x352   : > { %v8604_v2 = vsel %vm1720_vm14, %v2171_v1, -1e+30 }
 0x353   : > { %v2181_v30 = vsel %vm1767_vm15, %v8604_v2, -inf }
 0x354   : > { %2182 = vmax.xlane.f32.xlu2 %v2181_v30 }
 0x357   : > { %v2165_v36 = vpop.f32.mrf.mxu2 }
 0x358   : > { %v2172_v21 = vmul.f32 0.125, %v2165_v36 }
 0x35a   : > { %v8650_v27 = vsel %vm1720_vm14, %v2172_v21, -1e+30 }
 0x35b   : > { %v2184_v29 = vsel %vm1767_vm15, %v8650_v27, -inf }
 0x35f   : > { %v2167_v6 = vpop.f32.mrf.mxu2 }
 0x360   : > { %v2173_v7 = vmul.f32 0.125, %v2167_v6 }
 0x362   : > { %v8610_v8 = vsel %vm1720_vm14, %v2173_v7, -1e+30 }
 0x363   : > { %v2187_v32 = vsel %vm1767_vm15, %v8610_v8, -inf }
 0x364   : > { %2188 = vmax.xlane.f32.xlu0 %v2187_v32 }
 0x365   : > { %2220 = vrot.lane.b32.xlu1 %v8540_v9, %s7869_s3  ;;  %v2048_v9 = vsel %vm1767_vm15, %v8626_v16, -inf }
 0x36c   : > { %2218 = vrot.lane.b32.xlu2 %v8543_v22, %s7869_s3  ;;  %1778 = vmax.xlane.f32.xlu0 %v1777_v12  ;;  %v2042_v22 = vmul.f32 0.125, %v2035_v18 }
 0x36e   : > { %v8638_v63 = vsel %vm1720_vm14, %v2042_v22, -1e+30 }
 0x36f   : > { %v2054_v24 = vsel %vm1767_vm15, %v8638_v63, -inf }
 0x374   : > { %2049 = vmax.xlane.f32.xlu0 %v2048_v9 }
 0x37c   : > { %2052 = vmax.xlane.f32.xlu0 %v2051_v20 }
 0x384   : > { %2055 = vmax.xlane.f32.xlu0 %v2054_v24 }
 0x38c   : > { %2058 = vmax.xlane.f32.xlu0 %v2057_v4 }
 0x38f   : > { %2185 = vmax.xlane.f32.xlu1 %v2184_v29 }
 0x395   : > { %1775 = vmax.xlane.f32.xlu2 %v1774_v34 }
 0x39e   : > { %v1901_v37 = vpop.xlane.xlu2 %1900 }
 0x39f   : > { %v1911_v11 = vsub.f32 %v8562_v28, %v1901_v37 }
 0x3a1   : > { %v1915_v38 = vmul.f32 1.442695, %v1911_v11 }
 0x3a3   : > { %7555 = vpow2.f32 %v1915_v38 }
 0x3a6   : > { %v1904_v50 = vpop.xlane.xlu1 %1903 }
 0x3a7   : > { %v1912_v39 = vsub.f32 %v8568_v15, %v1904_v50 }
 0x3a9   : > { %v1917_v40 = vmul.f32 1.442695, %v1912_v39  ;;  %v7556_v42 = vpop.eup %7555 }
 0x3aa   : > { %v1923_v55 = vsel %vm1767_vm15, %v7556_v42, 0.0 }
 0x3ab   : > { %7557 = vpow2.f32 %v1917_v40 }
 0x3af   : > { %v1907_v43 = vpop.xlane.xlu0 %1906 }
 0x3b0   : > { %v1913_v49 = vsub.f32 %v8574_v35, %v1907_v43 }
 0x3b1   : > { %v8662_v44 = vpop.eup %7557 }
 0x3b2   : > { %v1935_v10 = vpack.c.bf16 %v8662_v44, %v7556_v42  ;;  %v1919_v52 = vmul.f32 1.442695, %v1913_v49  ;;  %v1926_v11 = vsel %vm1767_vm15, %v8662_v44, 0.0 }
 0x3b4   : > { %5878 = vmatmul.msk.bf16.vlgmr.msrb.gmra.mxu3 %vm1767_vm15, %v1935_v10  ;;  %7559 = vpow2.f32 %v1919_v52 }
 0x3b7   : > { %v1770_v54 = vpop.xlane.xlu0 %1769  ;;  %v1910_v28 = vpop.xlane.xlu2 %1909 }
 0x3b8   : > { %v1780_v56 = vsub.f32 %v8580_v53, %v1770_v54  ;;  %v1914_v15 = vsub.f32 %v8584_v51, %v1910_v28 }
 0x3ba   : > { %v1784_v57 = vmul.f32 1.442695, %v1780_v56  ;;  %v1921_v58 = vmul.f32 1.442695, %v1914_v15  ;;  %v7560_v61 = vpop.eup %7559 }
 0x3bb   : > { %v1929_v43 = vsel %vm1767_vm15, %v7560_v61, 0.0 }
 0x3bc   : > { %7561 = vpow2.f32 %v1784_v57 }
 0x3bd   : > { %7563 = vpow2.f32 %v1921_v58 }
 0x3bf   : > { %v1773_v3 = vpop.xlane.xlu0 %1772  ;;  %v2180_v45 = vpop.xlane.xlu1 %2179 }
 0x3c0   : > { %v1781_v60 = vsub.f32 %v8592_v46, %v1773_v3  ;;  %v2190_v31 = vsub.f32 %v8596_v59, %v2180_v45 }
 0x3c2   : > { %v7562_v35 = vpop.eup %7561  ;;  %v1786_v62 = vmul.f32 1.442695, %v1781_v60  ;;  %v2194_v51 = vmul.f32 1.442695, %v2190_v31 }
 0x3c3   : > { %v7564_v1 = vpop.eup %7563  ;;  %v1792_v30 = vsel %vm1767_vm15, %v7562_v35, 0.0 }
 0x3c4   : > { %7565 = vpow2.f32 %v1786_v62  ;;  %1793 = vadd.xlane.f32.xlu0 %v1792_v30  ;;  %v1936_v53 = vpack.c.bf16 %v7564_v1, %v7560_v61  ;;  %v1932_v47 = vsel %vm1767_vm15, %v7564_v1, 0.0 }
 0x3c5   : > { %7567 = vpow2.f32 %v2194_v51 }
 0x3c6   : > { %5879 = vmatmul.msk.bf16.gmra.mxu3 %vm1767_vm15, %v1936_v53 }
 0x3c7   : > { %v2183_v36 = vpop.xlane.xlu2 %2182 }
 0x3c8   : > { %v2191_v6 = vsub.f32 %v8604_v2, %v2183_v36 }
 0x3ca   : > { %v7566_v5 = vpop.eup %7565  ;;  %v2196_v59 = vmul.f32 1.442695, %v2191_v6 }
 0x3cb   : > { %v1804_v46 = vpack.c.bf16 %v7566_v5, %v7562_v35  ;;  %v1795_v7 = vsel %vm1767_vm15, %v7566_v5, 0.0  ;;  %v7568_v32 = vpop.eup %7567 }
 0x3cc   : > { %1796 = vadd.xlane.f32.xlu1 %v1795_v7  ;;  %1933 = vadd.xlane.f32.xlu0 %v1932_v47  ;;  %7569 = vpow2.f32 %v2196_v59  ;;  %v2202_v12 = vsel %vm1767_vm15, %v7568_v32, 0.0 }
 0x3cd   : > { %5874 = vmatmul.msk.bf16.vlgmr.msrb.gmra.mxu1 %vm1767_vm15, %v1804_v46 }
 0x3cf   : > { %v2219_v9 = vpop.permute.xlu2 %2218 }
 0x3d2   : > { %v7570_v14 = vpop.eup %7569 }
 0x3d3   : > { %v2205_v17 = vsel %vm1767_vm15, %v7570_v14, 0.0  ;;  %v2214_v18 = vpack.c.bf16 %v7570_v14, %v7568_v32 }
 0x3d4   : > { %1924 = vadd.xlane.f32.xlu1 %v1923_v55  ;;  %2203 = vadd.xlane.f32.xlu0 %v2202_v12 }
 0x3d7   : > { %v2221_v13 = vpop.permute.xlu1 %2220  ;;  %v2189_v2 = vpop.xlane.xlu0 %2188 }
 0x3d8   : > { %2236 = vmatpush.bf16.msra.mxu3 %v2221_v13 }
 0x3dc   : > { %2206 = vadd.xlane.f32.xlu1 %v2205_v17  ;;  %2237 = vmatpush.bf16.msra.mxu3 %v2219_v9 }
 0x3df   : > { %5886 = vmatmul.msk.bf16.vlgmr.msra.gmra.mxu3 %vm1767_vm15, %v2214_v18  ;;  %v1779_v20 = vpop.xlane.xlu0 %1778 }
 0x3e0   : > { %v1783_v37 = vsub.f32 %v8618_v48, %v1779_v20 }
 0x3e2   : > { %v1790_v50 = vmul.f32 1.442695, %v1783_v37 }
 0x3e7   : > { %v2050_v22 = vpop.xlane.xlu0 %2049 }
 0x3e8   : > { %v2060_v23 = vsub.f32 %v8626_v16, %v2050_v22  ;;  %v2193_v16 = vsub.f32 %v8610_v8, %v2189_v2 }
 0x3ea   : > { %v2064_v24 = vmul.f32 1.442695, %v2060_v23 }
 0x3ec   : > { %7571 = vpow2.f32 %v2064_v24 }
 0x3ef   : > { %v2053_v41 = vpop.xlane.xlu0 %2052 }
 0x3f0   : > { %v2061_v21 = vsub.f32 %v8632_v19, %v2053_v41  ;;  %v2200_v19 = vmul.f32 1.442695, %v2193_v16 }
 0x3f2   : > { %v7572_v4 = vpop.eup %7571  ;;  %v2066_v33 = vmul.f32 1.442695, %v2061_v21 }
 0x3f3   : > { %v2072_v29 = vsel %vm1767_vm15, %v7572_v4, 0.0 }
 0x3f4   : > { %7573 = vpow2.f32 %v2066_v33  ;;  %2073 = vadd.xlane.f32.xlu2 %v2072_v29 }
 0x3f5   : > { %7575 = vpow2.f32 %v1790_v50 }
 0x3f6   : > { %7577 = vpow2.f32 %v2200_v19 }
 0x3f7   : > { %v2056_v58 = vpop.xlane.xlu0 %2055 }
 0x3f8   : > { %v2062_v61 = vsub.f32 %v8638_v63, %v2056_v58 }
 0x3fa   : > { %v7574_v34 = vpop.eup %7573  ;;  %v2068_v62 = vmul.f32 1.442695, %v2062_v61 }
 0x3fb   : > { %v2075_v38 = vsel %vm1767_vm15, %v7574_v34, 0.0  ;;  %v7576_v48 = vpop.eup %7575  ;;  %v2084_v60 = vpack.c.bf16 %v7574_v34, %v7572_v4 }
 0x3fc   : > { %1927 = vadd.xlane.f32.xlu2 %v1926_v11  ;;  %2076 = vadd.xlane.f32.xlu0 %v2075_v38  ;;  %v1801_v52 = vsel %vm1767_vm15, %v7576_v48, 0.0  ;;  %v7578_v8 = vpop.eup %7577 }
 0x3fd   : > { %v2211_v15 = vsel %vm1767_vm15, %v7578_v8, 0.0 }
 0x3ff   : > { %v2059_v3 = vpop.xlane.xlu0 %2058 }
 0x400   : > { %v2063_v45 = vsub.f32 %v8644_v25, %v2059_v3  ;;  %v5962_v3 = vld [vmem:[%s9972_s22 + $0x70] sm:$0xf] }
 0x402   : > { %v2186_v39 = vpop.xlane.xlu1 %2185  ;;  %v2070_v35 = vmul.f32 1.442695, %v2063_v45  ;;  %v7179_v45 = vld [vmem:[%s9972_s22 + $0x74] sm:$0xf0] }
 0x403   : > { %v2192_v40 = vsub.f32 %v8650_v27, %v2186_v39  ;;  %v5963_v61 = vor.u32 %v7179_v45, %v5962_v3  ;;  %v5924_v3 = vld [vmem:[%s9972_s22 + $0x28] sm:$0xf0]  ;;  %v7190_v45 = vld [vmem:[%s9972_s22 + $0xd4] sm:$0xf] }
 0x404   : > { %1930 = vadd.xlane.f32.xlu2 %v1929_v43 }
 0x405   : > { %v2198_v42 = vmul.f32 1.442695, %v2192_v40  ;;  %2503 = vmatpush.bf16.msrb.mxu0 %v5963_v61 }
 0x407   : > { %7579 = vpow2.f32 %v2198_v42 }
 0x408   : > { %v1776_v44 = vpop.xlane.xlu2 %1775 }
 0x409   : > { %v1782_v10 = vsub.f32 %v8656_v0, %v1776_v44 }
 0x40b   : > { %v1788_v49 = vmul.f32 1.442695, %v1782_v10 }
 0x40c   : > { %1802 = vadd.xlane.f32.xlu2 %v1801_v52 }
 0x40d   : > { %v7580_v54 = vpop.eup %7579  ;;  %7581 = vpow2.f32 %v1788_v49 }
 0x40e   : > { %v2208_v28 = vsel %vm1767_vm15, %v7580_v54, 0.0  ;;  %v2215_v27 = vpack.c.bf16 %v7578_v8, %v7580_v54  ;;  %7583 = vpow2.f32 %v2070_v35  ;;  %v5964_v35 = vld [vmem:[%s9972_s22 + $0x78] sm:$0xf0] }
 0x40f   : > { %2209 = vadd.xlane.f32.xlu1 %v2208_v28  ;;  %7585 = vpow2.f32 %v2068_v62  ;;  %v5954_v62 = vld [vmem:[%s9972_s22 + $0x60] sm:$0xf] }
 0x410   : > { %5887 = vmatmul.msk.bf16.gmra.mxu3 %vm1767_vm15, %v2215_v27 }
 0x413   : > { %v7582_v56 = vpop.eup %7581 }
 0x414   : > { %2212 = vadd.xlane.f32.xlu2 %v2211_v15  ;;  %v1798_v57 = vsel %vm1767_vm15, %v7582_v56, 0.0  ;;  %v1805_v0 = vpack.c.bf16 %v7576_v48, %v7582_v56  ;;  %v8701_v31 = vpop.eup %7583 }
 0x415   : > { %1799 = vadd.xlane.f32.xlu0 %v1798_v57  ;;  %v8703_v1 = vpop.eup %7585 }
 0x416   : > { %5875 = vmatmul.msk.bf16.gmra.mxu1 %vm1767_vm15, %v1805_v0  ;;  %v2085_v30 = vpack.c.bf16 %v8701_v31, %v8703_v1  ;;  %v2078_v28 = vsel %vm1767_vm15, %v8703_v1, 0.0 }
 0x426   : > { %5882 = vmatmul.msk.bf16.vlgmr.msra.gmra.mxu1 %vm1767_vm15, %v2084_v60  ;;  %v7178_v60 = vld [vmem:[%s9972_s22 + $0x74] sm:$0xf] }
 0x427   : > { %v5967_v1 = vor.u32 %v7178_v60, %v5964_v35  ;;  %v6012_v60 = vld [vmem:[%s9972_s22 + $0xd8] sm:$0xf0] }
 0x429   : > { %2541 = vmatpush.bf16.msrb.mxu2 %v5967_v1  ;;  %v5914_v1 = vld [vmem:[%s9972_s22 + $0x10] sm:$0xf] }
 0x436   : > { %5883 = vmatmul.msk.bf16.gmra.mxu1 %vm1767_vm15, %v2085_v30  ;;  %v7177_v30 = vld [vmem:[%s9972_s22 + $0x64] sm:$0xf0] }
 0x437   : > { %v1960_v53 = vpop.f32.mrf.mxu3  ;;  %v1794_v51 = vpop.xlane.xlu0 %1793 }
 0x438   : > { %7587 = vrcp.f32 %v1794_v51  ;;  %v7176_v51 = vld [vmem:[%s9972_s22 + $0x64] sm:$0xf] }
 0x43e   : > { %v7588_v5 = vpop.eup %7587 }
 0x43f   : > { %v1797_v25 = vpop.xlane.xlu1 %1796  ;;  %v1962_v63 = vpop.f32.mrf.mxu3 }
 0x440   : > { %v8708_v59 = vpop.xlane.xlu0 %1933 }
 0x447   : > { %v1925_v36 = vpop.xlane.xlu1 %1924 }
 0x448   : > { %7589 = vrcp.f32 %v1925_v36  ;;  %v2204_v17 = vpop.xlane.xlu0 %2203  ;;  %v5955_v36 = vor.u32 %v7177_v30, %v5954_v62  ;;  %v6015_v62 = vor.u32 %v7190_v45, %v6012_v60 }
 0x449   : > { %7591 = vrcp.f32 %v1797_v25  ;;  %v1965_v55 = vpop.f32.mrf.mxu3 }
 0x44a   : > { %v1821_v6 = vpop.f32.mrf.mxu1  ;;  %7593 = vrcp.f32 %v2204_v17  ;;  %2504 = vmatpush.bf16.msrb.mxu0 %v5955_v36  ;;  %v6026_v17 = vld [vmem:[%s9972_s22 + $0xf0] sm:$0xf] }
 0x44b   : > { %v1835_v46 = vmul.f32 %v7588_v5, %v1821_v6 }
 0x44d   : > { %v1839_v7 = vpack.c.bf16 %v1835_v46, %v1835_v46 }
 0x44e   : > { %v7590_v47 = vpop.eup %7589 }
 0x44f   : > { %1844 = vst.msk [vmem:[#allocation3] sm:$0xf] %vm1843_vm0, %v1839_v7  ;;  %v1974_v32 = vmul.f32 %v7590_v47, %v1960_v53  ;;  %v7592_v13 = vpop.eup %7591  ;;  %v2207_v20 = vpop.xlane.xlu1 %2206  ;;  %v2081_v7 = vsel %vm1767_vm15, %v8701_v31, 0.0  ;;  %v5938_v31 = vld [vmem:[%s9972_s22 + $0x40] sm:$0xf] }
 0x450   : > { %v7594_v22 = vpop.eup %7593  ;;  %7595 = vrcp.f32 %v2207_v20  ;;  %v7195_v20 = vld [vmem:[%s9972_s22 + $0xf4] sm:$0xf0] }
 0x451   : > { %v1978_v12 = vpack.c.bf16 %v1974_v32, %v1974_v32  ;;  %v8713_v18 = vpop.f32.mrf.mxu3 }
 0x452   : > { %v1823_v2 = vpop.f32.mrf.mxu1 }
 0x453   : > { %v1836_v14 = vmul.f32 %v7592_v13, %v1823_v2  ;;  %1986 = vrot.lane.b32.xlu1 %v1978_v12, %s7869_s3  ;;  %v7175_v12 = vld [vmem:[%s9972_s22 + $0x54] sm:$0xf0]  ;;  %v7174_v13 = vld [vmem:[%s9972_s22 + $0x54] sm:$0xf] }
 0x455   : > { %v1840_v9 = vpack.c.bf16 %v1836_v14, %v1836_v14  ;;  %v5948_v14 = vld [vmem:[%s9972_s22 + $0x58] sm:$0xf0] }
 0x456   : > { %v7596_v4 = vpop.eup %7595 }
 0x457   : > { %1845 = vst.msk [vmem:[#allocation3 + $0x8] sm:$0xf] %vm1843_vm0, %v1840_v9  ;;  %v7173_v9 = vld [vmem:[%s9972_s22 + $0x44] sm:$0xf0] }
 0x462   : > { %v2239_v23 = vpop.f32.mrf.mxu3 }
 0x463   : > { %v2253_v24 = vmul.f32 %v7594_v22, %v2239_v23  ;;  %v5939_v22 = vor.u32 %v7173_v9, %v5938_v31  ;;  %v6027_v23 = vor.u32 %v7195_v20, %v6026_v17  ;;  %v7187_v9 = vld [vmem:[%s9972_s22 + $0xb4] sm:$0xf0]  ;;  %v5908_v17 = vld [vmem:[%s9972_s22 + $0x8] sm:$0xf0] }
 0x465   : > { %v2257_v41 = vpack.c.bf16 %v2253_v24, %v2253_v24  ;;  %v7172_v24 = vld [vmem:[%s9972_s22 + $0x44] sm:$0xf]  ;;  %2522 = vmatpush.bf16.msrb.mxu1 %v6027_v23  ;;  %v7186_v23 = vld [vmem:[%s9972_s22 + $0xb4] sm:$0xf] }
 0x467   : > { %v2074_v21 = vpop.xlane.xlu2 %2073  ;;  %2265 = vrot.lane.b32.xlu0 %v2257_v41, %s7869_s3  ;;  %v5940_v41 = vld [vmem:[%s9972_s22 + $0x48] sm:$0xf0] }
 0x46a   : > { %v2241_v33 = vpop.f32.mrf.mxu3 }
 0x46b   : > { %v2254_v29 = vmul.f32 %v7596_v4, %v2241_v33  ;;  %v5943_v33 = vor.u32 %v7172_v24, %v5940_v41  ;;  %v5996_v24 = vld [vmem:[%s9972_s22 + $0xb8] sm:$0xf0] }
 0x46c   : > { %v5999_v41 = vor.u32 %v7186_v23, %v5996_v24  ;;  %v7691_v23 = vld [vmem:[#allocation2 + $0x30] sm:$0xff] }
 0x46d   : > { %v2258_v34 = vpack.c.bf16 %v2254_v29, %v2254_v29  ;;  %v6028_v29 = vld [vmem:[%s9972_s22 + $0xf8] sm:$0xf0] }
 0x46f   : > { %2267 = vrot.lane.b32.xlu1 %v2258_v34, %s7869_s3  ;;  %v1928_v37 = vpop.xlane.xlu2 %1927  ;;  %v2077_v43 = vpop.xlane.xlu0 %2076  ;;  %v5930_v34 = vld [vmem:[%s9972_s22 + $0x30] sm:$0xf] }
 0x470   : > { %7597 = vrcp.f32 %v1928_v37  ;;  %v7171_v37 = vld [vmem:[%s9972_s22 + $0x34] sm:$0xf0] }
 0x476   : > { %v7598_v11 = vpop.eup %7597 }
 0x477   : > { %v1931_v38 = vpop.xlane.xlu2 %1930  ;;  %v1975_v16 = vmul.f32 %v7598_v11, %v1962_v63  ;;  %v5956_v63 = vld [vmem:[%s9972_s22 + $0x68] sm:$0xf0] }
 0x478   : > { %7599 = vrcp.f32 %v1931_v38  ;;  %v5959_v5 = vor.u32 %v7176_v51, %v5956_v63  ;;  %v7167_v51 = vld [vmem:[%s9972_s22 + $0x14] sm:$0xf0]  ;;  %v6002_v63 = vld [vmem:[%s9972_s22 + $0xc0] sm:$0xf] }
 0x479   : > { %v1979_v50 = vpack.c.bf16 %v1975_v16, %v1975_v16  ;;  %v5915_v36 = vor.u32 %v7167_v51, %v5914_v1 }
 0x47a   : > { %2542 = vmatpush.bf16.msrb.mxu2 %v5959_v5  ;;  %v7189_v5 = vld [vmem:[%s9972_s22 + $0xc4] sm:$0xf0] }
 0x47b   : > { %1988 = vrot.lane.b32.xlu2 %v1979_v50, %s7869_s3  ;;  %v6018_v50 = vld [vmem:[%s9972_s22 + $0xe0] sm:$0xf] }
 0x47e   : > { %v7600_v19 = vpop.eup %7599 }
 0x47f   : > { %v1976_v39 = vmul.f32 %v7600_v19, %v1965_v55  ;;  %v1803_v42 = vpop.xlane.xlu2 %1802  ;;  %v5946_v55 = vld [vmem:[%s9972_s22 + $0x50] sm:$0xf]  ;;  %v7193_v19 = vld [vmem:[%s9972_s22 + $0xe4] sm:$0xf0] }
 0x480   : > { %v5947_v2 = vor.u32 %v7175_v12, %v5946_v55  ;;  %v6004_v55 = vld [vmem:[%s9972_s22 + $0xc8] sm:$0xf0] }
 0x481   : > { %v1980_v40 = vpack.c.bf16 %v1976_v39, %v1976_v39  ;;  %v7170_v39 = vld [vmem:[%s9972_s22 + $0x34] sm:$0xf] }
 0x482   : > { %2505 = vmatpush.bf16.msrb.mxu0 %v5947_v2  ;;  %v7165_v2 = vld [vmem:[%s9972_s22 + $0x4] sm:$0xf0] }
 0x483   : > { %1990 = vrot.lane.b32.xlu0 %v1980_v40, %s7869_s3 }
 0x486   : > { %2506 = vmatpush.bf16.msrb.mxu0 %v5939_v22 }
 0x487   : > { %v2213_v44 = vpop.xlane.xlu2 %2212 }
 0x488   : > { %v1800_v48 = vpop.xlane.xlu0 %1799 }
 0x489   : > { %7601 = vrcp.f32 %v1800_v48  ;;  %v6019_v48 = vor.u32 %v7193_v19, %v6018_v50  ;;  %v5980_v19 = vld [vmem:[%s9972_s22 + $0x98] sm:$0xf0] }
 0x48a   : > { %7603 = vrcp.f32 %v1803_v42 }
 0x48b   : > { %7605 = vrcp.f32 %v2213_v44  ;;  %v5932_v44 = vld [vmem:[%s9972_s22 + $0x38] sm:$0xf0]  ;;  %2523 = vmatpush.bf16.msrb.mxu1 %v6019_v48  ;;  %v5972_v48 = vld [vmem:[%s9972_s22 + $0x88] sm:$0xf0] }
 0x48c   : > { %7607 = vrcp.f32 %v2074_v21  ;;  %v7194_v21 = vld [vmem:[%s9972_s22 + $0xf4] sm:$0xf] }
 0x48d   : > { %7609 = vrcp.f32 %v8708_v59  ;;  %v5951_v59 = vor.u32 %v7174_v13, %v5948_v14  ;;  %v6031_v16 = vor.u32 %v7194_v21, %v6028_v29  ;;  %v5906_v13 = vld [vmem:[%s9972_s22] sm:$0xf]  ;;  %v5994_v14 = vld [vmem:[%s9972_s22 + $0xb0] sm:$0xf] }
 0x48e   : > { %7611 = vrcp.f32 %v2077_v43  ;;  %v2210_v43 = vpop.xlane.xlu1 %2209  ;;  %v5907_v31 = vor.u32 %v7165_v2, %v5906_v13  ;;  %v5995_v20 = vor.u32 %v7187_v9, %v5994_v14  ;;  %v5986_v21 = vld [vmem:[%s9972_s22 + $0xa0] sm:$0xf] }
 0x48f   : > { %v7602_v10 = vpop.eup %7601  ;;  %2543 = vmatpush.bf16.msrb.mxu2 %v5951_v59  ;;  %2560 = vmatpush.bf16.msrb.mxu3 %v6031_v16  ;;  %7613 = vrcp.f32 %v2210_v43  ;;  %v7164_v59 = vld [vmem:[%s9972_s22 + $0x4] sm:$0xf]  ;;  %v7182_v16 = vld [vmem:[%s9972_s22 + $0x94] sm:$0xf] }
 0x490   : > { %v7604_v27 = vpop.eup %7603  ;;  %v5911_v22 = vor.u32 %v7164_v59, %v5908_v17  ;;  %v5983_v43 = vor.u32 %v7182_v16, %v5980_v19 }
 0x491   : > { %v7606_v56 = vpop.eup %7605 }
 0x492   : > { %v7608_v6 = vpop.eup %7607 }
 0x493   : > { %v1826_v49 = vpop.f32.mrf.mxu1  ;;  %v8719_v52 = vpop.f32.mrf.mxu3  ;;  %2544 = vmatpush.bf16.msrb.mxu2 %v5943_v33  ;;  %v7184_v33 = vld [vmem:[%s9972_s22 + $0xa4] sm:$0xf] }
 0x494   : > { %v1837_v8 = vmul.f32 %v7602_v10, %v1826_v49  ;;  %v7610_v4 = vpop.eup %7609  ;;  %v7192_v10 = vld [vmem:[%s9972_s22 + $0xe4] sm:$0xf]  ;;  %v6020_v49 = vld [vmem:[%s9972_s22 + $0xe8] sm:$0xf0] }
 0x495   : > { %v7612_v11 = vpop.eup %7611  ;;  %v1977_v40 = vmul.f32 %v7610_v4, %v8713_v18  ;;  %v5935_v18 = vor.u32 %v7170_v39, %v5932_v44  ;;  %v7185_v4 = vld [vmem:[%s9972_s22 + $0xa4] sm:$0xf0]  ;;  %v5970_v39 = vld [vmem:[%s9972_s22 + $0x80] sm:$0xf] }
 0x496   : > { %v1841_v54 = vpack.c.bf16 %v1837_v8, %v1837_v8  ;;  %v5931_v8 = vor.u32 %v7171_v37, %v5930_v34  ;;  %v5987_v29 = vor.u32 %v7185_v4, %v5986_v21  ;;  %v5988_v34 = vld [vmem:[%s9972_s22 + $0xa8] sm:$0xf0] }
 0x497   : > { %v1981_v61 = vpack.c.bf16 %v1977_v40, %v1977_v40  ;;  %2545 = vmatpush.bf16.msrb.mxu2 %v5935_v18  ;;  %v5991_v37 = vor.u32 %v7184_v33, %v5988_v34  ;;  %v7181_v40 = vld [vmem:[%s9972_s22 + $0x84] sm:$0xf0] }
 0x498   : > { %1846 = vst.msk [vmem:[#allocation3 + $0x10] sm:$0xf] %vm1843_vm0, %v1841_v54  ;;  %v6023_v54 = vor.u32 %v7192_v10, %v6020_v49  ;;  %2507 = vmatpush.bf16.msrb.mxu0 %v5931_v8  ;;  %v5971_v10 = vor.u32 %v7181_v40, %v5970_v39  ;;  %v7694_v39 = vld [vmem:[#allocation2 + $0x10] sm:$0xff] }
 0x499   : > { %2079 = vadd.xlane.f32.xlu1 %v2078_v28  ;;  %v5922_v28 = vld [vmem:[%s9972_s22 + $0x20] sm:$0xf] }
 0x49a   : > { %2561 = vmatpush.bf16.msrb.mxu3 %v6023_v54 }
 0x49b   : > { %v1828_v15 = vpop.f32.mrf.mxu1  ;;  %v2246_v57 = vpop.f32.mrf.mxu3 }
 0x49c   : > { %v1838_v0 = vmul.f32 %v7604_v27, %v1828_v15  ;;  %v2256_v58 = vmul.f32 %v7606_v56, %v2246_v57  ;;  %v6010_v27 = vld [vmem:[%s9972_s22 + $0xd0] sm:$0xf]  ;;  %v7169_v15 = vld [vmem:[%s9972_s22 + $0x24] sm:$0xf0]  ;;  %v7191_v57 = vld [vmem:[%s9972_s22 + $0xd4] sm:$0xf0] }
 0x49d   : > { %v5923_v35 = vor.u32 %v7169_v15, %v5922_v28 }
 0x49e   : > { %v1842_v53 = vpack.c.bf16 %v1838_v0, %v1838_v0  ;;  %v2260_v25 = vpack.c.bf16 %v2256_v58, %v2256_v58  ;;  %v7168_v0 = vld [vmem:[%s9972_s22 + $0x24] sm:$0xf]  ;;  %v6011_v58 = vor.u32 %v7191_v57, %v6010_v27  ;;  %2562 = vmatpush.bf16.msrb.mxu3 %v6015_v62 }
 0x49f   : > { %v5927_v30 = vor.u32 %v7168_v0, %v5924_v3  ;;  %2508 = vmatpush.bf16.msrb.mxu0 %v5923_v35 }
 0x4a0   : > { %1847 = vst.msk [vmem:[#allocation3 + $0x18] sm:$0xf] %vm1843_vm0, %v1842_v53  ;;  %2271 = vrot.lane.b32.xlu0 %v2260_v25, %s7869_s3  ;;  %2524 = vmatpush.bf16.msrb.mxu1 %v6011_v58  ;;  %v7614_v53 = vpop.eup %7613 }
 0x4a1   : > { %v2255_v25 = vmul.f32 %v7614_v53, %v8719_v52  ;;  %2546 = vmatpush.bf16.msrb.mxu2 %v5927_v30 }
 0x4a3   : > { %v2101_v46 = vpop.f32.mrf.mxu1  ;;  %2509 = vmatpush.bf16.msrb.mxu0 %v5915_v36  ;;  %v2259_v12 = vpack.c.bf16 %v2255_v25, %v2255_v25 }
 0x4a4   : > { %v2115_v47 = vmul.f32 %v7608_v6, %v2101_v46  ;;  %2082 = vadd.xlane.f32.xlu2 %v2081_v7  ;;  %v7166_v6 = vld [vmem:[%s9972_s22 + $0x14] sm:$0xf]  ;;  %v5916_v46 = vld [vmem:[%s9972_s22 + $0x18] sm:$0xf0]  ;;  %v6003_v7 = vor.u32 %v7189_v5, %v6002_v63 }
 0x4a6   : > { %v2119_v32 = vpack.c.bf16 %v2115_v47, %v2115_v47  ;;  %v5919_v47 = vor.u32 %v7166_v6, %v5916_v46  ;;  %2525 = vmatpush.bf16.msrb.mxu1 %v6003_v7 }
 0x4a7   : > { %2510 = vmatpush.bf16.msrb.mxu0 %v5907_v31 }
 0x4a8   : > { %2123 = vst.msk [vmem:[#allocation3 + $0x4] sm:$0xf] %vm1843_vm0, %v2119_v32  ;;  %v7188_v32 = vld [vmem:[%s9972_s22 + $0xc4] sm:$0xf]  ;;  %2547 = vmatpush.bf16.msrb.mxu2 %v5919_v47 }
 0x4a9   : > { %v6007_v52 = vor.u32 %v7188_v32, %v6004_v55  ;;  %v2317_v55 = vld [vmem:[%s9974_s8] sm:$0x3] }
 0x4aa   : > { %2526 = vmatpush.bf16.msrb.mxu1 %v5995_v20  ;;  %v2320_v14 = vperm.slane %v2317_v55, 1 }
 0x4ab   : > { %v2103_v38 = vpop.f32.mrf.mxu1  ;;  %2563 = vmatpush.bf16.msrb.mxu3 %v6007_v52 }
 0x4ac   : > { %v2116_v42 = vmul.f32 %v7612_v11, %v2103_v38  ;;  %2548 = vmatpush.bf16.msrb.mxu2 %v5911_v22  ;;  %v5978_v11 = vld [vmem:[%s9972_s22 + $0x90] sm:$0xf]  ;;  %v7183_v38 = vld [vmem:[%s9972_s22 + $0x94] sm:$0xf0] }
 0x4ad   : > { %v5979_v50 = vor.u32 %v7183_v38, %v5978_v11 }
 0x4ae   : > { %v2120_v56 = vpack.c.bf16 %v2116_v42, %v2116_v42  ;;  %2527 = vmatpush.bf16.msrb.mxu1 %v5987_v29  ;;  %v7180_v42 = vld [vmem:[%s9972_s22 + $0x84] sm:$0xf] }
 0x4af   : > { %2564 = vmatpush.bf16.msrb.mxu3 %v5999_v41  ;;  %v5975_v49 = vor.u32 %v7180_v42, %v5972_v48  ;;  %v7692_v41 = vld [vmem:[#allocation2] sm:$0xff] }
 0x4b0   : > { %2124 = vst.msk [vmem:[#allocation3 + $0xc] sm:$0xf] %vm1843_vm0, %v2120_v56 }
 0x4b2   : > { %1992 = vrot.lane.b32.xlu1 %v1981_v61, %s7869_s3  ;;  %2528 = vmatpush.bf16.msrb.mxu1 %v5979_v50  ;;  %v7693_v50 = vld [vmem:[#allocation2 + $0x18] sm:$0xff] }
 0x4b3   : > { %2565 = vmatpush.bf16.msrb.mxu3 %v5991_v37  ;;  %v2106_v60 = vpop.f32.mrf.mxu1 }
 0x4b6   : > { %2529 = vmatpush.bf16.msrb.mxu1 %v5971_v10 }
 0x4b7   : > { %2566 = vmatpush.bf16.msrb.mxu3 %v5983_v43 }
 0x4bb   : > { %2567 = vmatpush.bf16.msrb.mxu3 %v5975_v49  ;;  %v2108_v53 = vpop.f32.mrf.mxu1 }
 0x4bc   : > { %2269 = vrot.lane.b32.xlu2 %v2259_v12, %s7869_s3  ;;  %v2319_v12 = vperm.slane %v2317_v55, 0 }
 0x4c5   : > { %v1987_v44 = vpop.permute.xlu1 %1986 }
 0x4c6   : > { %1999 = vst.msk [vmem:[#allocation3] sm:$0xf] %vm1998_vm1, %v1987_v44 }
 0x4cd   : > { %v5890_v28 = vld [vmem:[#allocation3] sm:$0xf] }
 0x4d5   : > { %v1989_v8 = vpop.permute.xlu2 %1988 }
 0x4d6   : > { %2000 = vst.msk [vmem:[#allocation3 + $0x8] sm:$0xf] %vm1998_vm1, %v1989_v8 }
 0x4d9   : > { %v2266_v54 = vpop.permute.xlu0 %2265 }
 0x4da   : > { %2277 = vst.msk [vmem:[#allocation3 + $0x4] sm:$0xf] %vm1998_vm1, %v2266_v54 }
 0x4dd   : > { %v7161_v27 = vld [vmem:[#allocation3 + $0x4] sm:$0xf0] }
 0x4de   : > { %v5891_v56 = vor.u32 %v7161_v27, %v5890_v28 }
 0x4e0   : > { %2511 = vmatmul.bf16.vlgmr.msrb.gmra.mxu0 %v5891_v56  ;;  %2549 = vmatmul.bf16.vlgmr.msrb.gmra.mxu2 %v5891_v56  ;;  %v7695_v56 = vld [vmem:[#allocation2 + $0x8] sm:$0xff] }
 0x4e1   : > { %v2268_v18 = vpop.permute.xlu1 %2267  ;;  %v7160_v15 = vld [vmem:[#allocation3 + $0x4] sm:$0xf] }
 0x4e2   : > { %2278 = vst.msk [vmem:[#allocation3 + $0xc] sm:$0xf] %vm1998_vm1, %v2268_v18 }
 0x4e9   : > { %v5892_v57 = vld [vmem:[#allocation3 + $0x8] sm:$0xf0] }
 0x4ea   : > { %v5895_v0 = vor.u32 %v7160_v15, %v5892_v57  ;;  %v7696_v15 = vld [vmem:[#allocation2 + $0x20] sm:$0xff] }
 0x4ec   : > { %2530 = vmatmul.bf16.vlgmr.msrb.gmra.mxu1 %v5895_v0  ;;  %2568 = vmatmul.bf16.vlgmr.msrb.gmra.mxu3 %v5895_v0 }
 0x4f5   : > { %v1991_v58 = vpop.permute.xlu0 %1990 }
 0x4f6   : > { %2001 = vst.msk [vmem:[#allocation3 + $0x10] sm:$0xf] %vm1998_vm1, %v1991_v58 }
 0x4fd   : > { %v5898_v7 = vld [vmem:[#allocation3 + $0x10] sm:$0xf] }
 0x50c   : > { %v2080_v3 = vpop.xlane.xlu1 %2079 }
 0x50d   : > { %7615 = vrcp.f32 %v2080_v3 }
 0x512   : > { %v2272_v63 = vpop.permute.xlu0 %2271 }
 0x513   : > { %v7616_v45 = vpop.eup %7615 }
 0x514   : > { %v2117_v61 = vmul.f32 %v7616_v45, %v2106_v60 }
 0x516   : > { %v2121_v35 = vpack.c.bf16 %v2117_v61, %v2117_v61 }
 0x517   : > { %v2083_v62 = vpop.xlane.xlu2 %2082 }
 0x518   : > { %7617 = vrcp.f32 %v2083_v62  ;;  %2125 = vst.msk [vmem:[#allocation3 + $0x14] sm:$0xf] %vm1843_vm0, %v2121_v35 }
 0x51e   : > { %v7618_v30 = vpop.eup %7617 }
 0x51f   : > { %v2118_v25 = vmul.f32 %v7618_v30, %v2108_v53  ;;  %v2270_v1 = vpop.permute.xlu2 %2269  ;;  %v7697_v30 = vld [vmem:[#allocation2 + $0x28] sm:$0xff] }
 0x520   : > { %2279 = vst.msk [vmem:[#allocation3 + $0x14] sm:$0xf] %vm1998_vm1, %v2270_v1 }
 0x521   : > { %v2122_v51 = vpack.c.bf16 %v2118_v25, %v2118_v25  ;;  %v7698_v25 = vld [vmem:[#allocation2 + $0x38] sm:$0xff] }
 0x523   : > { %2126 = vst.msk [vmem:[#allocation3 + $0x1c] sm:$0xf] %vm1843_vm0, %v2122_v51 }
 0x524   : > { %2280 = vst.msk [vmem:[#allocation3 + $0x1c] sm:$0xf] %vm1998_vm1, %v2272_v63  ;;  %v1993_v36 = vpop.permute.xlu1 %1992 }
 0x525   : > { %2002 = vst.msk [vmem:[#allocation3 + $0x18] sm:$0xf] %vm1998_vm1, %v1993_v36 }
 0x527   : > { %v7162_v5 = vld [vmem:[#allocation3 + $0x14] sm:$0xf] }
 0x52b   : > { %v5900_v6 = vld [vmem:[#allocation3 + $0x18] sm:$0xf0] }
 0x52c   : > { %v5903_v46 = vor.u32 %v7162_v5, %v5900_v6  ;;  %v7163_v47 = vld [vmem:[#allocation3 + $0x14] sm:$0xf0] }
 0x52d   : > { %v5899_v32 = vor.u32 %v7163_v47, %v5898_v7 }
 0x52e   : > { %2535 = vmatmul.bf16.gmra.mxu1 %v5903_v46  ;;  %2573 = vmatmul.bf16.gmra.mxu3 %v5903_v46 }
 0x52f   : > { %2516 = vmatmul.bf16.gmra.mxu0 %v5899_v32  ;;  %2554 = vmatmul.bf16.gmra.mxu2 %v5899_v32 }
 0x55d   : > { %v2512_v52 = vpop.f32.mrf.mxu0 }
 0x55e   : > { %v2513_v31 = vadd.f32 %v2512_v52, %v2319_v12 }
 0x563   : > { %v2550_v13 = vpop.f32.mrf.mxu2 }
 0x564   : > { %v2551_v9 = vadd.f32 %v2550_v13, %v2320_v14 }
 0x565   : > { %v2514_v22 = vpop.f32.mrf.mxu0 }
 0x566   : > { %v2515_v29 = vadd.f32 %v2514_v22, %v2319_v12 }
 0x569   : > { %v2531_v2 = vpop.f32.mrf.mxu1 }
 0x56a   : > { %v2532_v59 = vadd.f32 %v2531_v2, %v2513_v31 }
 0x56b   : > { %v2552_v4 = vpop.f32.mrf.mxu2 }
 0x56c   : > { %v8814_v24 = vadd.f32 %v7691_v23, %v2532_v59  ;;  %v2553_v37 = vadd.f32 %v2552_v4, %v2320_v14 }
 0x56f   : > { %v2569_v17 = vpop.f32.mrf.mxu3 }
 0x570   : > { %v2570_v20 = vadd.f32 %v2569_v17, %v2551_v9 }
 0x571   : > { %v2533_v33 = vpop.f32.mrf.mxu1 }
 0x572   : > { %v8816_v21 = vadd.f32 %v7692_v41, %v2570_v20  ;;  %v2534_v11 = vadd.f32 %v2533_v33, %v2515_v29 }
 0x574   : > { %v2589_v34 = vadd.f32 %v8816_v21, %v8814_v24  ;;  %v8820_v19 = vadd.f32 %v7693_v50, %v2534_v11  ;;  %v6514_v50 = vld [vmem:[%s9975_s18 + $0x3c0] sm:$0xf] }
 0x576   : > { %2590 = vadd.xlane.f32.xlu0 %v2589_v34 }
 0x577   : > { %v2571_v38 = vpop.f32.mrf.mxu3 }
 0x578   : > { %v2572_v16 = vadd.f32 %v2571_v38, %v2553_v37  ;;  %v6258_v38 = vld [vmem:[%s9975_s18 + $0x1c0] sm:$0xf] }
 0x57a   : > { %v8822_v40 = vadd.f32 %v7694_v39, %v2572_v16  ;;  %v7256_v16 = vld [vmem:[%s9975_s18 + $0x1dc] sm:$0xf0] }
 0x57b   : > { %v6259_v39 = vor.u32 %v7256_v16, %v6258_v38  ;;  %v6130_v16 = vld [vmem:[%s9975_s18 + $0xc0] sm:$0xf] }
 0x57c   : > { %v2592_v43 = vadd.f32 %v8822_v40, %v8820_v19 }
 0x57d   : > { %3505 = vmatpush.bf16.msra.mxu0 %v6259_v39  ;;  %v6386_v39 = vld [vmem:[%s9975_s18 + $0x2c0] sm:$0xf] }
 0x57e   : > { %2593 = vadd.xlane.f32.xlu1 %v2592_v43  ;;  %v7320_v43 = vld [vmem:[%s9975_s18 + $0x3dc] sm:$0xf0] }
 0x5ab   : > { %v2536_v44 = vpop.f32.mrf.mxu1 }
 0x5ac   : > { %v2517_v42 = vpop.f32.mrf.mxu0 }
 0x5ad   : > { %v2518_v48 = vadd.f32 %v2517_v42, %v2319_v12  ;;  %v7252_v42 = vld [vmem:[%s9975_s18 + $0x1c4] sm:$0xf] }
 0x5af   : > { %v2537_v8 = vadd.f32 %v2536_v44, %v2518_v48  ;;  %v6260_v48 = vld [vmem:[%s9975_s18 + $0x1e0] sm:$0xf0]  ;;  %v6515_v44 = vor.u32 %v7320_v43, %v6514_v50  ;;  %v7224_v50 = vld [vmem:[%s9975_s18 + $0xdc] sm:$0xf0] }
 0x5b0   : > { %v6131_v43 = vor.u32 %v7224_v50, %v6130_v16  ;;  %v7260_v16 = vld [vmem:[%s9975_s18 + $0x204] sm:$0xf] }
 0x5b1   : > { %v2574_v10 = vpop.f32.mrf.mxu3  ;;  %v8826_v18 = vadd.f32 %v7695_v56, %v2537_v8  ;;  %v6516_v8 = vld [vmem:[%s9975_s18 + $0x3e0] sm:$0xf0]  ;;  %3524 = vmatpush.bf16.msra.mxu1 %v6515_v44  ;;  %v6482_v56 = vld [vmem:[%s9975_s18 + $0x380] sm:$0xf] }
 0x5b2   : > { %v2555_v49 = vpop.f32.mrf.mxu2  ;;  %v6132_v44 = vld [vmem:[%s9975_s18 + $0xe0] sm:$0xf0] }
 0x5b3   : > { %v2556_v54 = vadd.f32 %v2555_v49, %v2320_v14  ;;  %v2538_v3 = vpop.f32.mrf.mxu1  ;;  %v7316_v49 = vld [vmem:[%s9975_s18 + $0x3c4] sm:$0xf] }
 0x5b4   : > { %v2519_v28 = vpop.f32.mrf.mxu0  ;;  %v6292_v50 = vld [vmem:[%s9975_s18 + $0x220] sm:$0xf0] }
 0x5b5   : > { %v2575_v27 = vadd.f32 %v2574_v10, %v2556_v54  ;;  %v2520_v0 = vadd.f32 %v2519_v28, %v2319_v12  ;;  %v6263_v10 = vor.u32 %v7252_v42, %v6260_v48  ;;  %v6519_v54 = vor.u32 %v7316_v49, %v6516_v8  ;;  %v6226_v28 = vld [vmem:[%s9975_s18 + $0x180] sm:$0xf]  ;;  %v7220_v48 = vld [vmem:[%s9975_s18 + $0xc4] sm:$0xf] }
 0x5b6   : > { %v7288_v42 = vld [vmem:[%s9975_s18 + $0x2dc] sm:$0xf0]  ;;  %v6135_v49 = vor.u32 %v7220_v48, %v6132_v44  ;;  %v7284_v8 = vld [vmem:[%s9975_s18 + $0x2c4] sm:$0xf] }
 0x5b7   : > { %v8828_v57 = vadd.f32 %v7696_v15, %v2575_v27  ;;  %v2539_v60 = vadd.f32 %v2538_v3, %v2520_v0  ;;  %3543 = vmatpush.bf16.msra.mxu2 %v6263_v10  ;;  %v7248_v27 = vld [vmem:[%s9975_s18 + $0x19c] sm:$0xf0]  ;;  %3562 = vmatpush.bf16.msra.mxu3 %v6519_v54  ;;  %v6228_v3 = vld [vmem:[%s9975_s18 + $0x1a0] sm:$0xf0]  ;;  %v6387_v10 = vor.u32 %v7288_v42, %v6386_v39 }
 0x5b8   : > { %v6227_v15 = vor.u32 %v7248_v27, %v6226_v28  ;;  %v7312_v0 = vld [vmem:[%s9975_s18 + $0x39c] sm:$0xf0]  ;;  %v6388_v54 = vld [vmem:[%s9975_s18 + $0x2e0] sm:$0xf0] }
 0x5b9   : > { %v2595_v58 = vadd.f32 %v8828_v57, %v8826_v18  ;;  %v2576_v35 = vpop.f32.mrf.mxu3  ;;  %v8832_v53 = vadd.f32 %v7697_v30, %v2539_v60  ;;  %v6194_v30 = vld [vmem:[%s9975_s18 + $0x140] sm:$0xf]  ;;  %v6391_v28 = vor.u32 %v7284_v8, %v6388_v54 }
 0x5ba   : > { %v2557_v45 = vpop.f32.mrf.mxu2  ;;  %3506 = vmatpush.bf16.msra.mxu0 %v6227_v15  ;;  %v6098_v27 = vld [vmem:[%s9975_s18 + $0x80] sm:$0xf] }
 0x5bb   : > { %v2558_v61 = vadd.f32 %v2557_v45, %v2320_v14  ;;  %2596 = vadd.xlane.f32.xlu2 %v2595_v58  ;;  %v7244_v58 = vld [vmem:[%s9975_s18 + $0x184] sm:$0xf]  ;;  %v6483_v45 = vor.u32 %v7312_v0, %v6482_v56  ;;  %v7216_v56 = vld [vmem:[%s9975_s18 + $0x9c] sm:$0xf0] }
 0x5bc   : > { %v6231_v60 = vor.u32 %v7244_v58, %v6228_v3  ;;  %v6354_v15 = vld [vmem:[%s9975_s18 + $0x280] sm:$0xf]  ;;  %v6099_v0 = vor.u32 %v7216_v56, %v6098_v27  ;;  %v7212_v3 = vld [vmem:[%s9975_s18 + $0x84] sm:$0xf] }
 0x5bd   : > { %v2577_v62 = vadd.f32 %v2576_v35, %v2558_v61  ;;  %v7308_v61 = vld [vmem:[%s9975_s18 + $0x384] sm:$0xf]  ;;  %3525 = vmatpush.bf16.msra.mxu1 %v6483_v45  ;;  %v7280_v58 = vld [vmem:[%s9975_s18 + $0x29c] sm:$0xf0] }
 0x5be   : > { %v6484_v35 = vld [vmem:[%s9975_s18 + $0x3a0] sm:$0xf0]  ;;  %3544 = vmatpush.bf16.msra.mxu2 %v6231_v60  ;;  %v6355_v60 = vor.u32 %v7280_v58, %v6354_v15  ;;  %v2587_v58 = vld [vmem:[%s714_s19] sm:$0x3] }
 0x5bf   : > { %v8834_v1 = vadd.f32 %v7698_v25, %v2577_v62  ;;  %v6487_v62 = vor.u32 %v7308_v61, %v6484_v35  ;;  %v7240_v25 = vld [vmem:[%s9975_s18 + $0x15c] sm:$0xf0]  ;;  %v6100_v45 = vld [vmem:[%s9975_s18 + $0xa0] sm:$0xf0] }
 0x5c0   : > { %v6103_v61 = vor.u32 %v7212_v3, %v6100_v45  ;;  %v7276_v35 = vld [vmem:[%s9975_s18 + $0x284] sm:$0xf] }
 0x5c1   : > { %v2598_v51 = vadd.f32 %v8834_v1, %v8832_v53  ;;  %3563 = vmatpush.bf16.msra.mxu3 %v6487_v62  ;;  %v6356_v62 = vld [vmem:[%s9975_s18 + $0x2a0] sm:$0xf0] }
 0x5c3   : > { %2599 = vadd.xlane.f32.xlu0 %v2598_v51  ;;  %v6450_v51 = vld [vmem:[%s9975_s18 + $0x340] sm:$0xf] }
 0x5e9   : > { %v2591_v63 = vpop.xlane.xlu0 %2590 }
 0x5ea   : > { %v2601_v36 = vmul.f32 %v2591_v63, %v8119_v26  ;;  %v6195_v63 = vor.u32 %v7240_v25, %v6194_v30  ;;  %v6359_v30 = vor.u32 %v7276_v35, %v6356_v62  ;;  %v6066_v25 = vld [vmem:[%s9975_s18 + $0x40] sm:$0xf]  ;;  %v8958_v35 = vperm.slane %v2587_v58, 0 }
 0x5eb   : > { %v8960_v62 = vperm.slane %v2587_v58, 1  ;;  %v6458_v58 = vld [vmem:[%s9975_s18 + $0x348] sm:$0xf] }
 0x5ec   : > { %v8840_v5 = vsub.f32 %v8814_v24, %v2601_v36  ;;  %v8843_v6 = vsub.f32 %v8816_v21, %v2601_v36  ;;  %v7304_v36 = vld [vmem:[%s9975_s18 + $0x35c] sm:$0xf0]  ;;  %3507 = vmatpush.bf16.msra.mxu0 %v6195_v63 }
 0x5ed   : > { %v6322_v63 = vld [vmem:[%s9975_s18 + $0x240] sm:$0xf] }
 0x5ee   : > { %v2613_v46 = vmul.f32 %v8840_v5, %v8840_v5  ;;  %v2614_v7 = vmul.f32 %v8843_v6, %v8843_v6 }
 0x5f0   : > { %v2621_v47 = vadd.f32 %v2614_v7, %v2613_v46  ;;  %v7236_v46 = vld [vmem:[%s9975_s18 + $0x144] sm:$0xf] }
 0x5f1   : > { %v2594_v32 = vpop.xlane.xlu1 %2593  ;;  %v6196_v7 = vld [vmem:[%s9975_s18 + $0x160] sm:$0xf0] }
 0x5f2   : > { %v2602_v55 = vmul.f32 %v2594_v32, %v8119_v26  ;;  %2622 = vadd.xlane.f32.xlu1 %v2621_v47  ;;  %v6451_v47 = vor.u32 %v7304_v36, %v6450_v51  ;;  %v6199_v32 = vor.u32 %v7236_v46, %v6196_v7  ;;  %v7208_v51 = vld [vmem:[%s9975_s18 + $0x5c] sm:$0xf0]  ;;  %v7204_v7 = vld [vmem:[%s9975_s18 + $0x44] sm:$0xf] }
 0x5f3   : > { %v6067_v36 = vor.u32 %v7208_v51, %v6066_v25  ;;  %v7272_v46 = vld [vmem:[%s9975_s18 + $0x25c] sm:$0xf0] }
 0x5f4   : > { %v8851_v52 = vsub.f32 %v8820_v19, %v2602_v55  ;;  %v8854_v12 = vsub.f32 %v8822_v40, %v2602_v55  ;;  %v7300_v55 = vld [vmem:[%s9975_s18 + $0x344] sm:$0xf]  ;;  %3526 = vmatpush.bf16.msra.mxu1 %v6451_v47  ;;  %3545 = vmatpush.bf16.msra.mxu2 %v6199_v32 }
 0x5f5   : > { %v6068_v47 = vld [vmem:[%s9975_s18 + $0x60] sm:$0xf0] }
 0x5f6   : > { %v2615_v13 = vmul.f32 %v8851_v52, %v8851_v52  ;;  %v2616_v2 = vmul.f32 %v8854_v12, %v8854_v12 }
 0x5f8   : > { %v2624_v14 = vadd.f32 %v2616_v2, %v2615_v13  ;;  %v6452_v13 = vld [vmem:[%s9975_s18 + $0x360] sm:$0xf0] }
 0x5f9   : > { %v6455_v2 = vor.u32 %v7300_v55, %v6452_v13  ;;  %v6323_v55 = vor.u32 %v7272_v46, %v6322_v63  ;;  %v6071_v13 = vor.u32 %v7204_v7, %v6068_v47 }
 0x5fa   : > { %2625 = vadd.xlane.f32.xlu2 %v2624_v14  ;;  %v6162_v14 = vld [vmem:[%s9975_s18 + $0x100] sm:$0xf] }
 0x5fb   : > { %3564 = vmatpush.bf16.msra.mxu3 %v6455_v2  ;;  %v7268_v2 = vld [vmem:[%s9975_s18 + $0x244] sm:$0xf] }
 0x62e   : > { %v2597_v31 = vpop.xlane.xlu2 %2596 }
 0x62f   : > { %v2603_v9 = vmul.f32 %v2597_v31, %v8119_v26  ;;  %v7232_v31 = vld [vmem:[%s9975_s18 + $0x11c] sm:$0xf0] }
 0x631   : > { %v8862_v59 = vsub.f32 %v8826_v18, %v2603_v9  ;;  %v8865_v17 = vsub.f32 %v8828_v57, %v2603_v9  ;;  %v6418_v9 = vld [vmem:[%s9975_s18 + $0x300] sm:$0xf] }
 0x633   : > { %v2617_v20 = vmul.f32 %v8862_v59, %v8862_v59  ;;  %v2618_v22 = vmul.f32 %v8865_v17, %v8865_v17 }
 0x635   : > { %v2627_v23 = vadd.f32 %v2618_v22, %v2617_v20  ;;  %v6163_v20 = vor.u32 %v7232_v31, %v6162_v14  ;;  %v7296_v22 = vld [vmem:[%s9975_s18 + $0x31c] sm:$0xf0]  ;;  %v6324_v14 = vld [vmem:[%s9975_s18 + $0x260] sm:$0xf0] }
 0x636   : > { %v2600_v41 = vpop.xlane.xlu0 %2599 }
 0x637   : > { %v2604_v4 = vmul.f32 %v2600_v41, %v8119_v26  ;;  %2628 = vadd.xlane.f32.xlu0 %v2627_v23  ;;  %v7228_v23 = vld [vmem:[%s9975_s18 + $0x104] sm:$0xf]  ;;  %3508 = vmatpush.bf16.msra.mxu0 %v6163_v20  ;;  %v6034_v20 = vld [vmem:[%s9975_s18] sm:$0xf] }
 0x638   : > { %v6164_v41 = vld [vmem:[%s9975_s18 + $0x120] sm:$0xf0] }
 0x639   : > { %v8873_v33 = vsub.f32 %v8832_v53, %v2604_v4  ;;  %v8876_v29 = vsub.f32 %v8834_v1, %v2604_v4  ;;  %v6419_v4 = vor.u32 %v7296_v22, %v6418_v9  ;;  %v6327_v9 = vor.u32 %v7268_v2, %v6324_v14  ;;  %v7200_v22 = vld [vmem:[%s9975_s18 + $0x1c] sm:$0xf0] }
 0x63b   : > { %v2619_v34 = vmul.f32 %v8873_v33, %v8873_v33  ;;  %v2620_v37 = vmul.f32 %v8876_v29, %v8876_v29  ;;  %3527 = vmatpush.bf16.msra.mxu1 %v6419_v4  ;;  %3509 = vmatpush.bf16.msra.mxu0 %v6131_v43  ;;  %v6035_v4 = vor.u32 %v7200_v22, %v6034_v20  ;;  %v7257_v20 = vld [vmem:[%s9975_s18 + $0x1e4] sm:$0xf0] }
 0x63c   : > { %v6295_v43 = vor.u32 %v7260_v16, %v6292_v50  ;;  %v6522_v22 = vld [vmem:[%s9975_s18 + $0x3c8] sm:$0xf]  ;;  %v6524_v16 = vld [vmem:[%s9975_s18 + $0x3e8] sm:$0xf0] }
 0x63d   : > { %v2630_v11 = vadd.f32 %v2620_v37, %v2619_v34  ;;  %v6167_v34 = vor.u32 %v7228_v23, %v6164_v41  ;;  %v7292_v37 = vld [vmem:[%s9975_s18 + $0x304] sm:$0xf]  ;;  %v6290_v23 = vld [vmem:[%s9975_s18 + $0x200] sm:$0xf] }
 0x63f   : > { %2631 = vadd.xlane.f32.xlu1 %v2630_v11  ;;  %v6420_v11 = vld [vmem:[%s9975_s18 + $0x320] sm:$0xf0]  ;;  %3546 = vmatpush.bf16.msra.mxu2 %v6167_v34  ;;  %v7264_v34 = vld [vmem:[%s9975_s18 + $0x21c] sm:$0xf0] }
 0x640   : > { %v6423_v38 = vor.u32 %v7292_v37, %v6420_v11  ;;  %3528 = vmatpush.bf16.msra.mxu1 %v6387_v10  ;;  %3510 = vmatpush.bf16.msra.mxu0 %v6099_v0  ;;  %v7196_v37 = vld [vmem:[%s9975_s18 + $0x4] sm:$0xf]  ;;  %v6291_v11 = vor.u32 %v7264_v34, %v6290_v23  ;;  %v6268_v34 = vld [vmem:[%s9975_s18 + $0x1e8] sm:$0xf0] }
 0x642   : > { %3565 = vmatpush.bf16.msra.mxu3 %v6423_v38  ;;  %v6036_v38 = vld [vmem:[%s9975_s18 + $0x20] sm:$0xf0] }
 0x643   : > { %3547 = vmatpush.bf16.msra.mxu2 %v6135_v49  ;;  %v6039_v39 = vor.u32 %v7196_v37, %v6036_v38  ;;  %v7317_v38 = vld [vmem:[%s9975_s18 + $0x3cc] sm:$0xf] }
 0x644   : > { %3529 = vmatpush.bf16.msra.mxu1 %v6355_v60  ;;  %3511 = vmatpush.bf16.msra.mxu0 %v6067_v36  ;;  %v6527_v50 = vor.u32 %v7317_v38, %v6524_v16  ;;  %v7289_v16 = vld [vmem:[%s9975_s18 + $0x2e4] sm:$0xf0] }
 0x646   : > { %3566 = vmatpush.bf16.msra.mxu3 %v6391_v28 }
 0x647   : > { %3548 = vmatpush.bf16.msra.mxu2 %v6103_v61  ;;  %v2588_v61 = vld [vmem:[%s718_s17] sm:$0x3] }
 0x648   : > { %3530 = vmatpush.bf16.msra.mxu1 %v6323_v55  ;;  %3512 = vmatpush.bf16.msra.mxu0 %v6035_v4  ;;  %v8964_v63 = vperm.slane %v2588_v61, 0  ;;  %v8966_v36 = vperm.slane %v2588_v61, 1  ;;  %v7253_v4 = vld [vmem:[%s9975_s18 + $0x1cc] sm:$0xf] }
 0x649   : > { %v6204_v61 = vld [vmem:[%s9975_s18 + $0x168] sm:$0xf0] }
 0x64a   : > { %3567 = vmatpush.bf16.msra.mxu3 %v6359_v30 }
 0x64b   : > { %3549 = vmatpush.bf16.msra.mxu2 %v6071_v13 }
 0x64c   : > { %3531 = vmatpush.bf16.msra.mxu1 %v6291_v11  ;;  %v6271_v11 = vor.u32 %v7253_v4, %v6268_v34  ;;  %v6138_v34 = vld [vmem:[%s9975_s18 + $0xc8] sm:$0xf] }
 0x64e   : > { %3568 = vmatpush.bf16.msra.mxu3 %v6327_v9  ;;  %v6266_v9 = vld [vmem:[%s9975_s18 + $0x1c8] sm:$0xf] }
 0x64f   : > { %3550 = vmatpush.bf16.msra.mxu2 %v6039_v39  ;;  %v6267_v23 = vor.u32 %v7257_v20, %v6266_v9  ;;  %v6234_v39 = vld [vmem:[%s9975_s18 + $0x188] sm:$0xf]  ;;  %v6172_v20 = vld [vmem:[%s9975_s18 + $0x128] sm:$0xf0] }
 0x651   : > { %3581 = vmatpush.bf16.msrb.mxu0 %v6267_v23  ;;  %v6428_v23 = vld [vmem:[%s9975_s18 + $0x328] sm:$0xf0] }
 0x652   : > { %3569 = vmatpush.bf16.msra.mxu3 %v6295_v43  ;;  %v7249_v43 = vld [vmem:[%s9975_s18 + $0x1a4] sm:$0xf0] }
 0x653   : > { %3619 = vmatpush.bf16.msrb.mxu2 %v6271_v11  ;;  %v6394_v11 = vld [vmem:[%s9975_s18 + $0x2c8] sm:$0xf] }
 0x656   : > { %3638 = vmatpush.bf16.msrb.mxu3 %v6527_v50  ;;  %v7221_v50 = vld [vmem:[%s9975_s18 + $0xcc] sm:$0xf] }
 0x665   : > { %v2623_v32 = vpop.xlane.xlu1 %2622 }
 0x666   : > { %v2633_v31 = vmul.f32 %v2623_v32, %v8119_v26 }
 0x668   : > { %v2637_v41 = vadd.f32 1e-12, %v2633_v31 }
 0x66a   : > { %7619 = vrsqrt.f32 %v2637_v41  ;;  %vm2647_vm3 = vweird.f32 %v2637_v41 }
 0x66d   : > { %v2626_v42 = vpop.xlane.xlu2 %2625 }
 0x66e   : > { %v2634_v48 = vmul.f32 %v2626_v42, %v8119_v26  ;;  %v6490_v42 = vld [vmem:[%s9975_s18 + $0x388] sm:$0xf] }
 0x670   : > { %v7620_v44 = vpop.eup %7619  ;;  %v2638_v10 = vadd.f32 1e-12, %v2634_v48  ;;  %v6235_v48 = vor.u32 %v7249_v43, %v6234_v39  ;;  %v6140_v39 = vld [vmem:[%s9975_s18 + $0xe8] sm:$0xf0] }
 0x671   : > { %v2642_v49 = vmul.f32 %v7620_v44, %v2637_v41  ;;  %vm2648_vm2 = vweird.f32 %v7620_v44  ;;  %v7321_v41 = vld [vmem:[%s9975_s18 + $0x3e4] sm:$0xf0] }
 0x672   : > { %7621 = vrsqrt.f32 %v2638_v10  ;;  %vm2649_vm4 = vmor %vm2647_vm3, %vm2648_vm2  ;;  %vm2657_vm6 = vweird.f32 %v2638_v10  ;;  %v6523_v37 = vor.u32 %v7321_v41, %v6522_v22  ;;  %3582 = vmatpush.bf16.msrb.mxu0 %v6235_v48  ;;  %v7293_v22 = vld [vmem:[%s9975_s18 + $0x30c] sm:$0xf]  ;;  %v6143_v48 = vor.u32 %v7221_v50, %v6140_v39 }
 0x673   : > { %v2643_v8 = vmul.f32 %v7620_v44, %v2642_v49  ;;  %v6236_v49 = vld [vmem:[%s9975_s18 + $0x1a8] sm:$0xf0]  ;;  %v6431_v4 = vor.u32 %v7293_v22, %v6428_v23 }
 0x674   : > { %3600 = vmatpush.bf16.msrb.mxu1 %v6523_v37  ;;  %v7225_v37 = vld [vmem:[%s9975_s18 + $0xe4] sm:$0xf0]  ;;  %v7261_v50 = vld [vmem:[%s9975_s18 + $0x20c] sm:$0xf] }
 0x675   : > { %v2644_v54 = vmul.f32 0.5, %v2643_v8  ;;  %v6139_v38 = vor.u32 %v7225_v37, %v6138_v34  ;;  %v7265_v34 = vld [vmem:[%s9975_s18 + $0x224] sm:$0xf0]  ;;  %v6300_v39 = vld [vmem:[%s9975_s18 + $0x228] sm:$0xf0] }
 0x677   : > { %v2645_v28 = vsub.f32 1.5, %v2644_v54 }
 0x678   : > { %v7622_v27 = vpop.eup %7621 }
 0x679   : > { %v2646_v56 = vmul.f32 %v7620_v44, %v2645_v28  ;;  %v2652_v15 = vmul.f32 %v7622_v27, %v2638_v10  ;;  %vm2658_vm5 = vweird.f32 %v7622_v27  ;;  %v7245_v10 = vld [vmem:[%s9975_s18 + $0x18c] sm:$0xf] }
 0x67a   : > { %vm2659_vm7 = vmor %vm2657_vm6, %vm2658_vm5  ;;  %v6239_v54 = vor.u32 %v7245_v10, %v6236_v49  ;;  %v7309_v28 = vld [vmem:[%s9975_s18 + $0x38c] sm:$0xf]  ;;  %v6106_v49 = vld [vmem:[%s9975_s18 + $0x88] sm:$0xf] }
 0x67b   : > { %v2653_v0 = vmul.f32 %v7622_v27, %v2652_v15  ;;  %v2650_v3 = vsel %vm2649_vm4, %v7620_v44, %v2646_v56  ;;  %v7313_v44 = vld [vmem:[%s9975_s18 + $0x3a4] sm:$0xf0]  ;;  %v6396_v10 = vld [vmem:[%s9975_s18 + $0x2e8] sm:$0xf0] }
 0x67c   : > { %v2681_v30 = vmul.f32 %v2650_v3, %v8840_v5  ;;  %v2682_v25 = vmul.f32 %v2650_v3, %v8843_v6  ;;  %v6491_v8 = vor.u32 %v7313_v44, %v6490_v42  ;;  %3620 = vmatpush.bf16.msrb.mxu2 %v6239_v54  ;;  %v6202_v15 = vld [vmem:[%s9975_s18 + $0x148] sm:$0xf]  ;;  %v6395_v42 = vor.u32 %v7289_v16, %v6394_v11  ;;  %v7285_v44 = vld [vmem:[%s9975_s18 + $0x2cc] sm:$0xf] }
 0x67d   : > { %v2654_v45 = vmul.f32 0.5, %v2653_v0  ;;  %v7241_v0 = vld [vmem:[%s9975_s18 + $0x164] sm:$0xf0]  ;;  %v6399_v54 = vor.u32 %v7285_v44, %v6396_v10  ;;  %v7197_v11 = vld [vmem:[%s9975_s18 + $0xc] sm:$0xf]  ;;  %v6303_v10 = vor.u32 %v7261_v50, %v6300_v39 }
 0x67e   : > { %v2694_v7 = vmul.f32 %v8958_v35, %v2681_v30  ;;  %v2695_v47 = vmul.f32 %v8960_v62, %v2682_v25  ;;  %3601 = vmatpush.bf16.msrb.mxu1 %v6491_v8  ;;  %v6203_v3 = vor.u32 %v7241_v0, %v6202_v15  ;;  %v6212_v50 = vld [vmem:[%s9975_s18 + $0x170] sm:$0xf0] }
 0x67f   : > { %v2655_v60 = vsub.f32 1.5, %v2654_v45  ;;  %v7305_v45 = vld [vmem:[%s9975_s18 + $0x364] sm:$0xf0] }
 0x680   : > { %v2707_v13 = vadd.f32 %v8964_v63, %v2694_v7  ;;  %v2708_v2 = vadd.f32 %v8966_v36, %v2695_v47  ;;  %v6459_v25 = vor.u32 %v7305_v45, %v6458_v58  ;;  %v6460_v7 = vld [vmem:[%s9975_s18 + $0x368] sm:$0xf0]  ;;  %3583 = vmatpush.bf16.msrb.mxu0 %v6203_v3 }
 0x681   : > { %v2656_v51 = vmul.f32 %v7622_v27, %v2655_v60  ;;  %v7237_v60 = vld [vmem:[%s9975_s18 + $0x14c] sm:$0xf] }
 0x682   : > { %3602 = vmatpush.bf16.msrb.mxu1 %v6459_v25  ;;  %v7213_v58 = vld [vmem:[%s9975_s18 + $0x8c] sm:$0xf]  ;;  %v6074_v25 = vld [vmem:[%s9975_s18 + $0x48] sm:$0xf] }
 0x683   : > { %v2660_v46 = vsel %vm2659_vm7, %v7622_v27, %v2656_v51  ;;  %v6492_v27 = vld [vmem:[%s9975_s18 + $0x3a8] sm:$0xf0]  ;;  %v6207_v51 = vor.u32 %v7237_v60, %v6204_v61 }
 0x684   : > { %v2683_v32 = vmul.f32 %v2660_v46, %v8851_v52  ;;  %v2684_v5 = vmul.f32 %v2660_v46, %v8854_v12  ;;  %v6495_v56 = vor.u32 %v7309_v28, %v6492_v27  ;;  %v7301_v46 = vld [vmem:[%s9975_s18 + $0x34c] sm:$0xf]  ;;  %v7217_v28 = vld [vmem:[%s9975_s18 + $0xa4] sm:$0xf0] }
 0x685   : > { %3621 = vmatpush.bf16.msrb.mxu2 %v6207_v51  ;;  %v6362_v27 = vld [vmem:[%s9975_s18 + $0x288] sm:$0xf]  ;;  %v6107_v15 = vor.u32 %v7217_v28, %v6106_v49  ;;  %v6108_v3 = vld [vmem:[%s9975_s18 + $0xa8] sm:$0xf0] }
 0x686   : > { %v2696_v6 = vmul.f32 %v8958_v35, %v2683_v32  ;;  %v2697_v55 = vmul.f32 %v8960_v62, %v2684_v5  ;;  %3639 = vmatpush.bf16.msrb.mxu3 %v6495_v56  ;;  %v6463_v32 = vor.u32 %v7301_v46, %v6460_v7  ;;  %v6170_v5 = vld [vmem:[%s9975_s18 + $0x108] sm:$0xf]  ;;  %v7277_v45 = vld [vmem:[%s9975_s18 + $0x28c] sm:$0xf]  ;;  %v6111_v61 = vor.u32 %v7213_v58, %v6108_v3  ;;  %v7254_v58 = vld [vmem:[%s9975_s18 + $0x1d4] sm:$0xf] }
 0x687   : > { %v7281_v56 = vld [vmem:[%s9975_s18 + $0x2a4] sm:$0xf0]  ;;  %v6276_v3 = vld [vmem:[%s9975_s18 + $0x1f0] sm:$0xf0] }
 0x688   : > { %v2709_v14 = vadd.f32 %v8964_v63, %v2696_v6  ;;  %v2710_v31 = vadd.f32 %v8966_v36, %v2697_v55  ;;  %v7233_v6 = vld [vmem:[%s9975_s18 + $0x124] sm:$0xf0]  ;;  %v6363_v0 = vor.u32 %v7281_v56, %v6362_v27  ;;  %v6274_v27 = vld [vmem:[%s9975_s18 + $0x1d0] sm:$0xf] }
 0x689   : > { %v6426_v55 = vld [vmem:[%s9975_s18 + $0x308] sm:$0xf]  ;;  %v7258_v56 = vld [vmem:[%s9975_s18 + $0x1ec] sm:$0xf0] }
 0x68a   : > { %v8978_v52 = vpack.c.bf16 %v2709_v14, %v2707_v13  ;;  %v8980_v12 = vpack.c.bf16 %v2710_v31, %v2708_v2  ;;  %3640 = vmatpush.bf16.msrb.mxu3 %v6463_v32  ;;  %v6171_v2 = vor.u32 %v7233_v6, %v6170_v5  ;;  %v7297_v14 = vld [vmem:[%s9975_s18 + $0x324] sm:$0xf0]  ;;  %v7229_v31 = vld [vmem:[%s9975_s18 + $0x10c] sm:$0xf] }
 0x68b   : > { %v6427_v9 = vor.u32 %v7297_v14, %v6426_v55  ;;  %v6175_v41 = vor.u32 %v7229_v31, %v6172_v20  ;;  %v7209_v7 = vld [vmem:[%s9975_s18 + $0x64] sm:$0xf0]  ;;  %v7205_v6 = vld [vmem:[%s9975_s18 + $0x4c] sm:$0xf] }
 0x68c   : > { %3513 = vmatmul.bf16.vlgmr.msra.gmra.mxu0 %v8978_v52  ;;  %3532 = vmatmul.bf16.vlgmr.msra.gmra.mxu1 %v8980_v12  ;;  %v7273_v32 = vld [vmem:[%s9975_s18 + $0x264] sm:$0xf0]  ;;  %v6075_v5 = vor.u32 %v7209_v7, %v6074_v25  ;;  %v6076_v55 = vld [vmem:[%s9975_s18 + $0x68] sm:$0xf0]  ;;  %v6532_v25 = vld [vmem:[%s9975_s18 + $0x3f0] sm:$0xf0] }
 0x68d   : > { %3551 = vmatmul.bf16.vlgmr.msra.gmra.mxu2 %v8978_v52  ;;  %3570 = vmatmul.bf16.vlgmr.msra.gmra.mxu3 %v8980_v12  ;;  %v7269_v31 = vld [vmem:[%s9975_s18 + $0x24c] sm:$0xf]  ;;  %v6042_v20 = vld [vmem:[%s9975_s18 + $0x8] sm:$0xf]  ;;  %v6079_v22 = vor.u32 %v7205_v6, %v6076_v55  ;;  %v6242_v7 = vld [vmem:[%s9975_s18 + $0x190] sm:$0xf] }
 0x68e   : > { %3584 = vmatpush.bf16.msrb.mxu0 %v6171_v2  ;;  %3603 = vmatpush.bf16.msrb.mxu1 %v6427_v9  ;;  %v6332_v9 = vld [vmem:[%s9975_s18 + $0x268] sm:$0xf0]  ;;  %v7246_v55 = vld [vmem:[%s9975_s18 + $0x194] sm:$0xf] }
 0x68f   : > { %3622 = vmatpush.bf16.msrb.mxu2 %v6175_v41  ;;  %3641 = vmatpush.bf16.msrb.mxu3 %v6431_v4  ;;  %v6335_v23 = vor.u32 %v7269_v31, %v6332_v9  ;;  %v7201_v41 = vld [vmem:[%s9975_s18 + $0x24] sm:$0xf0]  ;;  %v6244_v31 = vld [vmem:[%s9975_s18 + $0x1b0] sm:$0xf0] }
 0x690   : > { %v6298_v4 = vld [vmem:[%s9975_s18 + $0x208] sm:$0xf]  ;;  %v6043_v16 = vor.u32 %v7201_v41, %v6042_v20  ;;  %v7310_v9 = vld [vmem:[%s9975_s18 + $0x394] sm:$0xf] }
 0x691   : > { %v6500_v20 = vld [vmem:[%s9975_s18 + $0x3b0] sm:$0xf0] }
 0x692   : > { %3585 = vmatpush.bf16.msrb.mxu0 %v6139_v38  ;;  %3604 = vmatpush.bf16.msrb.mxu1 %v6395_v42  ;;  %v6044_v38 = vld [vmem:[%s9975_s18 + $0x28] sm:$0xf0]  ;;  %v6299_v42 = vor.u32 %v7265_v34, %v6298_v4  ;;  %v6503_v41 = vor.u32 %v7310_v9, %v6500_v20  ;;  %v6210_v4 = vld [vmem:[%s9975_s18 + $0x150] sm:$0xf]  ;;  %v7222_v6 = vld [vmem:[%s9975_s18 + $0xd4] sm:$0xf] }
 0x693   : > { %3623 = vmatpush.bf16.msrb.mxu2 %v6143_v48  ;;  %3642 = vmatpush.bf16.msrb.mxu3 %v6399_v54  ;;  %v6047_v44 = vor.u32 %v7197_v11, %v6044_v38  ;;  %v7242_v34 = vld [vmem:[%s9975_s18 + $0x16c] sm:$0xf0] }
 0x694   : > { %v7306_v38 = vld [vmem:[%s9975_s18 + $0x36c] sm:$0xf0] }
 0x695   : > { %v7218_v20 = vld [vmem:[%s9975_s18 + $0xac] sm:$0xf0] }
 0x696   : > { %3586 = vmatpush.bf16.msrb.mxu0 %v6107_v15  ;;  %3605 = vmatpush.bf16.msrb.mxu1 %v6363_v0  ;;  %v6530_v15 = vld [vmem:[%s9975_s18 + $0x3d0] sm:$0xf] }
 0x697   : > { %3624 = vmatpush.bf16.msrb.mxu2 %v6111_v61  ;;  %v7322_v0 = vld [vmem:[%s9975_s18 + $0x3ec] sm:$0xf0] }
 0x698   : > { %v6531_v61 = vor.u32 %v7322_v0, %v6530_v15  ;;  %v7298_v15 = vld [vmem:[%s9975_s18 + $0x32c] sm:$0xf0]  ;;  %v6180_v0 = vld [vmem:[%s9975_s18 + $0x130] sm:$0xf0] }
 0x69a   : > { %3587 = vmatpush.bf16.msrb.mxu0 %v6075_v5 }
 0x69b   : > { %3625 = vmatpush.bf16.msrb.mxu2 %v6079_v22 }
 0x69e   : > { %3588 = vmatpush.bf16.msrb.mxu0 %v6043_v16  ;;  %v7238_v16 = vld [vmem:[%s9975_s18 + $0x154] sm:$0xf] }
 0x69f   : > { %3626 = vmatpush.bf16.msrb.mxu2 %v6047_v44  ;;  %v7302_v44 = vld [vmem:[%s9975_s18 + $0x354] sm:$0xf] }
 0x6aa   : > { %v2629_v30 = vpop.xlane.xlu0 %2628 }
 0x6ab   : > { %v2635_v47 = vmul.f32 %v2629_v30, %v8119_v26  ;;  %v6364_v30 = vld [vmem:[%s9975_s18 + $0x2a8] sm:$0xf0] }
 0x6ac   : > { %v6367_v46 = vor.u32 %v7277_v45, %v6364_v30  ;;  %v7318_v30 = vld [vmem:[%s9975_s18 + $0x3d4] sm:$0xf] }
 0x6ad   : > { %v9014_v13 = vadd.f32 1e-12, %v2635_v47  ;;  %v6330_v47 = vld [vmem:[%s9975_s18 + $0x248] sm:$0xf] }
 0x6ae   : > { %v6331_v14 = vor.u32 %v7273_v32, %v6330_v47  ;;  %3643 = vmatpush.bf16.msrb.mxu3 %v6367_v46  ;;  %v6535_v46 = vor.u32 %v7318_v30, %v6532_v25  ;;  %v7250_v47 = vld [vmem:[%s9975_s18 + $0x1ac] sm:$0xf0] }
 0x6af   : > { %7623 = vrsqrt.f32 %v9014_v13  ;;  %vm2667_vm9 = vweird.f32 %v9014_v13  ;;  %v6498_v32 = vld [vmem:[%s9975_s18 + $0x390] sm:$0xf] }
 0x6b0   : > { %3606 = vmatpush.bf16.msrb.mxu1 %v6331_v14 }
 0x6b2   : > { %v2632_v43 = vpop.xlane.xlu1 %2631  ;;  %3644 = vmatpush.bf16.msrb.mxu3 %v6335_v23  ;;  %v6247_v23 = vor.u32 %v7246_v55, %v6244_v31  ;;  %v6114_v31 = vld [vmem:[%s9975_s18 + $0x90] sm:$0xf] }
 0x6b3   : > { %v2636_v8 = vmul.f32 %v2632_v43, %v8119_v26 }
 0x6b4   : > { %3607 = vmatpush.bf16.msrb.mxu1 %v6299_v42  ;;  %v6215_v42 = vor.u32 %v7238_v16, %v6212_v50  ;;  %v6082_v16 = vld [vmem:[%s9975_s18 + $0x50] sm:$0xf] }
 0x6b5   : > { %v7624_v60 = vpop.eup %7623  ;;  %v9038_v26 = vadd.f32 1e-12, %v2636_v8  ;;  %v7210_v50 = vld [vmem:[%s9975_s18 + $0x6c] sm:$0xf0] }
 0x6b6   : > { %v2662_v51 = vmul.f32 %v7624_v60, %v9014_v13  ;;  %vm2668_vm8 = vweird.f32 %v7624_v60  ;;  %3645 = vmatpush.bf16.msrb.mxu3 %v6303_v10  ;;  %v6275_v13 = vor.u32 %v7258_v56, %v6274_v27  ;;  %v6468_v10 = vld [vmem:[%s9975_s18 + $0x370] sm:$0xf0]  ;;  %v6434_v56 = vld [vmem:[%s9975_s18 + $0x310] sm:$0xf] }
 0x6b7   : > { %7625 = vrsqrt.f32 %v9038_v26  ;;  %vm2669_vm10 = vmor %vm2667_vm9, %vm2668_vm8  ;;  %vm2677_vm12 = vweird.f32 %v9038_v26  ;;  %v6471_v27 = vor.u32 %v7302_v44, %v6468_v10  ;;  %v6083_v10 = vor.u32 %v7210_v50, %v6082_v16  ;;  %v7307_v50 = vld [vmem:[%s9975_s18 + $0x374] sm:$0xf0] }
 0x6b8   : > { %v2663_v2 = vmul.f32 %v7624_v60, %v2662_v51  ;;  %3657 = vmatpush.bf16.msra.mxu0 %v6275_v13  ;;  %3676 = vmatpush.bf16.msra.mxu1 %v6531_v61  ;;  %v7230_v13 = vld [vmem:[%s9975_s18 + $0x114] sm:$0xf] }
 0x6b9   : > { %v7294_v61 = vld [vmem:[%s9975_s18 + $0x314] sm:$0xf] }
 0x6ba   : > { %v2664_v37 = vmul.f32 0.5, %v2663_v2  ;;  %3714 = vmatpush.bf16.msra.mxu3 %v6535_v46 }
 0x6bc   : > { %v2665_v43 = vsub.f32 1.5, %v2664_v37  ;;  %v6466_v37 = vld [vmem:[%s9975_s18 + $0x350] sm:$0xf] }
 0x6bd   : > { %v7626_v48 = vpop.eup %7625 }
 0x6be   : > { %v2666_v49 = vmul.f32 %v7624_v60, %v2665_v43  ;;  %v2672_v8 = vmul.f32 %v7626_v48, %v9038_v26  ;;  %vm2678_vm11 = vweird.f32 %v7626_v48  ;;  %v7314_v26 = vld [vmem:[%s9975_s18 + $0x3ac] sm:$0xf0]  ;;  %v6467_v43 = vor.u32 %v7306_v38, %v6466_v37  ;;  %3715 = vmatpush.bf16.msra.mxu3 %v6503_v41  ;;  %v6116_v37 = vld [vmem:[%s9975_s18 + $0xb0] sm:$0xf0] }
 0x6bf   : > { %vm9075_vm13 = vmor %vm2677_vm12, %vm2678_vm11  ;;  %v6499_v14 = vor.u32 %v7314_v26, %v6498_v32  ;;  %v7226_v32 = vld [vmem:[%s9975_s18 + $0xec] sm:$0xf0]  ;;  %v6115_v41 = vor.u32 %v7218_v20, %v6114_v31  ;;  %v6372_v38 = vld [vmem:[%s9975_s18 + $0x2b0] sm:$0xf0] }
 0x6c0   : > { %v2670_v54 = vsel %vm2669_vm10, %v7624_v60, %v2666_v49  ;;  %v2673_v28 = vmul.f32 %v7626_v48, %v2672_v8  ;;  %v6279_v60 = vor.u32 %v7254_v58, %v6276_v3  ;;  %v6178_v49 = vld [vmem:[%s9975_s18 + $0x110] sm:$0xf]  ;;  %v7315_v31 = vld [vmem:[%s9975_s18 + $0x3b4] sm:$0xf0] }
 0x6c1   : > { %v2685_v51 = vmul.f32 %v2670_v54, %v8862_v59  ;;  %v6243_v59 = vor.u32 %v7250_v47, %v6242_v7  ;;  %v2686_v2 = vmul.f32 %v2670_v54, %v8865_v17  ;;  %v6211_v17 = vor.u32 %v7242_v34, %v6210_v4  ;;  %3677 = vmatpush.bf16.msra.mxu1 %v6499_v14  ;;  %v6146_v47 = vld [vmem:[%s9975_s18 + $0xd0] sm:$0xf]  ;;  %v6404_v14 = vld [vmem:[%s9975_s18 + $0x2f0] sm:$0xf0] }
 0x6c2   : > { %v2674_v45 = vmul.f32 0.5, %v2673_v28  ;;  %3695 = vmatpush.bf16.msra.mxu2 %v6279_v60  ;;  %v6436_v60 = vld [vmem:[%s9975_s18 + $0x330] sm:$0xf0]  ;;  %3716 = vmatpush.bf16.msra.mxu3 %v6471_v27 }
 0x6c3   : > { %v2698_v11 = vmul.f32 %v8958_v35, %v2685_v51  ;;  %3658 = vmatpush.bf16.msra.mxu0 %v6243_v59  ;;  %v2699_v8 = vmul.f32 %v8960_v62, %v2686_v2  ;;  %v6439_v7 = vor.u32 %v7294_v61, %v6436_v60  ;;  %v6148_v59 = vld [vmem:[%s9975_s18 + $0xf0] sm:$0xf0] }
 0x6c4   : > { %v2675_v5 = vsub.f32 1.5, %v2674_v45  ;;  %v6151_v55 = vor.u32 %v7222_v6, %v6148_v59  ;;  %v7286_v2 = vld [vmem:[%s9975_s18 + $0x2d4] sm:$0xf]  ;;  %v7319_v6 = vld [vmem:[%s9975_s18 + $0x3dc] sm:$0xf] }
 0x6c5   : > { %3678 = vmatpush.bf16.msra.mxu1 %v6467_v43  ;;  %v2711_v30 = vadd.f32 %v8964_v63, %v2698_v11  ;;  %v2712_v25 = vadd.f32 %v8966_v36, %v2699_v8  ;;  %v6407_v9 = vor.u32 %v7286_v2, %v6404_v14  ;;  %v7214_v34 = vld [vmem:[%s9975_s18 + $0x94] sm:$0xf]  ;;  %v7274_v43 = vld [vmem:[%s9975_s18 + $0x26c] sm:$0xf0]  ;;  %v6540_v59 = vld [vmem:[%s9975_s18 + $0x3f8] sm:$0xf0] }
 0x6c6   : > { %v2676_v22 = vmul.f32 %v7626_v48, %v2675_v5  ;;  %3696 = vmatpush.bf16.msra.mxu2 %v6247_v23  ;;  %v6402_v5 = vld [vmem:[%s9975_s18 + $0x2d0] sm:$0xf]  ;;  %3717 = vmatpush.bf16.msra.mxu3 %v6439_v7  ;;  %v7278_v11 = vld [vmem:[%s9975_s18 + $0x294] sm:$0xf]  ;;  %v7251_v2 = vld [vmem:[%s9975_s18 + $0x1b4] sm:$0xf0] }
 0x6c7   : > { %3659 = vmatpush.bf16.msra.mxu0 %v6211_v17  ;;  %v7282_v23 = vld [vmem:[%s9975_s18 + $0x2ac] sm:$0xf0]  ;;  %v6119_v17 = vor.u32 %v7214_v34, %v6116_v37  ;;  %v6375_v44 = vor.u32 %v7278_v11, %v6372_v38  ;;  %v7270_v8 = vld [vmem:[%s9975_s18 + $0x254] sm:$0xf]  ;;  %v6506_v14 = vld [vmem:[%s9975_s18 + $0x398] sm:$0xf] }
 0x6c8   : > { %v2680_v39 = vsel %vm9075_vm13, %v7626_v48, %v2676_v22  ;;  %v7234_v48 = vld [vmem:[%s9975_s18 + $0x12c] sm:$0xf0]  ;;  %v7262_v61 = vld [vmem:[%s9975_s18 + $0x214] sm:$0xf]  ;;  %v6507_v20 = vor.u32 %v7315_v31, %v6506_v14  ;;  %v6508_v34 = vld [vmem:[%s9975_s18 + $0x3b8] sm:$0xf0] }
 0x6c9   : > { %v2687_v54 = vmul.f32 %v2680_v39, %v8873_v33  ;;  %v2688_v28 = vmul.f32 %v2680_v39, %v8876_v29  ;;  %v6179_v45 = vor.u32 %v7234_v48, %v6178_v49  ;;  %v6435_v33 = vor.u32 %v7298_v15, %v6434_v56  ;;  %v6370_v22 = vld [vmem:[%s9975_s18 + $0x290] sm:$0xf]  ;;  %v6084_v49 = vld [vmem:[%s9975_s18 + $0x70] sm:$0xf0]  ;;  %v6218_v11 = vld [vmem:[%s9975_s18 + $0x158] sm:$0xf] }
 0x6ca   : > { %3697 = vmatpush.bf16.msra.mxu2 %v6215_v42  ;;  %v6183_v29 = vor.u32 %v7230_v13, %v6180_v0  ;;  %v6371_v4 = vor.u32 %v7282_v23, %v6370_v22  ;;  %v6338_v39 = vld [vmem:[%s9975_s18 + $0x250] sm:$0xf]  ;;  %v7206_v42 = vld [vmem:[%s9975_s18 + $0x54] sm:$0xf]  ;;  %3718 = vmatpush.bf16.msra.mxu3 %v6407_v9  ;;  %v7247_v22 = vld [vmem:[%s9975_s18 + $0x19c] sm:$0xf] }
 0x6cb   : > { %v2700_v58 = vmul.f32 %v8958_v35, %v2687_v54  ;;  %v2701_v3 = vmul.f32 %v8960_v62, %v2688_v28  ;;  %3660 = vmatpush.bf16.msra.mxu0 %v6179_v45  ;;  %3679 = vmatpush.bf16.msra.mxu1 %v6435_v33  ;;  %v6340_v54 = vld [vmem:[%s9975_s18 + $0x270] sm:$0xf0]  ;;  %v6339_v28 = vor.u32 %v7274_v43, %v6338_v39  ;;  %v6050_v48 = vld [vmem:[%s9975_s18 + $0x10] sm:$0xf]  ;;  %v6252_v23 = vld [vmem:[%s9975_s18 + $0x1b8] sm:$0xf0] }
 0x6cc   : > { %v6087_v27 = vor.u32 %v7206_v42, %v6084_v49  ;;  %v7202_v56 = vld [vmem:[%s9975_s18 + $0x2c] sm:$0xf0]  ;;  %v7198_v0 = vld [vmem:[%s9975_s18 + $0x14] sm:$0xf]  ;;  %v6474_v38 = vld [vmem:[%s9975_s18 + $0x358] sm:$0xf] }
 0x6cd   : > { %v2713_v35 = vadd.f32 %v8964_v63, %v2700_v58  ;;  %v2714_v62 = vadd.f32 %v8966_v36, %v2701_v3  ;;  %v6147_v63 = vor.u32 %v7226_v32, %v6146_v47  ;;  %v7290_v36 = vld [vmem:[%s9975_s18 + $0x2ec] sm:$0xf0]  ;;  %v6052_v58 = vld [vmem:[%s9975_s18 + $0x30] sm:$0xf0]  ;;  %v6343_v3 = vor.u32 %v7270_v8, %v6340_v54  ;;  %v7323_v47 = vld [vmem:[%s9975_s18 + $0x3f4] sm:$0xf0] }
 0x6ce   : > { %3698 = vmatpush.bf16.msra.mxu2 %v6183_v29  ;;  %v6403_v26 = vor.u32 %v7290_v36, %v6402_v5  ;;  %v6306_v15 = vld [vmem:[%s9975_s18 + $0x210] sm:$0xf]  ;;  %3719 = vmatpush.bf16.msra.mxu3 %v6375_v44  ;;  %v6051_v45 = vor.u32 %v7202_v56, %v6050_v48  ;;  %v6055_v29 = vor.u32 %v7198_v0, %v6052_v58  ;;  %v6308_v60 = vld [vmem:[%s9975_s18 + $0x230] sm:$0xf0]  ;;  %v7255_v32 = vld [vmem:[%s9975_s18 + $0x1dc] sm:$0xf] }
 0x6cf   : > { %v9113_v51 = vpack.c.bf16 %v2713_v35, %v2711_v30  ;;  %v9115_v46 = vpack.c.bf16 %v2714_v62, %v2712_v25  ;;  %3661 = vmatpush.bf16.msra.mxu0 %v6147_v63  ;;  %v7266_v13 = vld [vmem:[%s9975_s18 + $0x22c] sm:$0xf0]  ;;  %v6311_v30 = vor.u32 %v7262_v61, %v6308_v60  ;;  %v6282_v25 = vld [vmem:[%s9975_s18 + $0x1d8] sm:$0xf]  ;;  %v6284_v5 = vld [vmem:[%s9975_s18 + $0x1f8] sm:$0xf0]  ;;  %v6475_v42 = vor.u32 %v7307_v50, %v6474_v38 }
 0x6d0   : > { %3680 = vmatpush.bf16.msra.mxu1 %v6403_v26  ;;  %v6307_v33 = vor.u32 %v7266_v13, %v6306_v15  ;;  %v7259_v35 = vld [vmem:[%s9975_s18 + $0x1f4] sm:$0xf0]  ;;  %v6287_v36 = vor.u32 %v7255_v32, %v6284_v5  ;;  %v7239_v39 = vld [vmem:[%s9975_s18 + $0x15c] sm:$0xf] }
 0x6d1   : > { %3518 = vmatmul.bf16.gmra.mxu0 %v9113_v51  ;;  %3537 = vmatmul.bf16.gmra.mxu1 %v9115_v46  ;;  %v6538_v62 = vld [vmem:[%s9975_s18 + $0x3d8] sm:$0xf]  ;;  %v6283_v7 = vor.u32 %v7259_v35, %v6282_v25  ;;  %v6220_v43 = vld [vmem:[%s9975_s18 + $0x178] sm:$0xf0] }
 0x6d2   : > { %3556 = vmatmul.bf16.gmra.mxu2 %v9113_v51  ;;  %3575 = vmatmul.bf16.gmra.mxu3 %v9115_v46  ;;  %v6539_v63 = vor.u32 %v7323_v47, %v6538_v62  ;;  %v6250_v26 = vld [vmem:[%s9975_s18 + $0x198] sm:$0xf]  ;;  %v6223_v44 = vor.u32 %v7239_v39, %v6220_v43  ;;  %v6476_v49 = vld [vmem:[%s9975_s18 + $0x378] sm:$0xf0] }
 0x6d3   : > { %3699 = vmatpush.bf16.msra.mxu2 %v6151_v55  ;;  %3662 = vmatpush.bf16.msra.mxu0 %v6115_v41  ;;  %v6543_v55 = vor.u32 %v7319_v6, %v6540_v59  ;;  %v6251_v9 = vor.u32 %v7251_v2, %v6250_v26  ;;  %v7311_v41 = vld [vmem:[%s9975_s18 + $0x39c] sm:$0xf]  ;;  %v6186_v54 = vld [vmem:[%s9975_s18 + $0x118] sm:$0xf] }
 0x6d4   : > { %3681 = vmatpush.bf16.msra.mxu1 %v6371_v4  ;;  %3720 = vmatpush.bf16.msra.mxu3 %v6343_v3  ;;  %v6255_v4 = vor.u32 %v7247_v22, %v6252_v23  ;;  %v6511_v37 = vor.u32 %v7311_v41, %v6508_v34  ;;  %v7299_v56 = vld [vmem:[%s9975_s18 + $0x334] sm:$0xf0]  ;;  %v7231_v15 = vld [vmem:[%s9975_s18 + $0x11c] sm:$0xf] }
 0x6d5   : > { %v6188_v13 = vld [vmem:[%s9975_s18 + $0x138] sm:$0xf0]  ;;  %v7227_v61 = vld [vmem:[%s9975_s18 + $0xf4] sm:$0xf0] }
 0x6d6   : > { %v6191_v58 = vor.u32 %v7231_v15, %v6188_v13  ;;  %v7295_v3 = vld [vmem:[%s9975_s18 + $0x31c] sm:$0xf]  ;;  %v6410_v60 = vld [vmem:[%s9975_s18 + $0x2d8] sm:$0xf] }
 0x6d7   : > { %3700 = vmatpush.bf16.msra.mxu2 %v6119_v17  ;;  %3663 = vmatpush.bf16.msra.mxu0 %v6083_v10  ;;  %v7243_v17 = vld [vmem:[%s9975_s18 + $0x174] sm:$0xf0]  ;;  %v7303_v10 = vld [vmem:[%s9975_s18 + $0x35c] sm:$0xf] }
 0x6d8   : > { %3682 = vmatpush.bf16.msra.mxu1 %v6339_v28  ;;  %3721 = vmatpush.bf16.msra.mxu3 %v6311_v30  ;;  %v6219_v16 = vor.u32 %v7243_v17, %v6218_v11  ;;  %v6479_v8 = vor.u32 %v7303_v10, %v6476_v49  ;;  %v7235_v28 = vld [vmem:[%s9975_s18 + $0x134] sm:$0xf0]  ;;  %v7223_v35 = vld [vmem:[%s9975_s18 + $0xdc] sm:$0xf] }
 0x6d9   : > { %v6187_v48 = vor.u32 %v7235_v28, %v6186_v54  ;;  %v7291_v25 = vld [vmem:[%s9975_s18 + $0x2f4] sm:$0xf0]  ;;  %v6156_v62 = vld [vmem:[%s9975_s18 + $0xf8] sm:$0xf0] }
 0x6da   : > { %v6159_v47 = vor.u32 %v7223_v35, %v6156_v62  ;;  %v7287_v32 = vld [vmem:[%s9975_s18 + $0x2dc] sm:$0xf]  ;;  %v7219_v6 = vld [vmem:[%s9975_s18 + $0xb4] sm:$0xf0]  ;;  %v7353_v62 = vld [vmem:[%s8116_s30 + $0xe4] sm:$0xf0] }
 0x6db   : > { %3701 = vmatpush.bf16.msra.mxu2 %v6087_v27  ;;  %3664 = vmatpush.bf16.msra.mxu0 %v6051_v45  ;;  %v6442_v27 = vld [vmem:[%s9975_s18 + $0x318] sm:$0xf]  ;;  %v6444_v45 = vld [vmem:[%s9975_s18 + $0x338] sm:$0xf0] }
 0x6dc   : > { %3683 = vmatpush.bf16.msra.mxu1 %v6307_v33  ;;  %v6443_v0 = vor.u32 %v7299_v56, %v6442_v27  ;;  %v6447_v33 = vor.u32 %v7295_v3, %v6444_v45  ;;  %v6412_v5 = vld [vmem:[%s9975_s18 + $0x2f8] sm:$0xf0]  ;;  %v6378_v59 = vld [vmem:[%s9975_s18 + $0x298] sm:$0xf]  ;;  %v6666_v45 = vld [vmem:[%s8116_s30 + $0xf0] sm:$0xf] }
 0x6dd   : > { %v7215_v2 = vld [vmem:[%s9975_s18 + $0x9c] sm:$0xf]  ;;  %v6090_v41 = vld [vmem:[%s9975_s18 + $0x58] sm:$0xf] }
 0x6de   : > { %v6124_v14 = vld [vmem:[%s9975_s18 + $0xb8] sm:$0xf0]  ;;  %v6346_v34 = vld [vmem:[%s9975_s18 + $0x258] sm:$0xf] }
 0x6df   : > { %3702 = vmatpush.bf16.msra.mxu2 %v6055_v29  ;;  %v6154_v29 = vld [vmem:[%s9975_s18 + $0xd8] sm:$0xf]  ;;  %v6380_v22 = vld [vmem:[%s9975_s18 + $0x2b8] sm:$0xf0] }
 0x6e0   : > { %v6155_v30 = vor.u32 %v7227_v61, %v6154_v29  ;;  %v7275_v11 = vld [vmem:[%s9975_s18 + $0x274] sm:$0xf0]  ;;  %v7207_v17 = vld [vmem:[%s9975_s18 + $0x5c] sm:$0xf] }
 0x6e1   : > { %3589 = vmatmul.bf16.vlgmr.msrb.gmra.mxu0 %v8978_v52  ;;  %3608 = vmatmul.bf16.vlgmr.msrb.gmra.mxu1 %v8980_v12  ;;  %v6092_v38 = vld [vmem:[%s9975_s18 + $0x78] sm:$0xf0]  ;;  %v7203_v10 = vld [vmem:[%s9975_s18 + $0x34] sm:$0xf0] }
 0x6e2   : > { %3627 = vmatmul.bf16.vlgmr.msrb.gmra.mxu2 %v8978_v52  ;;  %3646 = vmatmul.bf16.vlgmr.msrb.gmra.mxu3 %v8980_v12  ;;  %v6095_v50 = vor.u32 %v7207_v17, %v6092_v38  ;;  %v7271_v39 = vld [vmem:[%s9975_s18 + $0x25c] sm:$0xf]  ;;  %v6314_v49 = vld [vmem:[%s9975_s18 + $0x218] sm:$0xf]  ;;  %v6634_v38 = vld [vmem:[%s8116_s30 + $0xb0] sm:$0xf] }
 0x6e3   : > { %3733 = vmatpush.bf16.msrb.mxu0 %v6283_v7  ;;  %3752 = vmatpush.bf16.msrb.mxu1 %v6539_v63  ;;  %v6411_v7 = vor.u32 %v7291_v25, %v6410_v60  ;;  %v6415_v63 = vor.u32 %v7287_v32, %v6412_v5  ;;  %v6348_v43 = vld [vmem:[%s9975_s18 + $0x278] sm:$0xf0]  ;;  %v7267_v54 = vld [vmem:[%s9975_s18 + $0x234] sm:$0xf0]  ;;  %v6594_v60 = vld [vmem:[%s8116_s30 + $0x60] sm:$0xf] }
 0x6e4   : > { %3771 = vmatpush.bf16.msrb.mxu2 %v6287_v36  ;;  %3790 = vmatpush.bf16.msrb.mxu3 %v6543_v55  ;;  %v6122_v36 = vld [vmem:[%s9975_s18 + $0x98] sm:$0xf]  ;;  %v7199_v28 = vld [vmem:[%s9975_s18 + $0x1c] sm:$0xf]  ;;  %v6658_v25 = vld [vmem:[%s8116_s30 + $0xe0] sm:$0xf] }
 0x6e5   : > { %v6123_v26 = vor.u32 %v7219_v6, %v6122_v36  ;;  %v7283_v55 = vld [vmem:[%s9975_s18 + $0x2b4] sm:$0xf0]  ;;  %v6060_v27 = vld [vmem:[%s9975_s18 + $0x38] sm:$0xf0]  ;;  %v6586_v32 = vld [vmem:[%s8116_s30 + $0x50] sm:$0xf] }
 0x6e6   : > { %v6379_v31 = vor.u32 %v7283_v55, %v6378_v59  ;;  %v6063_v56 = vor.u32 %v7199_v28, %v6060_v27  ;;  %v7263_v15 = vld [vmem:[%s9975_s18 + $0x21c] sm:$0xf]  ;;  %v7339_v3 = vld [vmem:[%s8116_s30 + $0x74] sm:$0xf0]  ;;  %v6562_v28 = vld [vmem:[%s8116_s30 + $0x20] sm:$0xf] }
 0x6e7   : > { %3734 = vmatpush.bf16.msrb.mxu0 %v6251_v9  ;;  %3753 = vmatpush.bf16.msrb.mxu1 %v6507_v20  ;;  %v6127_v9 = vor.u32 %v7215_v2, %v6124_v14  ;;  %v7279_v20 = vld [vmem:[%s9975_s18 + $0x29c] sm:$0xf]  ;;  %v7355_v29 = vld [vmem:[%s8116_s30 + $0xf4] sm:$0xf0]  ;;  %v6578_v14 = vld [vmem:[%s8116_s30 + $0x40] sm:$0xf] }
 0x6e8   : > { %3772 = vmatpush.bf16.msrb.mxu2 %v6255_v4  ;;  %3791 = vmatpush.bf16.msrb.mxu3 %v6511_v37  ;;  %v6383_v23 = vor.u32 %v7279_v20, %v6380_v22  ;;  %v7211_v4 = vld [vmem:[%s9975_s18 + $0x74] sm:$0xf0]  ;;  %v6316_v13 = vld [vmem:[%s9975_s18 + $0x238] sm:$0xf0]  ;;  %v6667_v61 = vor.u32 %v7355_v29, %v6666_v45  ;;  %v7329_v27 = vld [vmem:[%s8116_s30 + $0x24] sm:$0xf0] }
 0x6e9   : > { %v6091_v37 = vor.u32 %v7211_v4, %v6090_v41  ;;  %v7335_v5 = vld [vmem:[%s8116_s30 + $0x54] sm:$0xf0]  ;;  %v6618_v45 = vld [vmem:[%s8116_s30 + $0x90] sm:$0xf] }
 0x6ea   : > { %v6587_v59 = vor.u32 %v7335_v5, %v6586_v32  ;;  %v7331_v17 = vld [vmem:[%s8116_s30 + $0x34] sm:$0xf0]  ;;  %v6610_v5 = vld [vmem:[%s8116_s30 + $0x80] sm:$0xf] }
 0x6eb   : > { %3735 = vmatpush.bf16.msrb.mxu0 %v6219_v16  ;;  %3754 = vmatpush.bf16.msrb.mxu1 %v6475_v42  ;;  %v6347_v16 = vor.u32 %v7275_v11, %v6346_v34  ;;  %v6351_v42 = vor.u32 %v7271_v39, %v6348_v43  ;;  %v6570_v11 = vld [vmem:[%s8116_s30 + $0x30] sm:$0xf]  ;;  %v7347_v43 = vld [vmem:[%s8116_s30 + $0xb4] sm:$0xf0] }
 0x6ec   : > { %3773 = vmatpush.bf16.msrb.mxu2 %v6223_v44  ;;  %3792 = vmatpush.bf16.msrb.mxu3 %v6479_v8  ;;  %v6058_v44 = vld [vmem:[%s9975_s18 + $0x18] sm:$0xf]  ;;  %v6571_v39 = vor.u32 %v7331_v17, %v6570_v11 }
 0x6ed   : > { %v6059_v8 = vor.u32 %v7203_v10, %v6058_v44  ;;  %v6635_v44 = vor.u32 %v7347_v43, %v6634_v38 }
 0x6ef   : > { %3736 = vmatpush.bf16.msrb.mxu0 %v6187_v48  ;;  %3755 = vmatpush.bf16.msrb.mxu1 %v6443_v0  ;;  %v6315_v48 = vor.u32 %v7267_v54, %v6314_v49  ;;  %v6319_v0 = vor.u32 %v7263_v15, %v6316_v13  ;;  %v7345_v15 = vld [vmem:[%s8116_s30 + $0xa4] sm:$0xf0]  ;;  %v6554_v13 = vld [vmem:[%s8116_s30 + $0x10] sm:$0xf] }
 0x6f0   : > { %3774 = vmatpush.bf16.msrb.mxu2 %v6191_v58  ;;  %3793 = vmatpush.bf16.msrb.mxu3 %v6447_v33  ;;  %v6602_v58 = vld [vmem:[%s8116_s30 + $0x70] sm:$0xf] }
 0x6f1   : > { %3594 = vmatmul.bf16.gmra.mxu0 %v9113_v51  ;;  %3613 = vmatmul.bf16.gmra.mxu1 %v9115_v46  ;;  %v6603_v33 = vor.u32 %v7339_v3, %v6602_v58 }
 0x6f2   : > { %3632 = vmatmul.bf16.gmra.mxu2 %v9113_v51  ;;  %3651 = vmatmul.bf16.gmra.mxu3 %v9115_v46 }
 0x6f3   : > { %3737 = vmatpush.bf16.msrb.mxu0 %v6155_v30  ;;  %3756 = vmatpush.bf16.msrb.mxu1 %v6411_v7  ;;  %v7337_v30 = vld [vmem:[%s8116_s30 + $0x64] sm:$0xf0]  ;;  %v6659_v7 = vor.u32 %v7353_v62, %v6658_v25 }
 0x6f4   : > { %3775 = vmatpush.bf16.msrb.mxu2 %v6159_v47  ;;  %3794 = vmatpush.bf16.msrb.mxu3 %v6415_v63  ;;  %v6595_v35 = vor.u32 %v7337_v30, %v6594_v60  ;;  %v9238_v47 = vld [vmem:[%s8105_s9] sm:$0xff]  ;;  %v6650_v63 = vld [vmem:[%s8116_s30 + $0xd0] sm:$0xf]  ;;  %v7325_v62 = vld [vmem:[%s8116_s30 + $0x4] sm:$0xf0] }
 0x6f5   : > { %v9245_v2 = vperm.slane %v9238_v47, 0  ;;  %v9251_v20 = vperm.slane %v9238_v47, 1 }
 0x6f7   : > { %3738 = vmatpush.bf16.msrb.mxu0 %v6123_v26  ;;  %3757 = vmatpush.bf16.msrb.mxu1 %v6379_v31  ;;  %v7351_v26 = vld [vmem:[%s8116_s30 + $0xd4] sm:$0xf0]  ;;  %v7333_v31 = vld [vmem:[%s8116_s30 + $0x44] sm:$0xf0] }
 0x6f8   : > { %3776 = vmatpush.bf16.msrb.mxu2 %v6127_v9  ;;  %3795 = vmatpush.bf16.msrb.mxu3 %v6383_v23  ;;  %v6651_v55 = vor.u32 %v7351_v26, %v6650_v63  ;;  %v6642_v9 = vld [vmem:[%s8116_s30 + $0xc0] sm:$0xf]  ;;  %v6579_v22 = vor.u32 %v7333_v31, %v6578_v14  ;;  %v7349_v23 = vld [vmem:[%s8116_s30 + $0xc4] sm:$0xf0] }
 0x6f9   : > { %v6643_v41 = vor.u32 %v7349_v23, %v6642_v9  ;;  %v7341_v63 = vld [vmem:[%s8116_s30 + $0x84] sm:$0xf0] }
 0x6fa   : > { %v6611_v14 = vor.u32 %v7341_v63, %v6610_v5  ;;  %v7385_v5 = vld [vmem:[%s8116_s30 + $0x1e4] sm:$0xf0] }
 0x6fb   : > { %3739 = vmatpush.bf16.msrb.mxu0 %v6091_v37  ;;  %3758 = vmatpush.bf16.msrb.mxu1 %v6347_v16 }
 0x6fc   : > { %3777 = vmatpush.bf16.msrb.mxu2 %v6095_v50  ;;  %3796 = vmatpush.bf16.msrb.mxu3 %v6351_v42 }
 0x6ff   : > { %3740 = vmatpush.bf16.msrb.mxu0 %v6059_v8  ;;  %3759 = vmatpush.bf16.msrb.mxu1 %v6315_v48  ;;  %v6626_v48 = vld [vmem:[%s8116_s30 + $0xa0] sm:$0xf] }
 0x700   : > { %3778 = vmatpush.bf16.msrb.mxu2 %v6063_v56  ;;  %3797 = vmatpush.bf16.msrb.mxu3 %v6319_v0  ;;  %v6563_v56 = vor.u32 %v7329_v27, %v6562_v28  ;;  %v7327_v0 = vld [vmem:[%s8116_s30 + $0x14] sm:$0xf0]  ;;  %v6627_v3 = vor.u32 %v7345_v15, %v6626_v48 }
 0x701   : > { %3665 = vmatmul.bf16.vlgmr.msra.gmra.mxu0 %v8978_v52  ;;  %3684 = vmatmul.bf16.vlgmr.msra.gmra.mxu1 %v8980_v12 }
 0x702   : > { %3703 = vmatmul.bf16.vlgmr.msra.gmra.mxu2 %v8978_v52  ;;  %3722 = vmatmul.bf16.vlgmr.msra.gmra.mxu3 %v8980_v12 }
 0x703   : > { %4887 = vmatpush.bf16.msra.mxu0 %v6603_v33  ;;  %4906 = vmatpush.bf16.msra.mxu1 %v6667_v61  ;;  %v7343_v33 = vld [vmem:[%s8116_s30 + $0x94] sm:$0xf0]  ;;  %v6555_v61 = vor.u32 %v7327_v0, %v6554_v13 }
 0x704   : > { %v6619_v25 = vor.u32 %v7343_v33, %v6618_v45  ;;  %v6730_v33 = vld [vmem:[%s8116_s30 + $0x170] sm:$0xf] }
 0x707   : > { %4888 = vmatpush.bf16.msra.mxu0 %v6595_v35  ;;  %4907 = vmatpush.bf16.msra.mxu1 %v6659_v7  ;;  %v6546_v35 = vld [vmem:[%s8116_s30] sm:$0xf] }
 0x708   : > { %v6547_v26 = vor.u32 %v7325_v62, %v6546_v35  ;;  %v6714_v35 = vld [vmem:[%s8116_s30 + $0x150] sm:$0xf]  ;;  %v7367_v62 = vld [vmem:[%s8116_s30 + $0x154] sm:$0xf0] }
 0x709   : > { %v3514_v36 = vpop.f32.mrf.mxu0  ;;  %v3533_v6 = vpop.f32.mrf.mxu1 }
 0x70a   : > { %v3515_v4 = vadd.f32 %v3514_v36, %v9245_v2 }
 0x70b   : > { %4889 = vmatpush.bf16.msra.mxu0 %v6587_v59  ;;  %4908 = vmatpush.bf16.msra.mxu1 %v6651_v55 }
 0x70c   : > { %v9265_v10 = vadd.f32 %v3533_v6, %v3515_v4 }
 0x70e   : > { %v3809_v29 = vmul.f32 %v9265_v10, %v9265_v10 }
 0x70f   : > { %4890 = vmatpush.bf16.msra.mxu0 %v6579_v22  ;;  %4909 = vmatpush.bf16.msra.mxu1 %v6643_v41 }
 0x710   : > { %v3552_v34 = vpop.f32.mrf.mxu2  ;;  %v3571_v37 = vpop.f32.mrf.mxu3  ;;  %v3841_v6 = vmul.f32 %v3809_v29, %v9265_v10 }
 0x711   : > { %v3553_v16 = vadd.f32 %v3552_v34, %v9251_v20  ;;  %v3516_v50 = vpop.f32.mrf.mxu0  ;;  %3670 = vmatmul.bf16.gmra.mxu0 %v9113_v51  ;;  %3689 = vmatmul.bf16.gmra.mxu1 %v9115_v46  ;;  %v3535_v49 = vpop.f32.mrf.mxu1 }
 0x712   : > { %v3517_v42 = vadd.f32 %v3516_v50, %v9245_v2  ;;  %3708 = vmatmul.bf16.gmra.mxu2 %v9113_v51  ;;  %3727 = vmatmul.bf16.gmra.mxu3 %v9115_v46  ;;  %v3873_v22 = vmul.f32 0.044715, %v3841_v6 }
 0x713   : > { %4891 = vmatpush.bf16.msra.mxu0 %v6571_v39  ;;  %v9267_v8 = vadd.f32 %v3571_v37, %v3553_v16  ;;  %4910 = vmatpush.bf16.msra.mxu1 %v6635_v44 }
 0x714   : > { %v9269_v54 = vadd.f32 %v3535_v49, %v3517_v42  ;;  %v3905_v37 = vadd.f32 %v3873_v22, %v9265_v10  ;;  %v7383_v22 = vld [vmem:[%s8116_s30 + $0x1d4] sm:$0xf0] }
 0x715   : > { %v3810_v60 = vmul.f32 %v9267_v8, %v9267_v8 }
 0x716   : > { %v3817_v58 = vmul.f32 %v9269_v54, %v9269_v54  ;;  %v3937_v50 = vmul.f32 0.7978846, %v3905_v37 }
 0x717   : > { %4892 = vmatpush.bf16.msra.mxu0 %v6563_v56  ;;  %4911 = vmatpush.bf16.msra.mxu1 %v6627_v3  ;;  %v3842_v55 = vmul.f32 %v3810_v60, %v9267_v8 }
 0x718   : > { %v3554_v30 = vpop.f32.mrf.mxu2  ;;  %v3849_v7 = vmul.f32 %v3817_v58, %v9269_v54  ;;  %v3573_v36 = vpop.f32.mrf.mxu3 }
 0x719   : > { %v3555_v32 = vadd.f32 %v3554_v30, %v9251_v20  ;;  %v3874_v41 = vmul.f32 0.044715, %v3842_v55  ;;  %v7387_v30 = vld [vmem:[%s8116_s30 + $0x1f4] sm:$0xf0]  ;;  %v7365_v55 = vld [vmem:[%s8116_s30 + $0x144] sm:$0xf0] }
 0x71a   : > { %v3881_v31 = vmul.f32 0.044715, %v3849_v7  ;;  %v6715_v7 = vor.u32 %v7367_v62, %v6714_v35  ;;  %v7377_v35 = vld [vmem:[%s8116_s30 + $0x1a4] sm:$0xf0] }
 0x71b   : > { %v3574_v59 = vadd.f32 %v3573_v36, %v3555_v32  ;;  %4893 = vmatpush.bf16.msra.mxu0 %v6555_v61  ;;  %4912 = vmatpush.bf16.msra.mxu1 %v6619_v25  ;;  %v3906_v17 = vadd.f32 %v3874_v41, %v9267_v8  ;;  %v6722_v61 = vld [vmem:[%s8116_s30 + $0x160] sm:$0xf] }
 0x71c   : > { %v3913_v4 = vadd.f32 %v3881_v31, %v9269_v54  ;;  %v6786_v32 = vld [vmem:[%s8116_s30 + $0x1e0] sm:$0xf] }
 0x71d   : > { %v3818_v9 = vmul.f32 %v3574_v59, %v3574_v59  ;;  %v3938_v39 = vmul.f32 0.7978846, %v3906_v17  ;;  %v6787_v6 = vor.u32 %v7385_v5, %v6786_v32 }
 0x71e   : > { %v3945_v38 = vmul.f32 0.7978846, %v3913_v4  ;;  %v6698_v4 = vld [vmem:[%s8116_s30 + $0x130] sm:$0xf] }
 0x71f   : > { %v3850_v23 = vmul.f32 %v3818_v9, %v3574_v59  ;;  %4894 = vmatpush.bf16.msra.mxu0 %v6547_v26  ;;  %4913 = vmatpush.bf16.msra.mxu1 %v6611_v14  ;;  %v6706_v26 = vld [vmem:[%s8116_s30 + $0x140] sm:$0xf]  ;;  %v6778_v9 = vld [vmem:[%s8116_s30 + $0x1d0] sm:$0xf] }
 0x720   : > { %7627 = vtanh.f32 %v3945_v38  ;;  %v6707_v14 = vor.u32 %v7365_v55, %v6706_v26  ;;  %v7357_v26 = vld [vmem:[%s8116_s30 + $0x104] sm:$0xf0] }
 0x721   : > { %v3882_v34 = vmul.f32 0.044715, %v3850_v23  ;;  %3741 = vmatmul.bf16.vlgmr.msrb.gmra.mxu0 %v8978_v52  ;;  %3760 = vmatmul.bf16.vlgmr.msrb.gmra.mxu1 %v8980_v12  ;;  %v6779_v23 = vor.u32 %v7383_v22, %v6778_v9 }
 0x722   : > { %3779 = vmatmul.bf16.vlgmr.msrb.gmra.mxu2 %v8978_v52  ;;  %3798 = vmatmul.bf16.vlgmr.msrb.gmra.mxu3 %v8980_v12 }
 0x723   : > { %v3914_v11 = vadd.f32 %v3882_v34, %v3574_v59  ;;  %v7363_v34 = vld [vmem:[%s8116_s30 + $0x134] sm:$0xf0] }
 0x724   : > { %v6699_v37 = vor.u32 %v7363_v34, %v6698_v4 }
 0x725   : > { %v3946_v16 = vmul.f32 0.7978846, %v3914_v11 }
 0x726   : > { %v7628_v43 = vpop.eup %7627 }
 0x727   : > { %7629 = vtanh.f32 %v3946_v16  ;;  %v4009_v12 = vadd.f32 1.0, %v7628_v43  ;;  %v6770_v16 = vld [vmem:[%s8116_s30 + $0x1c0] sm:$0xf] }
 0x728   : > { %7631 = vtanh.f32 %v3937_v50  ;;  %v7381_v50 = vld [vmem:[%s8116_s30 + $0x1c4] sm:$0xf0] }
 0x729   : > { %7633 = vtanh.f32 %v3938_v39  ;;  %v4041_v48 = vmul.f32 0.5, %v4009_v12 }
 0x72b   : > { %v4073_v0 = vmul.f32 %v4041_v48, %v9269_v54  ;;  %v7371_v54 = vld [vmem:[%s8116_s30 + $0x174] sm:$0xf0] }
 0x72c   : > { %v6731_v29 = vor.u32 %v7371_v54, %v6730_v33  ;;  %v6682_v54 = vld [vmem:[%s8116_s30 + $0x110] sm:$0xf] }
 0x72d   : > { %v7630_v42 = vpop.eup %7629 }
 0x72e   : > { %v7632_v44 = vpop.eup %7631  ;;  %v4010_v49 = vadd.f32 1.0, %v7630_v42  ;;  %4925 = vmatpush.bf16.msra.mxu2 %v6731_v29  ;;  %v7359_v29 = vld [vmem:[%s8116_s30 + $0x114] sm:$0xf0] }
 0x72f   : > { %v7634_v52 = vpop.eup %7633  ;;  %v4001_v28 = vadd.f32 1.0, %v7632_v44  ;;  %v6771_v44 = vor.u32 %v7381_v50, %v6770_v16  ;;  %v6858_v50 = vld [vmem:[%s8116_s30 + $0x270] sm:$0xf] }
 0x730   : > { %v4002_v27 = vadd.f32 1.0, %v7634_v52  ;;  %v4042_v56 = vmul.f32 0.5, %v4010_v49  ;;  %v6690_v49 = vld [vmem:[%s8116_s30 + $0x120] sm:$0xf] }
 0x731   : > { %3746 = vmatmul.bf16.gmra.mxu0 %v9113_v51  ;;  %3765 = vmatmul.bf16.gmra.mxu1 %v9115_v46  ;;  %v4033_v15 = vmul.f32 0.5, %v4001_v28  ;;  %v7361_v28 = vld [vmem:[%s8116_s30 + $0x124] sm:$0xf0] }
 0x732   : > { %3784 = vmatmul.bf16.gmra.mxu2 %v9113_v51  ;;  %3803 = vmatmul.bf16.gmra.mxu3 %v9115_v46  ;;  %v4034_v13 = vmul.f32 0.5, %v4002_v27  ;;  %v4074_v58 = vmul.f32 %v4042_v56, %v3574_v59  ;;  %v6691_v48 = vor.u32 %v7361_v28, %v6690_v49  ;;  %v6738_v49 = vld [vmem:[%s8116_s30 + $0x180] sm:$0xf]  ;;  %v7373_v28 = vld [vmem:[%s8116_s30 + $0x184] sm:$0xf0] }
 0x733   : > { %v4065_v51 = vmul.f32 %v4033_v15, %v9265_v10  ;;  %v7369_v10 = vld [vmem:[%s8116_s30 + $0x164] sm:$0xf0] }
 0x734   : > { %v4066_v46 = vmul.f32 %v4034_v13, %v9267_v8  ;;  %v6723_v60 = vor.u32 %v7369_v10, %v6722_v61  ;;  %v6794_v8 = vld [vmem:[%s8116_s30 + $0x1f0] sm:$0xf]  ;;  %v6683_v10 = vor.u32 %v7359_v29, %v6682_v54  ;;  %v6850_v54 = vld [vmem:[%s8116_s30 + $0x260] sm:$0xf]  ;;  %v7401_v29 = vld [vmem:[%s8116_s30 + $0x264] sm:$0xf0] }
 0x735   : > { %v9307_v3 = vpack.c.bf16 %v4073_v0, %v4065_v51  ;;  %v6795_v25 = vor.u32 %v7387_v30, %v6794_v8  ;;  %v6762_v13 = vld [vmem:[%s8116_s30 + $0x1b0] sm:$0xf]  ;;  %v7379_v0 = vld [vmem:[%s8116_s30 + $0x1b4] sm:$0xf0] }
 0x736   : > { %v9309_v45 = vpack.c.bf16 %v4074_v58, %v4066_v46  ;;  %4926 = vmatpush.bf16.msra.mxu2 %v6723_v60  ;;  %v6763_v51 = vor.u32 %v7379_v0, %v6762_v13 }
 0x737   : > { %4944 = vmatpush.bf16.msra.mxu3 %v6795_v25  ;;  %v6754_v25 = vld [vmem:[%s8116_s30 + $0x1a0] sm:$0xf] }
 0x73a   : > { %4927 = vmatpush.bf16.msra.mxu2 %v6715_v7 }
 0x73b   : > { %4945 = vmatpush.bf16.msra.mxu3 %v6787_v6 }
 0x73e   : > { %4928 = vmatpush.bf16.msra.mxu2 %v6707_v14 }
 0x73f   : > { %4946 = vmatpush.bf16.msra.mxu3 %v6779_v23  ;;  %v6746_v23 = vld [vmem:[%s8116_s30 + $0x190] sm:$0xf] }
 0x741   : > { %4895 = vmatmul.bf16.vlgmr.msra.gmra.mxu0 %v9307_v3  ;;  %4914 = vmatmul.bf16.vlgmr.msra.gmra.mxu1 %v9309_v45 }
 0x742   : > { %4929 = vmatpush.bf16.msra.mxu2 %v6699_v37  ;;  %v9376_v37 = vperm.slane %v9238_v47, 3 }
 0x743   : > { %4947 = vmatpush.bf16.msra.mxu3 %v6771_v44 }
 0x746   : > { %4930 = vmatpush.bf16.msra.mxu2 %v6691_v48 }
 0x747   : > { %4948 = vmatpush.bf16.msra.mxu3 %v6763_v51  ;;  %v6739_v51 = vor.u32 %v7373_v28, %v6738_v49  ;;  %v6834_v28 = vld [vmem:[%s8116_s30 + $0x240] sm:$0xf] }
 0x74a   : > { %4931 = vmatpush.bf16.msra.mxu2 %v6683_v10 }
 0x74e   : > { %v3519_v63 = vpop.f32.mrf.mxu0  ;;  %v3538_v36 = vpop.f32.mrf.mxu1 }
 0x74f   : > { %v3520_v59 = vadd.f32 %v3519_v63, %v9245_v2  ;;  %v6755_v63 = vor.u32 %v7377_v35, %v6754_v25  ;;  %v6922_v25 = vld [vmem:[%s8116_s30 + $0x2f0] sm:$0xf]  ;;  %v7419_v35 = vld [vmem:[%s8116_s30 + $0x2f4] sm:$0xf0] }
 0x751   : > { %v9326_v31 = vadd.f32 %v3538_v36, %v3520_v59  ;;  %v6674_v59 = vld [vmem:[%s8116_s30 + $0x100] sm:$0xf]  ;;  %4949 = vmatpush.bf16.msra.mxu3 %v6755_v63 }
 0x752   : > { %v6675_v9 = vor.u32 %v7357_v26, %v6674_v59  ;;  %v6842_v26 = vld [vmem:[%s8116_s30 + $0x250] sm:$0xf] }
 0x753   : > { %v3825_v41 = vmul.f32 %v9326_v31, %v9326_v31 }
 0x754   : > { %4932 = vmatpush.bf16.msra.mxu2 %v6675_v9 }
 0x755   : > { %v3857_v11 = vmul.f32 %v3825_v41, %v9326_v31  ;;  %v3557_v17 = vpop.f32.mrf.mxu2  ;;  %v3576_v38 = vpop.f32.mrf.mxu3  ;;  %v7375_v41 = vld [vmem:[%s8116_s30 + $0x194] sm:$0xf0] }
 0x756   : > { %v3558_v39 = vadd.f32 %v3557_v17, %v9251_v20  ;;  %v3521_v43 = vpop.f32.mrf.mxu0  ;;  %v3540_v42 = vpop.f32.mrf.mxu1 }
 0x757   : > { %v3889_v52 = vmul.f32 0.044715, %v3857_v11  ;;  %v3522_v12 = vadd.f32 %v3521_v43, %v9245_v2  ;;  %v9351_v2 = vperm.slane %v9238_v47, 2  ;;  %v6747_v11 = vor.u32 %v7375_v41, %v6746_v23 }
 0x758   : > { %v9341_v27 = vadd.f32 %v3576_v38, %v3558_v39  ;;  %v7403_v39 = vld [vmem:[%s8116_s30 + $0x274] sm:$0xf0] }
 0x759   : > { %v3921_v56 = vadd.f32 %v3889_v52, %v9326_v31  ;;  %v9344_v15 = vadd.f32 %v3540_v42, %v3522_v12  ;;  %4950 = vmatpush.bf16.msra.mxu3 %v6747_v11  ;;  %v6859_v12 = vor.u32 %v7403_v39, %v6858_v50 }
 0x75a   : > { %v3826_v58 = vmul.f32 %v9341_v27, %v9341_v27 }
 0x75b   : > { %v3953_v46 = vmul.f32 0.7978846, %v3921_v56  ;;  %v3833_v33 = vmul.f32 %v9344_v15, %v9344_v15  ;;  %4963 = vmatpush.bf16.msrb.mxu0 %v6859_v12 }
 0x75c   : > { %v3858_v61 = vmul.f32 %v3826_v58, %v9341_v27 }
 0x75d   : > { %7635 = vtanh.f32 %v3953_v46  ;;  %v3865_v60 = vmul.f32 %v3833_v33, %v9344_v15  ;;  %v3559_v8 = vpop.f32.mrf.mxu2  ;;  %v3578_v30 = vpop.f32.mrf.mxu3  ;;  %4951 = vmatpush.bf16.msra.mxu3 %v6739_v51 }
 0x75e   : > { %v3890_v62 = vmul.f32 0.044715, %v3858_v61  ;;  %v3560_v7 = vadd.f32 %v3559_v8, %v9251_v20  ;;  %v3590_v32 = vpop.f32.mrf.mxu0  ;;  %v3609_v5 = vpop.f32.mrf.mxu1 }
 0x75f   : > { %v3897_v36 = vmul.f32 0.044715, %v3865_v60  ;;  %v3591_v6 = vadd.f32 %v3590_v32, %v9351_v2  ;;  %v6851_v60 = vor.u32 %v7401_v29, %v6850_v54  ;;  %v7415_v54 = vld [vmem:[%s8116_s30 + $0x2d4] sm:$0xf0] }
 0x760   : > { %v3922_v55 = vadd.f32 %v3890_v62, %v9341_v27  ;;  %v9366_v14 = vadd.f32 %v3578_v30, %v3560_v7 }
 0x761   : > { %v3929_v20 = vadd.f32 %v3897_v36, %v9344_v15  ;;  %v9369_v22 = vadd.f32 %v3609_v5, %v3591_v6  ;;  %v6923_v5 = vor.u32 %v7419_v35, %v6922_v25  ;;  %4964 = vmatpush.bf16.msrb.mxu0 %v6851_v60 }
 0x762   : > { %v3954_v4 = vmul.f32 0.7978846, %v3922_v55  ;;  %v3834_v34 = vmul.f32 %v9366_v14, %v9366_v14 }
 0x763   : > { %v7636_v17 = vpop.eup %7635  ;;  %v3961_v38 = vmul.f32 0.7978846, %v3929_v20  ;;  %v3811_v16 = vmul.f32 %v9369_v22, %v9369_v22  ;;  %4982 = vmatpush.bf16.msrb.mxu1 %v6923_v5  ;;  %v7399_v20 = vld [vmem:[%s8116_s30 + $0x254] sm:$0xf0] }
 0x764   : > { %7637 = vtanh.f32 %v3954_v4  ;;  %v3866_v43 = vmul.f32 %v3834_v34, %v9366_v14  ;;  %v4017_v58 = vadd.f32 1.0, %v7636_v17  ;;  %v6843_v11 = vor.u32 %v7399_v20, %v6842_v26  ;;  %v6914_v17 = vld [vmem:[%s8116_s30 + $0x2e0] sm:$0xf]  ;;  %v7413_v20 = vld [vmem:[%s8116_s30 + $0x2c4] sm:$0xf0] }
 0x765   : > { %v3843_v42 = vmul.f32 %v3811_v16, %v9369_v22  ;;  %v3628_v44 = vpop.f32.mrf.mxu2  ;;  %v3647_v52 = vpop.f32.mrf.mxu3  ;;  %7639 = vtanh.f32 %v3961_v38  ;;  %v7417_v38 = vld [vmem:[%s8116_s30 + $0x2e4] sm:$0xf0] }
 0x766   : > { %v3898_v48 = vmul.f32 0.044715, %v3866_v43  ;;  %v3629_v56 = vadd.f32 %v3628_v44, %v9376_v37  ;;  %v3592_v13 = vpop.f32.mrf.mxu0  ;;  %v3611_v0 = vpop.f32.mrf.mxu1  ;;  %v4049_v59 = vmul.f32 0.5, %v4017_v58  ;;  %v6915_v44 = vor.u32 %v7417_v38, %v6914_v17  ;;  %4965 = vmatpush.bf16.msrb.mxu0 %v6843_v11 }
 0x767   : > { %v3875_v46 = vmul.f32 0.044715, %v3843_v42  ;;  %v3593_v33 = vadd.f32 %v3592_v13, %v9351_v2 }
 0x768   : > { %v3930_v61 = vadd.f32 %v3898_v48, %v9366_v14  ;;  %v9391_v10 = vadd.f32 %v3647_v52, %v3629_v56  ;;  %v4081_v49 = vmul.f32 %v4049_v59, %v9326_v31  ;;  %v7397_v48 = vld [vmem:[%s8116_s30 + $0x244] sm:$0xf0]  ;;  %4983 = vmatpush.bf16.msrb.mxu1 %v6915_v44 }
 0x769   : > { %v3907_v8 = vadd.f32 %v3875_v46, %v9369_v22  ;;  %v9394_v30 = vadd.f32 %v3611_v0, %v3593_v33  ;;  %v6835_v58 = vor.u32 %v7397_v48, %v6834_v28  ;;  %v6906_v33 = vld [vmem:[%s8116_s30 + $0x2d0] sm:$0xf] }
 0x76a   : > { %v7638_v62 = vpop.eup %7637  ;;  %v3962_v7 = vmul.f32 0.7978846, %v3930_v61  ;;  %v3812_v32 = vmul.f32 %v9391_v10, %v9391_v10 }
 0x76b   : > { %v7640_v63 = vpop.eup %7639  ;;  %v3939_v36 = vmul.f32 0.7978846, %v3907_v8  ;;  %v3819_v6 = vmul.f32 %v9394_v30, %v9394_v30  ;;  %v4018_v34 = vadd.f32 1.0, %v7638_v62  ;;  %v6907_v8 = vor.u32 %v7415_v54, %v6906_v33  ;;  %4966 = vmatpush.bf16.msrb.mxu0 %v6835_v58 }
 0x76c   : > { %v3844_v55 = vmul.f32 %v3812_v32, %v9391_v10  ;;  %v4025_v9 = vadd.f32 1.0, %v7640_v63  ;;  %7641 = vtanh.f32 %v3962_v7  ;;  %v6826_v32 = vld [vmem:[%s8116_s30 + $0x230] sm:$0xf]  ;;  %v7395_v63 = vld [vmem:[%s8116_s30 + $0x234] sm:$0xf0]  ;;  %v9454_v58 = vperm.slane %v9238_v47, 4 }
 0x76d   : > { %7643 = vtanh.f32 %v3939_v36  ;;  %v3851_v23 = vmul.f32 %v3819_v6, %v9394_v30  ;;  %v3630_v41 = vpop.f32.mrf.mxu2  ;;  %v3649_v4 = vpop.f32.mrf.mxu3  ;;  %v4050_v7 = vmul.f32 0.5, %v4018_v34  ;;  %4984 = vmatpush.bf16.msrb.mxu1 %v6907_v8  ;;  %v6810_v8 = vld [vmem:[%s8116_s30 + $0x210] sm:$0xf] }
 0x76e   : > { %v3876_v16 = vmul.f32 0.044715, %v3844_v55  ;;  %v3631_v50 = vadd.f32 %v3630_v41, %v9376_v37  ;;  %v3595_v39 = vpop.f32.mrf.mxu0  ;;  %v3614_v43 = vpop.f32.mrf.mxu1  ;;  %v4057_v42 = vmul.f32 0.5, %v4025_v9  ;;  %v6827_v55 = vor.u32 %v7395_v63, %v6826_v32  ;;  %v6898_v9 = vld [vmem:[%s8116_s30 + $0x2c0] sm:$0xf] }
 0x76f   : > { %v3883_v52 = vmul.f32 0.044715, %v3851_v23  ;;  %v3596_v12 = vadd.f32 %v3595_v39, %v9351_v2  ;;  %v6899_v17 = vor.u32 %v7413_v20, %v6898_v9  ;;  %v6882_v63 = vld [vmem:[%s8116_s30 + $0x2a0] sm:$0xf] }
 0x770   : > { %v3908_v56 = vadd.f32 %v3876_v16, %v9391_v10  ;;  %v9414_v13 = vadd.f32 %v3649_v4, %v3631_v50  ;;  %v4089_v0 = vmul.f32 %v4057_v42, %v9344_v15  ;;  %v4082_v50 = vmul.f32 %v4050_v7, %v9341_v27  ;;  %4967 = vmatpush.bf16.msrb.mxu0 %v6827_v55  ;;  %v7393_v42 = vld [vmem:[%s8116_s30 + $0x224] sm:$0xf0]  ;;  %v7411_v27 = vld [vmem:[%s8116_s30 + $0x2b4] sm:$0xf0] }
 0x771   : > { %v3915_v51 = vadd.f32 %v3883_v52, %v9394_v30  ;;  %v9418_v46 = vadd.f32 %v3614_v43, %v3596_v12  ;;  %v6818_v43 = vld [vmem:[%s8116_s30 + $0x220] sm:$0xf]  ;;  %4985 = vmatpush.bf16.msrb.mxu1 %v6899_v17  ;;  %v7389_v17 = vld [vmem:[%s8116_s30 + $0x204] sm:$0xf0] }
 0x772   : > { %v7642_v29 = vpop.eup %7641  ;;  %v3940_v31 = vmul.f32 0.7978846, %v3908_v56  ;;  %v3820_v61 = vmul.f32 %v9414_v13, %v9414_v13  ;;  %v9424_v60 = vpack.c.bf16 %v4089_v0, %v4081_v49  ;;  %v6819_v12 = vor.u32 %v7393_v42, %v6818_v43  ;;  %v6874_v42 = vld [vmem:[%s8116_s30 + $0x290] sm:$0xf] }
 0x773   : > { %v7644_v25 = vpop.eup %7643  ;;  %v3947_v15 = vmul.f32 0.7978846, %v3915_v51  ;;  %v3827_v35 = vmul.f32 %v9418_v46, %v9418_v46  ;;  %v4026_v62 = vadd.f32 1.0, %v7642_v29 }
 0x774   : > { %7645 = vtanh.f32 %v3940_v31  ;;  %v3852_v5 = vmul.f32 %v3820_v61, %v9414_v13  ;;  %4900 = vmatmul.bf16.gmra.mxu0 %v9424_v60  ;;  %v4003_v23 = vadd.f32 1.0, %v7644_v25 }
 0x775   : > { %7647 = vtanh.f32 %v3947_v15  ;;  %v3859_v36 = vmul.f32 %v3827_v35, %v9418_v46  ;;  %v3633_v6 = vpop.f32.mrf.mxu2  ;;  %v3652_v59 = vpop.f32.mrf.mxu3  ;;  %v4058_v26 = vmul.f32 0.5, %v4026_v62  ;;  %4968 = vmatpush.bf16.msrb.mxu0 %v6819_v12  ;;  %v7391_v35 = vld [vmem:[%s8116_s30 + $0x214] sm:$0xf0] }
 0x776   : > { %v3884_v41 = vmul.f32 0.044715, %v3852_v5  ;;  %v3634_v4 = vadd.f32 %v3633_v6, %v9376_v37  ;;  %v3597_v34 = vpop.f32.mrf.mxu0  ;;  %v3616_v11 = vpop.f32.mrf.mxu1  ;;  %v4035_v54 = vmul.f32 0.5, %v4003_v23  ;;  %v6811_v5 = vor.u32 %v7391_v35, %v6810_v8 }
 0x777   : > { %v3891_v38 = vmul.f32 0.044715, %v3859_v36  ;;  %v3598_v16 = vadd.f32 %v3597_v34, %v9351_v2  ;;  %v4090_v39 = vmul.f32 %v4058_v26, %v9366_v14  ;;  %v6890_v2 = vld [vmem:[%s8116_s30 + $0x2b0] sm:$0xf]  ;;  %v7409_v36 = vld [vmem:[%s8116_s30 + $0x2a4] sm:$0xf0] }
 0x778   : > { %v3916_v44 = vadd.f32 %v3884_v41, %v9414_v13  ;;  %v9442_v52 = vadd.f32 %v3652_v59, %v3634_v4  ;;  %v6891_v51 = vor.u32 %v7411_v27, %v6890_v2  ;;  %v4067_v23 = vmul.f32 %v4035_v54, %v9369_v22 }
 0x779   : > { %v3923_v49 = vadd.f32 %v3891_v38, %v9418_v46  ;;  %v9445_v28 = vadd.f32 %v3616_v11, %v3598_v16  ;;  %v9447_v48 = vpack.c.bf16 %v4090_v39, %v4082_v50  ;;  %4969 = vmatpush.bf16.msrb.mxu0 %v6811_v5  ;;  %v6883_v34 = vor.u32 %v7409_v36, %v6882_v63  ;;  %v6802_v11 = vld [vmem:[%s8116_s30 + $0x200] sm:$0xf] }
 0x77a   : > { %v7646_v56 = vpop.eup %7645  ;;  %v3948_v14 = vmul.f32 0.7978846, %v3916_v44  ;;  %v3828_v0 = vmul.f32 %v9442_v52, %v9442_v52  ;;  %4986 = vmatpush.bf16.msrb.mxu1 %v6891_v51  ;;  %v9478_v22 = vperm.slane %v9238_v47, 5  ;;  %v7407_v44 = vld [vmem:[%s8116_s30 + $0x294] sm:$0xf0] }
 0x77b   : > { %v7648_v33 = vpop.eup %7647  ;;  %v4004_v29 = vadd.f32 1.0, %v7646_v56  ;;  %v3955_v31 = vmul.f32 0.7978846, %v3923_v49  ;;  %v3835_v61 = vmul.f32 %v9445_v28, %v9445_v28  ;;  %4919 = vmatmul.bf16.gmra.mxu1 %v9447_v48  ;;  %v6875_v27 = vor.u32 %v7407_v44, %v6874_v42  ;;  %v7050_v44 = vld [vmem:[%s8116_s30 + $0x3f0] sm:$0xf] }
 0x77c   : > { %v4011_v25 = vadd.f32 1.0, %v7648_v33  ;;  %7649 = vtanh.f32 %v3948_v14  ;;  %v3860_v15 = vmul.f32 %v3828_v0, %v9442_v52  ;;  %v6986_v33 = vld [vmem:[%s8116_s30 + $0x370] sm:$0xf] }
 0x77d   : > { %7651 = vtanh.f32 %v3955_v31  ;;  %v3867_v62 = vmul.f32 %v3835_v61, %v9445_v28  ;;  %v3635_v7 = vpop.f32.mrf.mxu2  ;;  %v3654_v32 = vpop.f32.mrf.mxu3  ;;  %v4036_v6 = vmul.f32 0.5, %v4004_v29  ;;  %v7435_v31 = vld [vmem:[%s8116_s30 + $0x374] sm:$0xf0]  ;;  %v7338_v61 = vld [vmem:[%s8116_s30 + $0x74] sm:$0xf] }
 0x77e   : > { %v4043_v59 = vmul.f32 0.5, %v4011_v25  ;;  %v3892_v26 = vmul.f32 0.044715, %v3860_v15  ;;  %v3636_v55 = vadd.f32 %v3635_v7, %v9376_v37  ;;  %v3666_v9 = vpop.f32.mrf.mxu0  ;;  %v3685_v20 = vpop.f32.mrf.mxu1  ;;  %v6803_v37 = vor.u32 %v7389_v17, %v6802_v11  ;;  %4987 = vmatpush.bf16.msrb.mxu1 %v6883_v34  ;;  %v6604_v7 = vld [vmem:[%s8116_s30 + $0x78] sm:$0xf0] }
 0x77f   : > { %v3899_v41 = vmul.f32 0.044715, %v3867_v62  ;;  %v3667_v4 = vadd.f32 %v3666_v9, %v9454_v58  ;;  %v4068_v54 = vmul.f32 %v4036_v6, %v9391_v10  ;;  %v6987_v62 = vor.u32 %v7435_v31, %v6986_v33  ;;  %v6866_v10 = vld [vmem:[%s8116_s30 + $0x280] sm:$0xf] }
 0x780   : > { %v4075_v38 = vmul.f32 %v4043_v59, %v9394_v30  ;;  %v3924_v16 = vadd.f32 %v3892_v26, %v9442_v52  ;;  %v9472_v50 = vadd.f32 %v3654_v32, %v3636_v55  ;;  %4970 = vmatpush.bf16.msrb.mxu0 %v6803_v37  ;;  %v6607_v59 = vor.u32 %v7338_v61, %v6604_v7  ;;  %v7405_v26 = vld [vmem:[%s8116_s30 + $0x284] sm:$0xf0]  ;;  %v7334_v7 = vld [vmem:[%s8116_s30 + $0x54] sm:$0xf] }
 0x781   : > { %v3931_v39 = vadd.f32 %v3899_v41, %v9445_v28  ;;  %v9475_v43 = vadd.f32 %v3685_v20, %v3667_v4  ;;  %5001 = vmatpush.bf16.msrb.mxu2 %v6987_v62  ;;  %v6978_v41 = vld [vmem:[%s8116_s30 + $0x360] sm:$0xf]  ;;  %v7433_v4 = vld [vmem:[%s8116_s30 + $0x364] sm:$0xf0]  ;;  %v7431_v62 = vld [vmem:[%s8116_s30 + $0x354] sm:$0xf0] }
 0x782   : > { %v7650_v12 = vpop.eup %7649  ;;  %v9482_v30 = vpack.c.bf16 %v4075_v38, %v4067_v23  ;;  %v3956_v49 = vmul.f32 0.7978846, %v3924_v16  ;;  %v3836_v2 = vmul.f32 %v9472_v50, %v9472_v50  ;;  %4988 = vmatpush.bf16.msrb.mxu1 %v6875_v27  ;;  %v6867_v23 = vor.u32 %v7405_v26, %v6866_v10  ;;  %v7336_v38 = vld [vmem:[%s8116_s30 + $0x64] sm:$0xf]  ;;  %v6596_v16 = vld [vmem:[%s8116_s30 + $0x68] sm:$0xf0] }
 0x783   : > { %v7652_v56 = vpop.eup %7651  ;;  %v4012_v14 = vadd.f32 1.0, %v7650_v12  ;;  %v3963_v0 = vmul.f32 0.7978846, %v3931_v39  ;;  %v3813_v51 = vmul.f32 %v9475_v43, %v9475_v43  ;;  %v6979_v17 = vor.u32 %v7433_v4, %v6978_v41  ;;  %v7451_v12 = vld [vmem:[%s8116_s30 + $0x3f4] sm:$0xf0] }
 0x784   : > { %7653 = vtanh.f32 %v3956_v49  ;;  %v3868_v29 = vmul.f32 %v3836_v2, %v9472_v50  ;;  %4933 = vmatmul.bf16.vlgmr.msra.gmra.mxu2 %v9482_v30  ;;  %v4019_v6 = vadd.f32 1.0, %v7652_v56  ;;  %5039 = vmatpush.bf16.msra.mxu0 %v6607_v59  ;;  %v6599_v42 = vor.u32 %v7336_v38, %v6596_v16  ;;  %v7354_v49 = vld [vmem:[%s8116_s30 + $0xf4] sm:$0xf]  ;;  %v7042_v59 = vld [vmem:[%s8116_s30 + $0x3e0] sm:$0xf] }
 0x785   : > { %v4044_v8 = vmul.f32 0.5, %v4012_v14  ;;  %v3845_v25 = vmul.f32 %v3813_v51, %v9475_v43  ;;  %v3704_v15 = vpop.f32.mrf.mxu2  ;;  %v3723_v35 = vpop.f32.mrf.mxu3  ;;  %7655 = vtanh.f32 %v3963_v0  ;;  %v7051_v0 = vor.u32 %v7451_v12, %v7050_v44  ;;  %v6668_v51 = vld [vmem:[%s8116_s30 + $0xf8] sm:$0xf0]  ;;  %5002 = vmatpush.bf16.msrb.mxu2 %v6979_v17  ;;  %v7449_v41 = vld [vmem:[%s8116_s30 + $0x3e4] sm:$0xf0] }
 0x786   : > { %v3900_v32 = vmul.f32 0.044715, %v3868_v29  ;;  %v3705_v5 = vadd.f32 %v3704_v15, %v9478_v22  ;;  %v3668_v63 = vpop.f32.mrf.mxu0  ;;  %v3687_v36 = vpop.f32.mrf.mxu1  ;;  %4989 = vmatpush.bf16.msrb.mxu1 %v6867_v23  ;;  %v4051_v14 = vmul.f32 0.5, %v4019_v6  ;;  %v6671_v61 = vor.u32 %v7354_v49, %v6668_v51  ;;  %v6588_v6 = vld [vmem:[%s8116_s30 + $0x58] sm:$0xf0] }
 0x787   : > { %v4076_v55 = vmul.f32 %v4044_v8, %v9414_v13  ;;  %v3877_v9 = vmul.f32 0.044715, %v3845_v25  ;;  %v3669_v20 = vadd.f32 %v3668_v63, %v9454_v58  ;;  %v6970_v8 = vld [vmem:[%s8116_s30 + $0x350] sm:$0xf]  ;;  %5020 = vmatpush.bf16.msrb.mxu3 %v7051_v0  ;;  %v6591_v23 = vor.u32 %v7334_v7, %v6588_v6  ;;  %v7352_v16 = vld [vmem:[%s8116_s30 + $0xe4] sm:$0xf] }
 0x788   : > { %v3932_v34 = vadd.f32 %v3900_v32, %v9472_v50  ;;  %v9504_v11 = vadd.f32 %v3723_v35, %v3705_v5  ;;  %v9525_v35 = vperm.slane %v9238_v47, 6  ;;  %5040 = vmatpush.bf16.msra.mxu0 %v6599_v42  ;;  %v4083_v17 = vmul.f32 %v4051_v14, %v9418_v46 }
 0x789   : > { %v9508_v13 = vpack.c.bf16 %v4076_v55, %v4068_v54  ;;  %v3909_v37 = vadd.f32 %v3877_v9, %v9475_v43  ;;  %v9511_v39 = vadd.f32 %v3687_v36, %v3669_v20  ;;  %v6971_v36 = vor.u32 %v7431_v62, %v6970_v8  ;;  %v6652_v62 = vld [vmem:[%s8116_s30 + $0xd8] sm:$0xf0] }
 0x78a   : > { %v7654_v2 = vpop.eup %7653  ;;  %v3964_v27 = vmul.f32 0.7978846, %v3932_v34  ;;  %v3814_v56 = vmul.f32 %v9504_v11, %v9504_v11  ;;  %5058 = vmatpush.bf16.msra.mxu1 %v6671_v61  ;;  %v7043_v38 = vor.u32 %v7449_v41, %v7042_v59 }
 0x78b   : > { %v7656_v33 = vpop.eup %7655  ;;  %v3941_v54 = vmul.f32 0.7978846, %v3909_v37  ;;  %v3821_v29 = vmul.f32 %v9511_v39, %v9511_v39  ;;  %4952 = vmatmul.bf16.vlgmr.msra.gmra.mxu3 %v9508_v13  ;;  %v4020_v31 = vadd.f32 1.0, %v7654_v2  ;;  %5003 = vmatpush.bf16.msrb.mxu2 %v6971_v36  ;;  %v6660_v37 = vld [vmem:[%s8116_s30 + $0xe8] sm:$0xf0] }
 0x78c   : > { %v3846_v25 = vmul.f32 %v3814_v56, %v9504_v11  ;;  %v4027_v15 = vadd.f32 1.0, %v7656_v33  ;;  %7657 = vtanh.f32 %v3964_v27  ;;  %5041 = vmatpush.bf16.msra.mxu0 %v6591_v23  ;;  %v6663_v49 = vor.u32 %v7352_v16, %v6660_v37  ;;  %v6962_v2 = vld [vmem:[%s8116_s30 + $0x340] sm:$0xf]  ;;  %v7429_v27 = vld [vmem:[%s8116_s30 + $0x344] sm:$0xf0]  ;;  %5021 = vmatpush.bf16.msrb.mxu3 %v7043_v38 }
 0x78d   : > { %7659 = vtanh.f32 %v3941_v54  ;;  %v3853_v10 = vmul.f32 %v3821_v29, %v9511_v39  ;;  %v3706_v32 = vpop.f32.mrf.mxu2  ;;  %v3725_v5 = vpop.f32.mrf.mxu3  ;;  %v4052_v63 = vmul.f32 0.5, %v4020_v31  ;;  %v7332_v56 = vld [vmem:[%s8116_s30 + $0x44] sm:$0xf]  ;;  %v6963_v51 = vor.u32 %v7429_v27, %v6962_v2  ;;  %v6580_v33 = vld [vmem:[%s8116_s30 + $0x48] sm:$0xf0] }
 0x78e   : > { %v3878_v26 = vmul.f32 0.044715, %v3846_v25  ;;  %v3707_v47 = vadd.f32 %v3706_v32, %v9478_v22  ;;  %v3671_v55 = vpop.f32.mrf.mxu0  ;;  %v3690_v9 = vpop.f32.mrf.mxu1  ;;  %v4059_v20 = vmul.f32 0.5, %v4027_v15  ;;  %v7034_v54 = vld [vmem:[%s8116_s30 + $0x3d0] sm:$0xf]  ;;  %5059 = vmatpush.bf16.msra.mxu1 %v6663_v49  ;;  %v6583_v25 = vor.u32 %v7332_v56, %v6580_v33 }
 0x78f   : > { %v3885_v4 = vmul.f32 0.044715, %v3853_v10  ;;  %v3672_v34 = vadd.f32 %v3671_v55, %v9454_v58  ;;  %v4084_v0 = vmul.f32 %v4052_v63, %v9442_v52  ;;  %v7447_v29 = vld [vmem:[%s8116_s30 + $0x3d4] sm:$0xf0]  ;;  %v7350_v15 = vld [vmem:[%s8116_s30 + $0xd4] sm:$0xf]  ;;  %5004 = vmatpush.bf16.msrb.mxu2 %v6963_v51 }
 0x790   : > { %v3910_v42 = vadd.f32 %v3878_v26, %v9504_v11  ;;  %v9539_v44 = vadd.f32 %v3725_v5, %v3707_v47  ;;  %v4091_v12 = vmul.f32 %v4059_v20, %v9445_v28  ;;  %v7035_v5 = vor.u32 %v7447_v29, %v7034_v54  ;;  %v6954_v63 = vld [vmem:[%s8116_s30 + $0x330] sm:$0xf]  ;;  %5042 = vmatpush.bf16.msra.mxu0 %v6583_v25  ;;  %v7427_v26 = vld [vmem:[%s8116_s30 + $0x334] sm:$0xf0]  ;;  %v7330_v47 = vld [vmem:[%s8116_s30 + $0x34] sm:$0xf] }
 0x791   : > { %v3917_v46 = vadd.f32 %v3885_v4, %v9511_v39  ;;  %v9546_v14 = vadd.f32 %v3690_v9, %v3672_v34  ;;  %v6655_v59 = vor.u32 %v7350_v15, %v6652_v62  ;;  %v6955_v41 = vor.u32 %v7427_v26, %v6954_v63  ;;  %v6572_v4 = vld [vmem:[%s8116_s30 + $0x38] sm:$0xf0]  ;;  %v7026_v34 = vld [vmem:[%s8116_s30 + $0x3c0] sm:$0xf]  ;;  %v7445_v49 = vld [vmem:[%s8116_s30 + $0x3c4] sm:$0xf0] }
 0x792   : > { %v7658_v28 = vpop.eup %7657  ;;  %v3942_v31 = vmul.f32 0.7978846, %v3910_v42  ;;  %v3822_v61 = vmul.f32 %v9539_v44, %v9539_v44  ;;  %v9554_v8 = vpack.c.bf16 %v4091_v12, %v4083_v17  ;;  %5022 = vmatpush.bf16.msrb.mxu3 %v7035_v5  ;;  %v6575_v12 = vor.u32 %v7330_v47, %v6572_v4  ;;  %v7348_v51 = vld [vmem:[%s8116_s30 + $0xc4] sm:$0xf]  ;;  %v6644_v33 = vld [vmem:[%s8116_s30 + $0xc8] sm:$0xf0] }
 0x793   : > { %v7660_v52 = vpop.eup %7659  ;;  %v3949_v7 = vmul.f32 0.7978846, %v3917_v46  ;;  %v3829_v10 = vmul.f32 %v9546_v14, %v9546_v14  ;;  %v4028_v32 = vadd.f32 1.0, %v7658_v28  ;;  %5060 = vmatpush.bf16.msra.mxu1 %v6655_v59  ;;  %5005 = vmatpush.bf16.msrb.mxu2 %v6955_v41  ;;  %v7027_v46 = vor.u32 %v7445_v49, %v7026_v34  ;;  %v7328_v25 = vld [vmem:[%s8116_s30 + $0x24] sm:$0xf] }
 0x794   : > { %v4005_v36 = vadd.f32 1.0, %v7660_v52  ;;  %7661 = vtanh.f32 %v3942_v31  ;;  %v3854_v6 = vmul.f32 %v3822_v61, %v9539_v44  ;;  %4938 = vmatmul.bf16.gmra.mxu2 %v9554_v8  ;;  %5043 = vmatpush.bf16.msra.mxu0 %v6575_v12  ;;  %v6647_v28 = vor.u32 %v7348_v51, %v6644_v33  ;;  %v6946_v31 = vld [vmem:[%s8116_s30 + $0x320] sm:$0xf]  ;;  %v7425_v61 = vld [vmem:[%s8116_s30 + $0x324] sm:$0xf0] }
 0x795   : > { %7663 = vtanh.f32 %v3949_v7  ;;  %v3861_v55 = vmul.f32 %v3829_v10, %v9546_v14  ;;  %v3709_v9 = vpop.f32.mrf.mxu2  ;;  %v3728_v20 = vpop.f32.mrf.mxu3  ;;  %v4060_v23 = vmul.f32 0.5, %v4028_v32  ;;  %v6947_v62 = vor.u32 %v7425_v61, %v6946_v31  ;;  %v6564_v52 = vld [vmem:[%s8116_s30 + $0x28] sm:$0xf0]  ;;  %v7018_v7 = vld [vmem:[%s8116_s30 + $0x3b0] sm:$0xf] }
 0x796   : > { %v9568_v17 = vmul.f32 0.5, %v4005_v36  ;;  %v3886_v38 = vmul.f32 0.044715, %v3854_v6  ;;  %v3710_v16 = vadd.f32 %v3709_v9, %v9478_v22  ;;  %v3673_v37 = vpop.f32.mrf.mxu0  ;;  %v3692_v42 = vpop.f32.mrf.mxu1  ;;  %5023 = vmatpush.bf16.msrb.mxu3 %v7027_v46  ;;  %v7443_v10 = vld [vmem:[%s8116_s30 + $0x3b4] sm:$0xf0]  ;;  %v6567_v36 = vor.u32 %v7328_v25, %v6564_v52 }
 0x797   : > { %v3893_v2 = vmul.f32 0.044715, %v3861_v55  ;;  %v3674_v27 = vadd.f32 %v3673_v37, %v9454_v58  ;;  %v4092_v56 = vmul.f32 %v4060_v23, %v9472_v50  ;;  %5061 = vmatpush.bf16.msra.mxu1 %v6647_v28  ;;  %v7019_v6 = vor.u32 %v7443_v10, %v7018_v7  ;;  %v7346_v59 = vld [vmem:[%s8116_s30 + $0xb4] sm:$0xf]  ;;  %v6636_v26 = vld [vmem:[%s8116_s30 + $0xb8] sm:$0xf0]  ;;  %5006 = vmatpush.bf16.msrb.mxu2 %v6947_v62 }
 0x798   : > { %v3918_v54 = vadd.f32 %v3886_v38, %v9539_v44  ;;  %v9577_v29 = vadd.f32 %v3728_v20, %v3710_v16  ;;  %v6639_v20 = vor.u32 %v7346_v59, %v6636_v26  ;;  %v6938_v23 = vld [vmem:[%s8116_s30 + $0x310] sm:$0xf]  ;;  %5044 = vmatpush.bf16.msra.mxu0 %v6567_v36  ;;  %v7423_v34 = vld [vmem:[%s8116_s30 + $0x314] sm:$0xf0]  ;;  %v7326_v38 = vld [vmem:[%s8116_s30 + $0x14] sm:$0xf]  ;;  %v4069_v31 = vmul.f32 %v9568_v17, %v9475_v43 }
 0x799   : > { %v3925_v58 = vadd.f32 %v3893_v2, %v9546_v14  ;;  %v9583_v50 = vadd.f32 %v3692_v42, %v3674_v27  ;;  %v9585_v15 = vpack.c.bf16 %v4092_v56, %v4084_v0  ;;  %v6939_v49 = vor.u32 %v7423_v34, %v6938_v23  ;;  %v6556_v2 = vld [vmem:[%s8116_s30 + $0x18] sm:$0xf0]  ;;  %v7010_v28 = vld [vmem:[%s8116_s30 + $0x3a0] sm:$0xf]  ;;  %v7344_v43 = vld [vmem:[%s8116_s30 + $0xa4] sm:$0xf] }
 0x79a   : > { %v7662_v32 = vpop.eup %7661  ;;  %v3950_v5 = vmul.f32 0.7978846, %v3918_v54  ;;  %v3830_v63 = vmul.f32 %v9577_v29, %v9577_v29  ;;  %5024 = vmatpush.bf16.msrb.mxu3 %v7019_v6  ;;  %v6559_v54 = vor.u32 %v7326_v38, %v6556_v2  ;;  %v6628_v17 = vld [vmem:[%s8116_s30 + $0xa8] sm:$0xf0]  ;;  %v7421_v26 = vld [vmem:[%s8116_s30 + $0x304] sm:$0xf0] }
 0x79b   : > { %v7664_v0 = vpop.eup %7663  ;;  %v4006_v47 = vadd.f32 1.0, %v7662_v32  ;;  %v3957_v55 = vmul.f32 0.7978846, %v3925_v58  ;;  %v3837_v9 = vmul.f32 %v9583_v50, %v9583_v50  ;;  %4957 = vmatmul.bf16.gmra.mxu3 %v9585_v15  ;;  %5062 = vmatpush.bf16.msra.mxu1 %v6639_v20  ;;  %v7699_v58 = vld [vmem:[%s8105_s9] sm:$0xff]  ;;  %v6631_v59 = vor.u32 %v7344_v43, %v6628_v17  ;;  %v6860_v43 = vld [vmem:[%s8116_s30 + $0x278] sm:$0xf0] }
 0x79c   : > { %v4013_v41 = vadd.f32 1.0, %v7664_v0  ;;  %7665 = vtanh.f32 %v3950_v5  ;;  %v3862_v4 = vmul.f32 %v3830_v63, %v9577_v29  ;;  %v9609_v62 = vperm.slane %v7699_v58, 7  ;;  %5007 = vmatpush.bf16.msrb.mxu2 %v6939_v49  ;;  %5045 = vmatpush.bf16.msra.mxu0 %v6559_v54  ;;  %v6930_v5 = vld [vmem:[%s8116_s30 + $0x300] sm:$0xf]  ;;  %v6548_v0 = vld [vmem:[%s8116_s30 + $0x8] sm:$0xf0] }
 0x79d   : > { %v4038_v16 = vmul.f32 0.5, %v4006_v47  ;;  %7667 = vtanh.f32 %v3957_v55  ;;  %v3869_v37 = vmul.f32 %v3837_v9, %v9583_v50  ;;  %v3711_v42 = vpop.f32.mrf.mxu2  ;;  %v3730_v12 = vpop.f32.mrf.mxu3  ;;  %v6931_v23 = vor.u32 %v7421_v26, %v6930_v5  ;;  %v6994_v26 = vld [vmem:[%s8116_s30 + $0x380] sm:$0xf] }
 0x79e   : > { %v4045_v27 = vmul.f32 0.5, %v4013_v41  ;;  %v3894_v56 = vmul.f32 0.044715, %v3862_v4  ;;  %v3712_v46 = vadd.f32 %v3711_v42, %v9478_v22  ;;  %v3742_v51 = vpop.f32.mrf.mxu0  ;;  %v3761_v33 = vpop.f32.mrf.mxu1  ;;  %v7441_v22 = vld [vmem:[%s8116_s30 + $0x3a4] sm:$0xf0] }
 0x79f   : > { %v3901_v61 = vmul.f32 0.044715, %v3869_v37  ;;  %v3743_v25 = vadd.f32 %v3742_v51, %v9525_v35  ;;  %v7011_v32 = vor.u32 %v7441_v22, %v7010_v28  ;;  %v4070_v63 = vmul.f32 %v4038_v16, %v9504_v11  ;;  %v7002_v11 = vld [vmem:[%s8116_s30 + $0x390] sm:$0xf]  ;;  %v7439_v41 = vld [vmem:[%s8116_s30 + $0x394] sm:$0xf0]  ;;  %5063 = vmatpush.bf16.msra.mxu1 %v6631_v59 }
 0x7a0   : > { %v4077_v52 = vmul.f32 %v4045_v27, %v9511_v39  ;;  %v3926_v7 = vadd.f32 %v3894_v56, %v9577_v29  ;;  %v9614_v10 = vadd.f32 %v3730_v12, %v3712_v46  ;;  %v7324_v39 = vld [vmem:[%s8116_s30 + $0x4] sm:$0xf]  ;;  %v7342_v42 = vld [vmem:[%s8116_s30 + $0x94] sm:$0xf]  ;;  %5008 = vmatpush.bf16.msrb.mxu2 %v6931_v23  ;;  %v7003_v2 = vor.u32 %v7439_v41, %v7002_v11  ;;  %v6620_v27 = vld [vmem:[%s8116_s30 + $0x98] sm:$0xf0] }
 0x7a1   : > { %v3933_v36 = vadd.f32 %v3901_v61, %v9583_v50  ;;  %v9621_v6 = vadd.f32 %v3761_v33, %v3743_v25  ;;  %5025 = vmatpush.bf16.msrb.mxu3 %v7011_v32  ;;  %v6551_v37 = vor.u32 %v7324_v39, %v6548_v0  ;;  %v7370_v56 = vld [vmem:[%s8116_s30 + $0x174] sm:$0xf]  ;;  %v6623_v28 = vor.u32 %v7342_v42, %v6620_v27  ;;  %v7437_v39 = vld [vmem:[%s8116_s30 + $0x384] sm:$0xf0]  ;;  %v6612_v23 = vld [vmem:[%s8116_s30 + $0x88] sm:$0xf0] }
 0x7a2   : > { %v7666_v47 = vpop.eup %7665  ;;  %v9626_v55 = vpack.c.bf16 %v4077_v52, %v4069_v31  ;;  %v3958_v9 = vmul.f32 0.7978846, %v3926_v7  ;;  %v3838_v20 = vmul.f32 %v9614_v10, %v9614_v10  ;;  %v6732_v31 = vld [vmem:[%s8116_s30 + $0x178] sm:$0xf0]  ;;  %v7402_v61 = vld [vmem:[%s8116_s30 + $0x274] sm:$0xf] }
 0x7a3   : > { %v7668_v4 = vpop.eup %7667  ;;  %v4014_v34 = vadd.f32 1.0, %v7666_v47  ;;  %v3965_v38 = vmul.f32 0.7978846, %v3933_v36  ;;  %v3815_v16 = vmul.f32 %v9621_v6, %v9621_v6  ;;  %5046 = vmatpush.bf16.msra.mxu0 %v6551_v37  ;;  %v6735_v32 = vor.u32 %v7370_v56, %v6732_v31  ;;  %5064 = vmatpush.bf16.msra.mxu1 %v6623_v28  ;;  %v6852_v37 = vld [vmem:[%s8116_s30 + $0x268] sm:$0xf0] }
 0x7a4   : > { %7669 = vtanh.f32 %v3958_v9  ;;  %v3870_v12 = vmul.f32 %v3838_v20, %v9614_v10  ;;  %4971 = vmatmul.bf16.vlgmr.msrb.gmra.mxu0 %v9626_v55  ;;  %v4021_v49 = vadd.f32 1.0, %v7668_v4  ;;  %v6863_v59 = vor.u32 %v7402_v61, %v6860_v43  ;;  %v7340_v20 = vld [vmem:[%s8116_s30 + $0x84] sm:$0xf]  ;;  %v7386_v27 = vld [vmem:[%s8116_s30 + $0x1f4] sm:$0xf] }
 0x7a5   : > { %v4046_v46 = vmul.f32 0.5, %v4014_v34  ;;  %7671 = vtanh.f32 %v3965_v38  ;;  %v3847_v51 = vmul.f32 %v3815_v16, %v9621_v6  ;;  %v3780_v33 = vpop.f32.mrf.mxu2  ;;  %v3799_v54 = vpop.f32.mrf.mxu3  ;;  %5026 = vmatpush.bf16.msrb.mxu3 %v7003_v2  ;;  %5077 = vmatpush.bf16.msra.mxu2 %v6735_v32  ;;  %v6995_v9 = vor.u32 %v7437_v39, %v6994_v26  ;;  %v6724_v38 = vld [vmem:[%s8116_s30 + $0x168] sm:$0xf0]  ;;  %v7400_v16 = vld [vmem:[%s8116_s30 + $0x264] sm:$0xf] }
 0x7a6   : > { %v3902_v25 = vmul.f32 0.044715, %v3870_v12  ;;  %v3781_v58 = vadd.f32 %v3780_v33, %v9609_v62  ;;  %v3744_v22 = vpop.f32.mrf.mxu0  ;;  %v3763_v52 = vpop.f32.mrf.mxu1  ;;  %v9643_v7 = vmul.f32 0.5, %v4021_v49  ;;  %v6615_v34 = vor.u32 %v7340_v20, %v6612_v23  ;;  %v6796_v56 = vld [vmem:[%s8116_s30 + $0x1f8] sm:$0xf0] }
 0x7a7   : > { %v4078_v17 = vmul.f32 %v4046_v46, %v9539_v44  ;;  %v3879_v5 = vmul.f32 0.044715, %v3847_v51  ;;  %v3745_v36 = vadd.f32 %v3744_v22, %v9525_v35  ;;  %v7368_v44 = vld [vmem:[%s8116_s30 + $0x164] sm:$0xf]  ;;  %5115 = vmatpush.bf16.msrb.mxu0 %v6863_v59  ;;  %v6799_v28 = vor.u32 %v7386_v27, %v6796_v56  ;;  %v7418_v31 = vld [vmem:[%s8116_s30 + $0x2f4] sm:$0xf] }
 0x7a8   : > { %v3934_v0 = vadd.f32 %v3902_v25, %v9614_v10  ;;  %v9651_v47 = vadd.f32 %v3799_v54, %v3781_v58  ;;  %v6727_v2 = vor.u32 %v7368_v44, %v6724_v38  ;;  %5065 = vmatpush.bf16.msra.mxu1 %v6615_v34  ;;  %v6924_v58 = vld [vmem:[%s8116_s30 + $0x2f8] sm:$0xf0]  ;;  %v7366_v22 = vld [vmem:[%s8116_s30 + $0x154] sm:$0xf]  ;;  %v4085_v38 = vmul.f32 %v9643_v7, %v9546_v14  ;;  %v7416_v27 = vld [vmem:[%s8116_s30 + $0x2e4] sm:$0xf] }
 0x7a9   : > { %v9656_v11 = vpack.c.bf16 %v4078_v17, %v4070_v63  ;;  %v3911_v41 = vadd.f32 %v3879_v5, %v9621_v6  ;;  %v9659_v4 = vadd.f32 %v3763_v52, %v3745_v36  ;;  %5027 = vmatpush.bf16.msrb.mxu3 %v6995_v9  ;;  %v6855_v63 = vor.u32 %v7400_v16, %v6852_v37  ;;  %v6716_v36 = vld [vmem:[%s8116_s30 + $0x158] sm:$0xf0]  ;;  %v7398_v59 = vld [vmem:[%s8116_s30 + $0x254] sm:$0xf]  ;;  %v7384_v37 = vld [vmem:[%s8116_s30 + $0x1e4] sm:$0xf] }
 0x7aa   : > { %v7670_v42 = vpop.eup %7669  ;;  %v3966_v12 = vmul.f32 0.7978846, %v3934_v0  ;;  %v3816_v49 = vmul.f32 %v9651_v47, %v9651_v47  ;;  %5078 = vmatpush.bf16.msra.mxu2 %v6727_v2  ;;  %v6927_v5 = vor.u32 %v7418_v31, %v6924_v58  ;;  %v6719_v23 = vor.u32 %v7366_v22, %v6716_v36  ;;  %v6844_v44 = vld [vmem:[%s8116_s30 + $0x258] sm:$0xf0]  ;;  %v6916_v56 = vld [vmem:[%s8116_s30 + $0x2e8] sm:$0xf0] }
 0x7ab   : > { %v7672_v46 = vpop.eup %7671  ;;  %v3943_v51 = vmul.f32 0.7978846, %v3911_v41  ;;  %v3823_v33 = vmul.f32 %v9659_v4, %v9659_v4  ;;  %4990 = vmatmul.bf16.vlgmr.msrb.gmra.mxu1 %v9656_v11  ;;  %v4022_v54 = vadd.f32 1.0, %v7670_v42  ;;  %5116 = vmatpush.bf16.msrb.mxu0 %v6855_v63  ;;  %v6847_v16 = vor.u32 %v7398_v59, %v6844_v44  ;;  %v6788_v42 = vld [vmem:[%s8116_s30 + $0x1e8] sm:$0xf0] }
 0x7ac   : > { %7673 = vtanh.f32 %v3966_v12  ;;  %v3848_v61 = vmul.f32 %v3816_v49, %v9651_v47  ;;  %v4029_v25 = vadd.f32 1.0, %v7672_v46  ;;  %5134 = vmatpush.bf16.msrb.mxu1 %v6927_v5  ;;  %v6791_v63 = vor.u32 %v7384_v37, %v6788_v42  ;;  %v7364_v46 = vld [vmem:[%s8116_s30 + $0x144] sm:$0xf]  ;;  %v6836_v31 = vld [vmem:[%s8116_s30 + $0x248] sm:$0xf0] }
 0x7ad   : > { %7675 = vtanh.f32 %v3943_v51  ;;  %v3855_v52 = vmul.f32 %v3823_v33, %v9659_v4  ;;  %v3782_v32 = vpop.f32.mrf.mxu2  ;;  %v3801_v43 = vpop.f32.mrf.mxu3  ;;  %v4054_v17 = vmul.f32 0.5, %v4022_v54  ;;  %5096 = vmatpush.bf16.msra.mxu3 %v6799_v28  ;;  %v6919_v33 = vor.u32 %v7416_v27, %v6916_v56  ;;  %v6708_v54 = vld [vmem:[%s8116_s30 + $0x148] sm:$0xf0]  ;;  %v7396_v28 = vld [vmem:[%s8116_s30 + $0x244] sm:$0xf] }
 0x7ae   : > { %v3880_v26 = vmul.f32 0.044715, %v3848_v61  ;;  %v3783_v39 = vadd.f32 %v3782_v32, %v9609_v62  ;;  %v3747_v0 = vpop.f32.mrf.mxu0  ;;  %v3766_v9 = vpop.f32.mrf.mxu1  ;;  %v4061_v20 = vmul.f32 0.5, %v4029_v25  ;;  %5079 = vmatpush.bf16.msra.mxu2 %v6719_v23  ;;  %v6711_v22 = vor.u32 %v7364_v46, %v6708_v54  ;;  %v6780_v32 = vld [vmem:[%s8116_s30 + $0x1d8] sm:$0xf0] }
 0x7af   : > { %v3887_v41 = vmul.f32 0.044715, %v3855_v52  ;;  %v3748_v34 = vadd.f32 %v3747_v0, %v9525_v35  ;;  %v4086_v51 = vmul.f32 %v4054_v17, %v9577_v29  ;;  %5117 = vmatpush.bf16.msrb.mxu0 %v6847_v16  ;;  %v7382_v52 = vld [vmem:[%s8116_s30 + $0x1d4] sm:$0xf]  ;;  %v6839_v36 = vor.u32 %v7396_v28, %v6836_v31  ;;  %v6700_v16 = vld [vmem:[%s8116_s30 + $0x138] sm:$0xf0] }
 0x7b0   : > { %v3912_v12 = vadd.f32 %v3880_v26, %v9651_v47  ;;  %v9686_v49 = vadd.f32 %v3801_v43, %v3783_v39  ;;  %v4093_v2 = vmul.f32 %v4061_v20, %v9583_v50  ;;  %5135 = vmatpush.bf16.msrb.mxu1 %v6919_v33  ;;  %v7414_v59 = vld [vmem:[%s8116_s30 + $0x2d4] sm:$0xf]  ;;  %v6783_v0 = vor.u32 %v7382_v52, %v6780_v32  ;;  %v6828_v56 = vld [vmem:[%s8116_s30 + $0x238] sm:$0xf0]  ;;  %v7380_v28 = vld [vmem:[%s8116_s30 + $0x1c4] sm:$0xf] }
 0x7b1   : > { %v3919_v14 = vadd.f32 %v3887_v41, %v9659_v4  ;;  %v9693_v7 = vadd.f32 %v3766_v9, %v3748_v34  ;;  %5097 = vmatpush.bf16.msra.mxu3 %v6791_v63  ;;  %v6908_v9 = vld [vmem:[%s8116_s30 + $0x2d8] sm:$0xf0]  ;;  %v7362_v20 = vld [vmem:[%s8116_s30 + $0x134] sm:$0xf]  ;;  %v6772_v31 = vld [vmem:[%s8116_s30 + $0x1c8] sm:$0xf0] }
 0x7b2   : > { %v7674_v50 = vpop.eup %7673  ;;  %v3944_v61 = vmul.f32 0.7978846, %v3912_v12  ;;  %v3824_v25 = vmul.f32 %v9686_v49, %v9686_v49  ;;  %v9701_v58 = vpack.c.bf16 %v4093_v2, %v4085_v38  ;;  %5080 = vmatpush.bf16.msra.mxu2 %v6711_v22  ;;  %v6911_v38 = vor.u32 %v7414_v59, %v6908_v9  ;;  %v7394_v37 = vld [vmem:[%s8116_s30 + $0x234] sm:$0xf]  ;;  %v7412_v52 = vld [vmem:[%s8116_s30 + $0x2c4] sm:$0xf] }
 0x7b3   : > { %v7676_v29 = vpop.eup %7675  ;;  %v3951_v43 = vmul.f32 0.7978846, %v3919_v14  ;;  %v3831_v17 = vmul.f32 %v9693_v7, %v9693_v7  ;;  %v4030_v5 = vadd.f32 1.0, %v7674_v50  ;;  %5118 = vmatpush.bf16.msrb.mxu0 %v6839_v36  ;;  %v6703_v27 = vor.u32 %v7362_v20, %v6700_v16  ;;  %v6900_v32 = vld [vmem:[%s8116_s30 + $0x2c8] sm:$0xf0] }
 0x7b4   : > { %v4007_v26 = vadd.f32 1.0, %v7676_v29  ;;  %7677 = vtanh.f32 %v3944_v61  ;;  %v3856_v39 = vmul.f32 %v3824_v25, %v9686_v49  ;;  %4976 = vmatmul.bf16.gmra.mxu0 %v9701_v58  ;;  %5136 = vmatpush.bf16.msrb.mxu1 %v6911_v38  ;;  %v6831_v54 = vor.u32 %v7394_v37, %v6828_v56  ;;  %v7392_v36 = vld [vmem:[%s8116_s30 + $0x224] sm:$0xf]  ;;  %v6820_v59 = vld [vmem:[%s8116_s30 + $0x228] sm:$0xf0] }
 0x7b5   : > { %7679 = vtanh.f32 %v3951_v43  ;;  %v3863_v23 = vmul.f32 %v3831_v17, %v9693_v7  ;;  %v3785_v44 = vpop.f32.mrf.mxu2  ;;  %v3804_v41 = vpop.f32.mrf.mxu3  ;;  %v4062_v34 = vmul.f32 0.5, %v4030_v5  ;;  %5098 = vmatpush.bf16.msra.mxu3 %v6783_v0  ;;  %v6775_v22 = vor.u32 %v7380_v28, %v6772_v31  ;;  %v6692_v5 = vld [vmem:[%s8116_s30 + $0x128] sm:$0xf0]  ;;  %v7410_v37 = vld [vmem:[%s8116_s30 + $0x2b4] sm:$0xf] }
 0x7b6   : > { %v9715_v42 = vmul.f32 0.5, %v4007_v26  ;;  %v3888_v12 = vmul.f32 0.044715, %v3856_v39  ;;  %v3786_v2 = vadd.f32 %v3785_v44, %v9609_v62  ;;  %v3749_v63 = vpop.f32.mrf.mxu0  ;;  %v3768_v25 = vpop.f32.mrf.mxu1  ;;  %5081 = vmatpush.bf16.msra.mxu2 %v6703_v27  ;;  %v6903_v17 = vor.u32 %v7412_v52, %v6900_v32  ;;  %v6764_v44 = vld [vmem:[%s8116_s30 + $0x1b8] sm:$0xf0] }
 0x7b7   : > { %v3895_v46 = vmul.f32 0.044715, %v3863_v23  ;;  %v3750_v14 = vadd.f32 %v3749_v63, %v9525_v35  ;;  %v4094_v33 = vmul.f32 %v4062_v34, %v9614_v10  ;;  %v7360_v35 = vld [vmem:[%s8116_s30 + $0x124] sm:$0xf]  ;;  %5119 = vmatpush.bf16.msrb.mxu0 %v6831_v54  ;;  %v6823_v20 = vor.u32 %v7392_v36, %v6820_v59  ;;  %v7378_v23 = vld [vmem:[%s8116_s30 + $0x1b4] sm:$0xf] }
 0x7b8   : > { %v3920_v50 = vadd.f32 %v3888_v12, %v9686_v49  ;;  %v9724_v61 = vadd.f32 %v3804_v41, %v3786_v2  ;;  %v6695_v9 = vor.u32 %v7360_v35, %v6692_v5  ;;  %v6767_v16 = vor.u32 %v7378_v23, %v6764_v44  ;;  %5137 = vmatpush.bf16.msrb.mxu1 %v6903_v17  ;;  %v6892_v63 = vld [vmem:[%s8116_s30 + $0x2b8] sm:$0xf0]  ;;  %v7358_v27 = vld [vmem:[%s8116_s30 + $0x114] sm:$0xf]  ;;  %v7376_v5 = vld [vmem:[%s8116_s30 + $0x1a4] sm:$0xf] }
 0x7b9   : > { %v3927_v10 = vadd.f32 %v3895_v46, %v9693_v7  ;;  %v9730_v29 = vadd.f32 %v3768_v25, %v3750_v14  ;;  %v9732_v43 = vpack.c.bf16 %v4094_v33, %v4086_v51  ;;  %5099 = vmatpush.bf16.msra.mxu3 %v6775_v22  ;;  %v6895_v33 = vor.u32 %v7410_v37, %v6892_v63  ;;  %v6684_v54 = vld [vmem:[%s8116_s30 + $0x118] sm:$0xf0]  ;;  %v7390_v28 = vld [vmem:[%s8116_s30 + $0x214] sm:$0xf]  ;;  %v6756_v36 = vld [vmem:[%s8116_s30 + $0x1a8] sm:$0xf0] }
 0x7ba   : > { %v7678_v26 = vpop.eup %7677  ;;  %v3952_v39 = vmul.f32 0.7978846, %v3920_v50  ;;  %v3832_v0 = vmul.f32 %v9724_v61, %v9724_v61  ;;  %5082 = vmatpush.bf16.msra.mxu2 %v6695_v9  ;;  %v6687_v22 = vor.u32 %v7358_v27, %v6684_v54  ;;  %v6812_v52 = vld [vmem:[%s8116_s30 + $0x218] sm:$0xf0]  ;;  %v4071_v32 = vmul.f32 %v9715_v42, %v9621_v6  ;;  %v6884_v6 = vld [vmem:[%s8116_s30 + $0x2a8] sm:$0xf0] }
 0x7bb   : > { %v7680_v51 = vpop.eup %7679  ;;  %v4008_v41 = vadd.f32 1.0, %v7678_v26  ;;  %v3959_v34 = vmul.f32 0.7978846, %v3927_v10  ;;  %v3839_v38 = vmul.f32 %v9730_v29, %v9730_v29  ;;  %4995 = vmatmul.bf16.gmra.mxu1 %v9732_v43  ;;  %5120 = vmatpush.bf16.msrb.mxu0 %v6823_v20  ;;  %v6815_v17 = vor.u32 %v7390_v28, %v6812_v52  ;;  %v7356_v42 = vld [vmem:[%s8116_s30 + $0x104] sm:$0xf] }
 0x7bc   : > { %v4015_v12 = vadd.f32 1.0, %v7680_v51  ;;  %7681 = vtanh.f32 %v3952_v39  ;;  %v3864_v2 = vmul.f32 %v3832_v0, %v9724_v61  ;;  %5138 = vmatpush.bf16.msrb.mxu1 %v6895_v33  ;;  %v7408_v39 = vld [vmem:[%s8116_s30 + $0x2a4] sm:$0xf]  ;;  %v6759_v9 = vor.u32 %v7376_v5, %v6756_v36  ;;  %v6676_v23 = vld [vmem:[%s8116_s30 + $0x108] sm:$0xf0] }
 0x7bd   : > { %v9748_v56 = vmul.f32 0.5, %v4008_v41  ;;  %v3871_v46 = vmul.f32 %v3839_v38, %v9730_v29  ;;  %v3787_v14 = vpop.f32.mrf.mxu2  ;;  %5100 = vmatpush.bf16.msra.mxu3 %v6767_v16  ;;  %7683 = vtanh.f32 %v3959_v34  ;;  %v3806_v10 = vpop.f32.mrf.mxu3  ;;  %v6887_v20 = vor.u32 %v7408_v39, %v6884_v6  ;;  %v7388_v44 = vld [vmem:[%s8116_s30 + $0x204] sm:$0xf]  ;;  %v7374_v37 = vld [vmem:[%s8116_s30 + $0x194] sm:$0xf] }
 0x7be   : > { %v4047_v31 = vmul.f32 0.5, %v4015_v12  ;;  %v3896_v50 = vmul.f32 0.044715, %v3864_v2  ;;  %v3788_v25 = vadd.f32 %v3787_v14, %v9609_v62  ;;  %5083 = vmatpush.bf16.msra.mxu2 %v6687_v22  ;;  %v6679_v16 = vor.u32 %v7356_v42, %v6676_v23  ;;  %v6748_v12 = vld [vmem:[%s8116_s30 + $0x198] sm:$0xf0] }
 0x7bf   : > { %v3903_v35 = vmul.f32 0.044715, %v3871_v46  ;;  %5121 = vmatpush.bf16.msrb.mxu0 %v6815_v17  ;;  %v6751_v46 = vor.u32 %v7374_v37, %v6748_v12  ;;  %v7406_v14 = vld [vmem:[%s8116_s30 + $0x294] sm:$0xf]  ;;  %v6876_v54 = vld [vmem:[%s8116_s30 + $0x298] sm:$0xf0] }
 0x7c0   : > { %v4079_v62 = vmul.f32 %v4047_v31, %v9659_v4  ;;  %v3928_v59 = vadd.f32 %v3896_v50, %v9724_v61  ;;  %v9761_v26 = vadd.f32 %v3806_v10, %v3788_v25  ;;  %v6804_v4 = vld [vmem:[%s8116_s30 + $0x208] sm:$0xf0]  ;;  %v7434_v28 = vld [vmem:[%s8116_s30 + $0x374] sm:$0xf]  ;;  %5139 = vmatpush.bf16.msrb.mxu1 %v6887_v20  ;;  %v6879_v25 = vor.u32 %v7406_v14, %v6876_v54  ;;  %v6988_v22 = vld [vmem:[%s8116_s30 + $0x378] sm:$0xf0] }
 0x7c1   : > { %v3935_v0 = vadd.f32 %v3903_v35, %v9730_v29  ;;  %5101 = vmatpush.bf16.msra.mxu3 %v6759_v9  ;;  %v6807_v27 = vor.u32 %v7388_v44, %v6804_v4  ;;  %v7372_v52 = vld [vmem:[%s8116_s30 + $0x184] sm:$0xf]  ;;  %v6991_v35 = vor.u32 %v7434_v28, %v6988_v22  ;;  %v6740_v10 = vld [vmem:[%s8116_s30 + $0x188] sm:$0xf0]  ;;  %v7430_v4 = vld [vmem:[%s8116_s30 + $0x354] sm:$0xf] }
 0x7c2   : > { %v7682_v51 = vpop.eup %7681  ;;  %v9770_v41 = vpack.c.bf16 %v4079_v62, %v4071_v32  ;;  %v3960_v34 = vmul.f32 0.7978846, %v3928_v59  ;;  %v3840_v38 = vmul.f32 %v9761_v26, %v9761_v26  ;;  %5084 = vmatpush.bf16.msra.mxu2 %v6679_v16  ;;  %v7404_v5 = vld [vmem:[%s8116_s30 + $0x284] sm:$0xf]  ;;  %v6868_v36 = vld [vmem:[%s8116_s30 + $0x288] sm:$0xf0]  ;;  %v6743_v6 = vor.u32 %v7372_v52, %v6740_v10 }
 0x7c3   : > { %v4016_v2 = vadd.f32 1.0, %v7682_v51  ;;  %v3967_v63 = vmul.f32 0.7978846, %v3935_v0  ;;  %v7684_v31 = vpop.eup %7683  ;;  %5122 = vmatpush.bf16.msrb.mxu0 %v6807_v27  ;;  %v7432_v62 = vld [vmem:[%s8116_s30 + $0x364] sm:$0xf]  ;;  %v6871_v9 = vor.u32 %v7404_v5, %v6868_v36 }
 0x7c4   : > { %v3872_v33 = vmul.f32 %v3840_v38, %v9761_v26  ;;  %5009 = vmatmul.bf16.vlgmr.msrb.gmra.mxu2 %v9770_v41  ;;  %5047 = vmatmul.bf16.vlgmr.msra.gmra.mxu0 %v9307_v3  ;;  %v4072_v3 = vmul.f32 %v9748_v56, %v9651_v47  ;;  %v4023_v39 = vadd.f32 1.0, %v7684_v31  ;;  %v6980_v42 = vld [vmem:[%s8116_s30 + $0x368] sm:$0xf0]  ;;  %v7450_v56 = vld [vmem:[%s8116_s30 + $0x3f4] sm:$0xf] }
 0x7c5   : > { %v4048_v50 = vmul.f32 0.5, %v4016_v2  ;;  %7685 = vtanh.f32 %v3967_v63  ;;  %5102 = vmatpush.bf16.msra.mxu3 %v6751_v46  ;;  %5140 = vmatpush.bf16.msrb.mxu1 %v6879_v25  ;;  %v6983_v47 = vor.u32 %v7432_v62, %v6980_v42  ;;  %v6972_v51 = vld [vmem:[%s8116_s30 + $0x358] sm:$0xf0]  ;;  %v7448_v12 = vld [vmem:[%s8116_s30 + $0x3e4] sm:$0xf] }
 0x7c6   : > { %7687 = vtanh.f32 %v3960_v34  ;;  %v3904_v32 = vmul.f32 0.044715, %v3872_v33  ;;  %5153 = vmatpush.bf16.msrb.mxu2 %v6991_v35  ;;  %v4055_v16 = vmul.f32 0.5, %v4023_v39  ;;  %v6975_v37 = vor.u32 %v7430_v4, %v6972_v51  ;;  %v7044_v2 = vld [vmem:[%s8116_s30 + $0x3e8] sm:$0xf0] }
 0x7c7   : > { %v4080_v17 = vmul.f32 %v4048_v50, %v9686_v49  ;;  %v7052_v49 = vld [vmem:[%s8116_s30 + $0x3f8] sm:$0xf0]  ;;  %v7047_v63 = vor.u32 %v7448_v12, %v7044_v2  ;;  %v7428_v46 = vld [vmem:[%s8116_s30 + $0x344] sm:$0xf]  ;;  %v6964_v14 = vld [vmem:[%s8116_s30 + $0x348] sm:$0xf0] }
 0x7c8   : > { %v3936_v59 = vadd.f32 %v3904_v32, %v9761_v26  ;;  %v7055_v23 = vor.u32 %v7450_v56, %v7052_v49  ;;  %v4087_v33 = vmul.f32 %v4055_v16, %v9693_v7  ;;  %v6967_v28 = vor.u32 %v7428_v46, %v6964_v14  ;;  %v7446_v31 = vld [vmem:[%s8116_s30 + $0x3d4] sm:$0xf]  ;;  %v7036_v50 = vld [vmem:[%s8116_s30 + $0x3d8] sm:$0xf0]  ;;  %v7028_v5 = vld [vmem:[%s8116_s30 + $0x3c8] sm:$0xf0] }
 0x7c9   : > { %v9793_v0 = vpack.c.bf16 %v4080_v17, %v4072_v3  ;;  %5103 = vmatpush.bf16.msra.mxu3 %v6743_v6  ;;  %5141 = vmatpush.bf16.msrb.mxu1 %v6871_v9  ;;  %v7039_v52 = vor.u32 %v7446_v31, %v7036_v50  ;;  %v7426_v10 = vld [vmem:[%s8116_s30 + $0x334] sm:$0xf]  ;;  %v6956_v3 = vld [vmem:[%s8116_s30 + $0x338] sm:$0xf0]  ;;  %v7444_v17 = vld [vmem:[%s8116_s30 + $0x3c4] sm:$0xf] }
 0x7ca   : > { %v3968_v20 = vmul.f32 0.7978846, %v3936_v59  ;;  %5154 = vmatpush.bf16.msrb.mxu2 %v6983_v47  ;;  %v7031_v36 = vor.u32 %v7444_v17, %v7028_v5  ;;  %v7424_v39 = vld [vmem:[%s8116_s30 + $0x324] sm:$0xf]  ;;  %v6948_v6 = vld [vmem:[%s8116_s30 + $0x328] sm:$0xf0] }
 0x7cb   : > { %v7686_v44 = vpop.eup %7685  ;;  %5028 = vmatmul.bf16.vlgmr.msrb.gmra.mxu3 %v9793_v0  ;;  %5066 = vmatmul.bf16.vlgmr.msra.gmra.mxu1 %v9309_v45  ;;  %v6951_v42 = vor.u32 %v7424_v39, %v6948_v6  ;;  %v7442_v9 = vld [vmem:[%s8116_s30 + $0x3b4] sm:$0xf]  ;;  %v7020_v47 = vld [vmem:[%s8116_s30 + $0x3b8] sm:$0xf0]  ;;  %v7420_v4 = vld [vmem:[%s8116_s30 + $0x304] sm:$0xf] }
 0x7cc   : > { %v7688_v34 = vpop.eup %7687  ;;  %7689 = vtanh.f32 %v3968_v20  ;;  %v4031_v38 = vadd.f32 1.0, %v7686_v44  ;;  %v7023_v56 = vor.u32 %v7442_v9, %v7020_v47  ;;  %v7440_v20 = vld [vmem:[%s8116_s30 + $0x3a4] sm:$0xf]  ;;  %v6932_v51 = vld [vmem:[%s8116_s30 + $0x308] sm:$0xf0] }
 0x7cd   : > { %5172 = vmatpush.bf16.msrb.mxu3 %v7055_v23  ;;  %v4024_v45 = vadd.f32 1.0, %v7688_v34  ;;  %v7012_v23 = vld [vmem:[%s8116_s30 + $0x3a8] sm:$0xf0]  ;;  %v6935_v34 = vor.u32 %v7420_v4, %v6932_v51  ;;  %v7004_v16 = vld [vmem:[%s8116_s30 + $0x398] sm:$0xf0] }
 0x7ce   : > { %v4063_v27 = vmul.f32 0.5, %v4031_v38  ;;  %5155 = vmatpush.bf16.msrb.mxu2 %v6975_v37  ;;  %v7015_v44 = vor.u32 %v7440_v20, %v7012_v23  ;;  %v7438_v38 = vld [vmem:[%s8116_s30 + $0x394] sm:$0xf]  ;;  %v6996_v12 = vld [vmem:[%s8116_s30 + $0x388] sm:$0xf0] }
 0x7cf   : > { %v4056_v35 = vmul.f32 0.5, %v4024_v45  ;;  %v7007_v37 = vor.u32 %v7438_v38, %v7004_v16 }
 0x7d0   : > { %v4095_v54 = vmul.f32 %v4063_v27, %v9730_v29  ;;  %v6959_v29 = vor.u32 %v7426_v10, %v6956_v3 }
 0x7d1   : > { %5173 = vmatpush.bf16.msrb.mxu3 %v7047_v63  ;;  %v4088_v62 = vmul.f32 %v4056_v35, %v9724_v61  ;;  %v7422_v61 = vld [vmem:[%s8116_s30 + $0x314] sm:$0xf] }
 0x7d2   : > { %v7690_v25 = vpop.eup %7689  ;;  %v4111_v22 = vpack.c.bf16 %v4095_v54, %v4087_v33  ;;  %5156 = vmatpush.bf16.msrb.mxu2 %v6967_v28 }
 0x7d3   : > { %v4032_v32 = vadd.f32 1.0, %v7690_v25 }
 0x7d4   : > { %5014 = vmatmul.bf16.gmra.mxu2 %v4111_v22  ;;  %5052 = vmatmul.bf16.gmra.mxu0 %v9424_v60 }
 0x7d5   : > { %v4064_v7 = vmul.f32 0.5, %v4032_v32  ;;  %5174 = vmatpush.bf16.msrb.mxu3 %v7039_v52 }
 0x7d6   : > { %5157 = vmatpush.bf16.msrb.mxu2 %v6959_v29 }
 0x7d7   : > { %v4096_v59 = vmul.f32 %v4064_v7, %v9761_v26  ;;  %v6940_v26 = vld [vmem:[%s8116_s30 + $0x318] sm:$0xf0] }
 0x7d8   : > { %v6943_v49 = vor.u32 %v7422_v61, %v6940_v26 }
 0x7d9   : > { %v4112_v60 = vpack.c.bf16 %v4096_v59, %v4088_v62  ;;  %5175 = vmatpush.bf16.msrb.mxu3 %v7031_v36 }
 0x7da   : > { %5158 = vmatpush.bf16.msrb.mxu2 %v6951_v42 }
 0x7db   : > { %5033 = vmatmul.bf16.gmra.mxu3 %v4112_v60  ;;  %5071 = vmatmul.bf16.gmra.mxu1 %v9447_v48  ;;  %v7436_v48 = vld [vmem:[%s8116_s30 + $0x384] sm:$0xf] }
 0x7dc   : > { %v6999_v2 = vor.u32 %v7436_v48, %v6996_v12 }
 0x7dd   : > { %5176 = vmatpush.bf16.msrb.mxu3 %v7023_v56 }
 0x7de   : > { %5159 = vmatpush.bf16.msrb.mxu2 %v6943_v49 }
 0x7e1   : > { %5177 = vmatpush.bf16.msrb.mxu3 %v7015_v44 }
 0x7e2   : > { %5160 = vmatpush.bf16.msrb.mxu2 %v6935_v34 }
 0x7e4   : > { %5085 = vmatmul.bf16.vlgmr.msra.gmra.mxu2 %v9482_v30  ;;  %5123 = vmatmul.bf16.vlgmr.msrb.gmra.mxu0 %v9626_v55  ;;  %v4896_v30 = vpop.f32.mrf.mxu0  ;;  %v4915_v55 = vpop.f32.mrf.mxu1 }
 0x7e5   : > { %5178 = vmatpush.bf16.msrb.mxu3 %v7007_v37 }
 0x7e9   : > { %5179 = vmatpush.bf16.msrb.mxu3 %v6999_v2 }
 0x7eb   : > { %5104 = vmatmul.bf16.vlgmr.msra.gmra.mxu3 %v9508_v13  ;;  %5142 = vmatmul.bf16.vlgmr.msrb.gmra.mxu1 %v9656_v11 }
 0x7ec   : > { %v4898_v63 = vpop.f32.mrf.mxu0  ;;  %v4917_v13 = vpop.f32.mrf.mxu1 }
 0x7f4   : > { %5090 = vmatmul.bf16.gmra.mxu2 %v9554_v8  ;;  %5128 = vmatmul.bf16.gmra.mxu0 %v9701_v58  ;;  %v4901_v11 = vpop.f32.mrf.mxu0 }
 0x7f8   : > { %v4920_v8 = vpop.f32.mrf.mxu1 }
 0x7fb   : > { %5109 = vmatmul.bf16.gmra.mxu3 %v9585_v15  ;;  %5147 = vmatmul.bf16.gmra.mxu1 %v9732_v43 }
 0x7fc   : > { %v4903_v45 = vpop.f32.mrf.mxu0 }
 0x800   : > { %v4922_v15 = vpop.f32.mrf.mxu1 }
 0x804   : > { %5161 = vmatmul.bf16.vlgmr.msrb.gmra.mxu2 %v9770_v41 }
 0x807   : > { %v4934_v27 = vpop.f32.mrf.mxu2 }
 0x80b   : > { %5180 = vmatmul.bf16.vlgmr.msrb.gmra.mxu3 %v9793_v0  ;;  %v9846_v0 = vld [vmem:[%s726_s25] sm:$0x3] }
 0x80c   : > { %v4243_v28 = vperm.slane %v9846_v0, 0 }
 0x80e   : > { %v4953_v58 = vpop.f32.mrf.mxu3  ;;  %v4897_v25 = vadd.f32 %v4896_v30, %v4243_v28  ;;  %v4899_v3 = vadd.f32 %v4898_v63, %v4243_v28  ;;  %v4902_v56 = vadd.f32 %v4901_v11, %v4243_v28  ;;  %v4904_v48 = vadd.f32 %v4903_v45, %v4243_v28 }
 0x80f   : > { %v4936_v46 = vpop.f32.mrf.mxu2 }
 0x810   : > { %v4916_v52 = vadd.f32 %v4915_v55, %v4897_v25  ;;  %v4918_v36 = vadd.f32 %v4917_v13, %v4899_v3  ;;  %v4921_v20 = vadd.f32 %v4920_v8, %v4902_v56  ;;  %v4923_v30 = vadd.f32 %v4922_v15, %v4904_v48 }
 0x812   : > { %v4935_v35 = vadd.f32 %v4934_v27, %v4916_v52  ;;  %v4937_v59 = vadd.f32 %v4936_v46, %v4918_v36 }
 0x814   : > { %5166 = vmatmul.bf16.gmra.mxu2 %v4111_v22  ;;  %v4954_v7 = vadd.f32 %v4953_v58, %v4935_v35  ;;  %v4244_v35 = vperm.slane %v9846_v0, 1 }
 0x816   : > { %v4955_v43 = vpop.f32.mrf.mxu3 }
 0x817   : > { %v4939_v41 = vpop.f32.mrf.mxu2  ;;  %v4956_v42 = vadd.f32 %v4955_v43, %v4937_v59 }
 0x818   : > { %v4940_v44 = vadd.f32 %v4939_v41, %v4921_v20 }
 0x81b   : > { %5185 = vmatmul.bf16.gmra.mxu3 %v4112_v60 }
 0x81e   : > { %v4958_v31 = vpop.f32.mrf.mxu3 }
 0x81f   : > { %v4941_v22 = vpop.f32.mrf.mxu2  ;;  %v4959_v34 = vadd.f32 %v4958_v31, %v4940_v44 }
 0x820   : > { %v4942_v63 = vadd.f32 %v4941_v22, %v4923_v30 }
 0x821   : > { %v4972_v14 = vpop.f32.mrf.mxu0 }
 0x822   : > { %v4973_v5 = vadd.f32 %v4972_v14, %v4954_v7 }
 0x826   : > { %v4960_v10 = vpop.f32.mrf.mxu3 }
 0x827   : > { %v4961_v27 = vadd.f32 %v4960_v10, %v4942_v63 }
 0x828   : > { %v4991_v33 = vpop.f32.mrf.mxu1 }
 0x829   : > { %v4974_v54 = vpop.f32.mrf.mxu0  ;;  %v4992_v62 = vadd.f32 %v4991_v33, %v4973_v5 }
 0x82a   : > { %v4975_v61 = vadd.f32 %v4974_v54, %v4956_v42 }
 0x830   : > { %v4993_v50 = vpop.f32.mrf.mxu1 }
 0x831   : > { %v4977_v32 = vpop.f32.mrf.mxu0  ;;  %v4994_v23 = vadd.f32 %v4993_v50, %v4975_v61 }
 0x832   : > { %v4978_v12 = vadd.f32 %v4977_v32, %v4959_v34 }
 0x838   : > { %v4996_v17 = vpop.f32.mrf.mxu1 }
 0x839   : > { %v4979_v6 = vpop.f32.mrf.mxu0 }
 0x83a   : > { %v4980_v46 = vadd.f32 %v4979_v6, %v4961_v27 }
 0x840   : > { %v4998_v49 = vpop.f32.mrf.mxu1 }
 0x841   : > { %v5048_v37 = vpop.f32.mrf.mxu0  ;;  %v4999_v43 = vadd.f32 %v4998_v49, %v4980_v46 }
 0x842   : > { %v5049_v3 = vadd.f32 %v5048_v37, %v4244_v35 }
 0x847   : > { %v5010_v29 = vpop.f32.mrf.mxu2 }
 0x848   : > { %v5011_v39 = vadd.f32 %v5010_v29, %v4992_v62  ;;  %v5067_v55 = vpop.f32.mrf.mxu1 }
 0x849   : > { %v5050_v45 = vpop.f32.mrf.mxu0  ;;  %v5068_v29 = vadd.f32 %v5067_v55, %v5049_v3 }
 0x84a   : > { %v5051_v59 = vadd.f32 %v5050_v45, %v4244_v35 }
 0x84e   : > { %v5029_v60 = vpop.f32.mrf.mxu3 }
 0x84f   : > { %v5030_v9 = vadd.f32 %v5029_v60, %v5011_v39  ;;  %v5012_v47 = vpop.f32.mrf.mxu2 }
 0x850   : > { %v5013_v4 = vadd.f32 %v5012_v47, %v4994_v23  ;;  %v5069_v15 = vpop.f32.mrf.mxu1 }
 0x851   : > { %v9850_v26 = vadd.f32 %v5030_v9, %v8814_v24  ;;  %v4997_v24 = vadd.f32 %v4996_v17, %v4978_v12  ;;  %v5053_v31 = vpop.f32.mrf.mxu0  ;;  %v5070_v6 = vadd.f32 %v5069_v15, %v5051_v59 }
 0x852   : > { %v5054_v49 = vadd.f32 %v5053_v31, %v4244_v35 }
 0x853   : > { %5199 = vst [vmem:[#allocation2 + $0x30] sm:$0xff] %v9850_v26 }
 0x856   : > { %v5031_v51 = vpop.f32.mrf.mxu3 }
 0x857   : > { %v5032_v38 = vadd.f32 %v5031_v51, %v5013_v4  ;;  %v5015_v16 = vpop.f32.mrf.mxu2 }
 0x858   : > { %v5016_v13 = vadd.f32 %v5015_v16, %v4997_v24  ;;  %v5072_v22 = vpop.f32.mrf.mxu1 }
 0x859   : > { %v9854_v2 = vadd.f32 %v5032_v38, %v8820_v19  ;;  %v5073_v44 = vadd.f32 %v5072_v22, %v5054_v49 }
 0x85b   : > { %5201 = vst [vmem:[#allocation2 + $0x18] sm:$0xff] %v9854_v2 }
 0x85e   : > { %v5034_v11 = vpop.f32.mrf.mxu3 }
 0x85f   : > { %v5035_v8 = vadd.f32 %v5034_v11, %v5016_v13  ;;  %v5017_v58 = vpop.f32.mrf.mxu2 }
 0x860   : > { %v5018_v19 = vadd.f32 %v5017_v58, %v4999_v43  ;;  %v5074_v10 = vpop.f32.mrf.mxu1 }
 0x861   : > { %v9858_v14 = vadd.f32 %v5035_v8, %v8826_v18  ;;  %v5055_v18 = vpop.f32.mrf.mxu0 }
 0x862   : > { %v5056_v30 = vadd.f32 %v5055_v18, %v4244_v35 }
 0x863   : > { %5203 = vst [vmem:[#allocation2 + $0x8] sm:$0xff] %v9858_v14 }
 0x864   : > { %v5075_v63 = vadd.f32 %v5074_v10, %v5056_v30 }
 0x866   : > { %v5036_v33 = vpop.f32.mrf.mxu3 }
 0x867   : > { %v5037_v41 = vadd.f32 %v5036_v33, %v5018_v19  ;;  %v5086_v54 = vpop.f32.mrf.mxu2 }
 0x868   : > { %v5087_v36 = vadd.f32 %v5086_v54, %v5068_v29  ;;  %v5143_v62 = vpop.f32.mrf.mxu1 }
 0x869   : > { %v9862_v28 = vadd.f32 %v5037_v41, %v8832_v53  ;;  %v5124_v5 = vpop.f32.mrf.mxu0 }
 0x86b   : > { %5205 = vst [vmem:[#allocation2 + $0x28] sm:$0xff] %v9862_v28 }
 0x86e   : > { %v5105_v50 = vpop.f32.mrf.mxu3 }
 0x86f   : > { %v5088_v25 = vpop.f32.mrf.mxu2  ;;  %v5106_v53 = vadd.f32 %v5105_v50, %v5087_v36 }
 0x870   : > { %v5089_v9 = vadd.f32 %v5088_v25, %v5070_v6  ;;  %v5145_v20 = vpop.f32.mrf.mxu1 }
 0x871   : > { %v5125_v60 = vadd.f32 %v5124_v5, %v5106_v53  ;;  %v5126_v47 = vpop.f32.mrf.mxu0 }
 0x873   : > { %v5144_v61 = vadd.f32 %v5143_v62, %v5125_v60 }
 0x876   : > { %v5107_v52 = vpop.f32.mrf.mxu3 }
 0x877   : > { %v5091_v32 = vpop.f32.mrf.mxu2  ;;  %v5108_v56 = vadd.f32 %v5107_v52, %v5089_v9 }
 0x878   : > { %v5092_v38 = vadd.f32 %v5091_v32, %v5073_v44  ;;  %v5148_v27 = vpop.f32.mrf.mxu1 }
 0x879   : > { %v5127_v4 = vadd.f32 %v5126_v47, %v5108_v56  ;;  %v5129_v12 = vpop.f32.mrf.mxu0 }
 0x87b   : > { %v5146_v48 = vadd.f32 %v5145_v20, %v5127_v4 }
 0x87e   : > { %v5110_v7 = vpop.f32.mrf.mxu3 }
 0x87f   : > { %v5093_v17 = vpop.f32.mrf.mxu2  ;;  %v5111_v37 = vadd.f32 %v5110_v7, %v5092_v38 }
 0x880   : > { %v5094_v58 = vadd.f32 %v5093_v17, %v5075_v63  ;;  %v5150_v31 = vpop.f32.mrf.mxu1 }
 0x881   : > { %v5130_v13 = vadd.f32 %v5129_v12, %v5111_v37 }
 0x883   : > { %v5149_v43 = vadd.f32 %v5148_v27, %v5130_v13 }
 0x886   : > { %v5112_v39 = vpop.f32.mrf.mxu3 }
 0x887   : > { %v5162_v42 = vpop.f32.mrf.mxu2  ;;  %v5113_v45 = vadd.f32 %v5112_v39, %v5094_v58 }
 0x888   : > { %v5163_v0 = vadd.f32 %v5162_v42, %v5144_v61 }
 0x88e   : > { %v5181_v23 = vpop.f32.mrf.mxu3 }
 0x88f   : > { %v5182_v51 = vadd.f32 %v5181_v23, %v5163_v0  ;;  %v5164_v34 = vpop.f32.mrf.mxu2 }
 0x890   : > { %v5165_v24 = vadd.f32 %v5164_v34, %v5146_v48 }
 0x891   : > { %v5192_v16 = vadd.f32 %v5182_v51, %v8816_v21  ;;  %v5131_v21 = vpop.f32.mrf.mxu0 }
 0x892   : > { %v5132_v33 = vadd.f32 %v5131_v21, %v5113_v45 }
 0x893   : > { %5200 = vst [vmem:[#allocation2] sm:$0xff] %v5192_v16 }
 0x894   : > { %v5151_v25 = vadd.f32 %v5150_v31, %v5132_v33 }
 0x896   : > { %v5183_v55 = vpop.f32.mrf.mxu3 }
 0x897   : > { %v5184_v11 = vadd.f32 %v5183_v55, %v5165_v24  ;;  %v5167_v8 = vpop.f32.mrf.mxu2 }
 0x898   : > { %v5168_v19 = vadd.f32 %v5167_v8, %v5149_v43 }
 0x899   : > { %v5194_v46 = vadd.f32 %v5184_v11, %v8822_v40 }
 0x89b   : > { %5202 = vst [vmem:[#allocation2 + $0x10] sm:$0xff] %v5194_v46 }
 0x89e   : > { %v5186_v15 = vpop.f32.mrf.mxu3 }
 0x89f   : > { %v5187_v41 = vadd.f32 %v5186_v15, %v5168_v19  ;;  %v5169_v50 = vpop.f32.mrf.mxu2 }
 0x8a0   : > { %v5170_v22 = vadd.f32 %v5169_v50, %v5151_v25 }
 0x8a1   : > { %v5196_v54 = vadd.f32 %v5187_v41, %v8828_v57 }
 0x8a3   : > { %5204 = vst [vmem:[#allocation2 + $0x20] sm:$0xff] %v5196_v54 }
 0x8a6   : > { %v5188_v18 = vpop.f32.mrf.mxu3 }
 0x8a7   : > { %v5189_v52 = vadd.f32 %v5188_v18, %v5170_v22  ;;  %5210 = sbr.rel (%p7056_p3) target bundleno = 2228 (0x8b4), region = 92 }
 0x8a9   : > { %v5198_v32 = vadd.f32 %v5189_v52, %v8834_v1 }
 0x8ab   : > { %5206 = vst [vmem:[#allocation2 + $0x38] sm:$0xff] %v5198_v32 }
 0x8ac   : > { %5211 = vst [vmem:[%s8114_s6] sm:$0xff] %v9850_v26 }
 0x8ad   : > { %5212 = vst [vmem:[%s8114_s6 + $0x8] sm:$0xff] %v5192_v16 }
 0x8ae   : > { %5213 = vst [vmem:[%s8114_s6 + $0x10] sm:$0xff] %v9854_v2 }
 0x8af   : > { %5214 = vst [vmem:[%s8114_s6 + $0x18] sm:$0xff] %v5194_v46 }
 0x8b0   : > { %5215 = vst [vmem:[%s8114_s6 + $0x20] sm:$0xff] %v9858_v14 }
 0x8b1   : > { %5216 = vst [vmem:[%s8114_s6 + $0x28] sm:$0xff] %v5196_v54 }
 0x8b2   : > { %5217 = vst [vmem:[%s8114_s6 + $0x30] sm:$0xff] %v9862_v28 }
 0x8b3   : > { %5218 = vst [vmem:[%s8114_s6 + $0x38] sm:$0xff] %v5198_v32 }
 0x8b4 PF: > { %s9981_s28 = sld [smem:[#allocation15_spill]] }
 0x8b5   : > { %s9982_s25 = sld [smem:[#allocation11_spill]] }
 0x8b6   : > { %s9983_s26 = sld [smem:[#allocation12_spill]] }
 0x8b7   : > { %s9984_s27 = sld [smem:[#allocation18_spill]] }
 0x8b8   : > { %s9986_s29 = sld [smem:[#allocation14_spill]] }
 0x8b9   : > { %s9987_s30 = sld [smem:[#allocation16_spill]] }
 0x8ba   : > { %s29_s15 = sadd.s32 1, %s9981_s28   ;;  %s9985_s28 = sld [smem:[#allocation13_spill]] }
 0x8bb   : > { %p26_p4 = scmp.ge.s32.totalorder %s29_s15, 6   ;;  %s9988_s14 = sld [smem:[#allocation17_spill]] }
 0x8bd   :  { %28 = sbr.rel (!%p26_p4) target bundleno = 20 (0x14), region = 174 }
 0x8c2   :  { %5240 = vsyncpa [#allocation5], 1 }
 0x8c3   :  { %5242 = vsyncpa [#allocation5 + $0x1], 1 }
 0x8c4   :  { %5243 = vsyncpa [#allocation7], 1 }
 0x8c5   :  { %5245 = vsyncpa [#allocation7 + $0x1], 1 }

</bundles_post_ra>
